<compile_context>
chip_gen: v6e
topology: v6e:2x2x1
jax: 0.10.0
libtpu: 0.0.40
codegen_flags: <defaults>
</compile_context>

<pallas_src>
import functools

import numpy as np

import jax
import jax.numpy as jnp
from jax import lax
from jax.experimental import pallas as pl
from jax.experimental.pallas import tpu as pltpu

OUTPUT_CLASS = 10
TB_DEFAULT = 128          # batch tile (keeps >=2 grid steps for big batches)


# ----------------------------- Pallas kernel -------------------------------

def fused_forward_kernel(x_ref, w1q_ref, b1_ref, w2q_ref, b2_ref,
                         fw1_ref, fb1_ref, fw2_ref, fb2_ref,
                         fw3_ref, fb3_ref, o_ref):
    """conv1+pool1 -> conv2+pool2 -> fc1+ReLU -> fc2+ReLU -> fc3, one tile."""
    f32 = jnp.float32
    bf16 = jnp.bfloat16
    x = x_ref[...]                                            # (TB, 784) bf16

    # Conv2d(1,4,5) + MaxPool2d(2): 4 quadrant Toeplitz matmuls + VPU max.
    q00 = jnp.dot(x, w1q_ref[0], preferred_element_type=f32)
    q01 = jnp.dot(x, w1q_ref[1], preferred_element_type=f32)
    q10 = jnp.dot(x, w1q_ref[2], preferred_element_type=f32)
    q11 = jnp.dot(x, w1q_ref[3], preferred_element_type=f32)
    y1 = jnp.maximum(jnp.maximum(q00, q01), jnp.maximum(q10, q11)) + b1_ref[...]
    # TODO(synk): Dropout2d(0.2) is eval-mode identity here.
    y1 = y1.astype(bf16)                                      # (TB, 576)

    # Conv2d(4,16,5) + MaxPool2d(2): same trick; columns already in PyTorch
    # Flatten(1,3) order (co*16 + ih*4 + iw) so the result feeds fc1 directly.
    p00 = jnp.dot(y1, w2q_ref[0], preferred_element_type=f32)
    p01 = jnp.dot(y1, w2q_ref[1], preferred_element_type=f32)
    p10 = jnp.dot(y1, w2q_ref[2], preferred_element_type=f32)
    p11 = jnp.dot(y1, w2q_ref[3], preferred_element_type=f32)
    feat = jnp.maximum(jnp.maximum(p00, p01), jnp.maximum(p10, p11)) + b2_ref[...]

    # Fused MLP (all weights resident in VMEM).
    h = jnp.dot(feat.astype(bf16), fw1_ref[...],
                preferred_element_type=f32) + fb1_ref[...]
    h = jnp.maximum(h, 0.0)
    h = jnp.dot(h.astype(bf16), fw2_ref[...],
                preferred_element_type=f32) + fb2_ref[...]
    h = jnp.maximum(h, 0.0)
    # fc3 padded to 128 output columns -> lane-dense unmasked store.
    o_ref[...] = jnp.dot(h.astype(bf16), fw3_ref[...],
                         preferred_element_type=f32) + fb3_ref[...]


# ------------------------- parameter preparation ---------------------------

def init_params(key):
    """PyTorch-style (uniform +/- 1/sqrt(fan_in)) init, PyTorch layouts."""
    ks = jax.random.split(key, 10)

    def u(k, shape, fan_in):
        bound = 1.0 / float(np.sqrt(fan_in))
        return jax.random.uniform(k, shape, jnp.float32, -bound, bound)

    p = {}
    p["conv1_w"] = u(ks[0], (4, 1, 5, 5), 25)
    p["conv1_b"] = u(ks[1], (4,), 25)
    p["conv2_w"] = u(ks[2], (16, 4, 5, 5), 100)
    p["conv2_b"] = u(ks[3], (16,), 100)
    p["fc1_w"] = u(ks[4], (128, 256), 256)
    p["fc1_b"] = u(ks[5], (128,), 256)
    p["fc2_w"] = u(ks[6], (64, 128), 128)
    p["fc2_b"] = u(ks[7], (64,), 128)
    p["fc3_w"] = u(ks[8], (OUTPUT_CLASS, 64), 64)
    p["fc3_b"] = u(ks[9], (OUTPUT_CLASS,), 64)
    return p


def prepare_params(params):
    """One-time weight preprocessing (outside the jitted forward).

    Builds, per conv stage, 4 dense Toeplitz matrices (one per max-pool
    quadrant) that map flattened inputs directly to the pooled-resolution
    conv output, plus tiled biases and pre-transposed / padded fc weights.
    """
    w1 = np.asarray(params["conv1_w"], np.float32)      # (4, 1, 5, 5)
    b1 = np.asarray(params["conv1_b"], np.float32)
    w2 = np.asarray(params["conv2_w"], np.float32)      # (16, 4, 5, 5)
    b2 = np.asarray(params["conv2_b"], np.float32)

    quadrants = [(0, 0), (0, 1), (1, 0), (1, 1)]

    # Stage 1: x_flat (784,) -> pooled conv1 (576,), col = ip*48 + jp*4 + c.
    w1q = np.zeros((4, 784, 576), np.float32)
    ip = np.arange(12).reshape(12, 1, 1, 1, 1)
    jp = np.arange(12).reshape(1, 12, 1, 1, 1)
    c = np.arange(4).reshape(1, 1, 4, 1, 1)
    kh = np.arange(5).reshape(1, 1, 1, 5, 1)
    kw = np.arange(5).reshape(1, 1, 1, 1, 5)
    shape1 = (12, 12, 4, 5, 5)
    cols1 = np.broadcast_to(ip * 48 + jp * 4 + c, shape1).ravel()
    vals1 = np.broadcast_to(w1[c, 0, kh, kw], shape1).ravel()
    for p, (pi, pj) in enumerate(quadrants):
        rows = np.broadcast_to((2 * ip + pi + kh) * 28 + (2 * jp + pj + kw),
                               shape1).ravel()
        np.add.at(w1q[p], (rows, cols1), vals1)
    b1t = np.tile(b1, 144).reshape(1, 576)

    # Stage 2: pooled conv1 (576,) -> pooled conv2 (256,), col in PyTorch
    # Flatten(1,3) order: co*16 + ip*4 + jp.
    w2q = np.zeros((4, 576, 256), np.float32)
    ip = np.arange(4).reshape(4, 1, 1, 1, 1, 1)
    jp = np.arange(4).reshape(1, 4, 1, 1, 1, 1)
    co = np.arange(16).reshape(1, 1, 16, 1, 1, 1)
    ci = np.arange(4).reshape(1, 1, 1, 4, 1, 1)
    kh = np.arange(5).reshape(1, 1, 1, 1, 5, 1)
    kw = np.arange(5).reshape(1, 1, 1, 1, 1, 5)
    shape2 = (4, 4, 16, 4, 5, 5)
    cols2 = np.broadcast_to(co * 16 + ip * 4 + jp, shape2).ravel()
    vals2 = np.broadcast_to(w2[co, ci, kh, kw], shape2).ravel()
    for p, (pi, pj) in enumerate(quadrants):
        rows = np.broadcast_to((2 * ip + pi + kh) * 48 + (2 * jp + pj + kw) * 4 + ci,
                               shape2).ravel()
        np.add.at(w2q[p], (rows, cols2), vals2)
    b2t = np.repeat(b2, 16).reshape(1, 256)

    # FC weights: pre-transpose once; pad fc3 to 128 lanes for dense stores.
    fw1 = np.ascontiguousarray(np.asarray(params["fc1_w"], np.float32).T)   # (256,128)
    fw2 = np.ascontiguousarray(np.asarray(params["fc2_w"], np.float32).T)   # (128,64)
    fw3 = np.zeros((64, 128), np.float32)
    fw3[:, :OUTPUT_CLASS] = np.asarray(params["fc3_w"], np.float32).T
    fb3 = np.zeros((1, 128), np.float32)
    fb3[0, :OUTPUT_CLASS] = np.asarray(params["fc3_b"], np.float32)

    return {
        # bf16 matmul operands (accumulation stays f32 in the kernel)
        "W1q": jnp.asarray(w1q, jnp.bfloat16),
        "W2q": jnp.asarray(w2q, jnp.bfloat16),
        "FW1": jnp.asarray(fw1, jnp.bfloat16),
        "FW2": jnp.asarray(fw2, jnp.bfloat16),
        "FW3": jnp.asarray(fw3, jnp.bfloat16),
        # f32 epilogue constants
        "b1t": jnp.asarray(b1t, jnp.float32),
        "b2t": jnp.asarray(b2t, jnp.float32),
        "fb1": jnp.asarray(np.asarray(params["fc1_b"]).reshape(1, 128), jnp.float32),
        "fb2": jnp.asarray(np.asarray(params["fc2_b"]).reshape(1, 64), jnp.float32),
        "fb3": jnp.asarray(fb3, jnp.float32),
    }


# ------------------------------- forward -----------------------------------

def _round_up(x, m):
    return ((x + m - 1) // m) * m


def sample_net_forward(prep, x_nchw):
    """x_nchw: (N, 1, 28, 28) float32, PyTorch NCHW convention."""
    n = x_nchw.shape[0]
    x = x_nchw.reshape(n, 28 * 28).astype(jnp.bfloat16)       # (N, 784)
    tb = min(TB_DEFAULT, _round_up(n, 8))
    npad = _round_up(n, tb)
    if npad != n:
        x = jnp.pad(x, ((0, npad - n), (0, 0)))

    out = pl.pallas_call(
        fused_forward_kernel,
        out_shape=jax.ShapeDtypeStruct((npad, 128), jnp.float32),
        grid=(npad // tb,),
        in_specs=[
            pl.BlockSpec((tb, 784), lambda t: (t, 0)),          # x tile
            pl.BlockSpec((4, 784, 576), lambda t: (0, 0, 0)),   # conv1+pool1
            pl.BlockSpec((1, 576), lambda t: (0, 0)),
            pl.BlockSpec((4, 576, 256), lambda t: (0, 0, 0)),   # conv2+pool2
            pl.BlockSpec((1, 256), lambda t: (0, 0)),
            pl.BlockSpec((256, 128), lambda t: (0, 0)),         # fc1
            pl.BlockSpec((1, 128), lambda t: (0, 0)),
            pl.BlockSpec((128, 64), lambda t: (0, 0)),          # fc2
            pl.BlockSpec((1, 64), lambda t: (0, 0)),
            pl.BlockSpec((64, 128), lambda t: (0, 0)),          # fc3 (padded)
            pl.BlockSpec((1, 128), lambda t: (0, 0)),
        ],
        out_specs=pl.BlockSpec((tb, 128), lambda t: (t, 0)),
        compiler_params=pltpu.CompilerParams(
            dimension_semantics=("parallel",),
            vmem_limit_bytes=48 * 1024 * 1024),
    )(x, prep["W1q"], prep["b1t"], prep["W2q"], prep["b2t"],
      prep["FW1"], prep["fb1"], prep["FW2"], prep["fb2"],
      prep["FW3"], prep["fb3"])

    return out[:n, :OUTPUT_CLASS]


# ------------------------- pure-JAX reference ------------------------------

def reference_forward(params, x_nchw):
    hp = lax.Precision.HIGHEST
    y = lax.conv_general_dilated(
        x_nchw, params["conv1_w"], (1, 1), "VALID",
        dimension_numbers=("NCHW", "OIHW", "NCHW"), precision=hp)
    y = y + params["conv1_b"][None, :, None, None]
    y = lax.reduce_window(y, -jnp.inf, lax.max, (1, 1, 2, 2), (1, 1, 2, 2), "VALID")
    y = lax.conv_general_dilated(
        y, params["conv2_w"], (1, 1), "VALID",
        dimension_numbers=("NCHW", "OIHW", "NCHW"), precision=hp)
    y = y + params["conv2_b"][None, :, None, None]
    y = lax.reduce_window(y, -jnp.inf, lax.max, (1, 1, 2, 2), (1, 1, 2, 2), "VALID")
    f = y.reshape(y.shape[0], -1)                              # Flatten(1,3)
    h = jnp.maximum(jnp.dot(f, params["fc1_w"].T, precision=hp) + params["fc1_b"], 0.0)
    h = jnp.maximum(jnp.dot(h, params["fc2_w"].T, precision=hp) + params["fc2_b"], 0.0)
    return jnp.dot(h, params["fc3_w"].T, precision=hp) + params["fc3_b"]


if __name__ == "__main__":
    key = jax.random.PRNGKey(0)
    xkey, pkey = jax.random.split(key)
    x = jax.random.normal(xkey, (2, 1, 28, 28), jnp.float32)

    params = init_params(pkey)
    prep = prepare_params(params)

    fwd = jax.jit(functools.partial(sample_net_forward, prep))
    out = fwd(x)
    jax.block_until_ready(out)
    assert out.shape == (2, OUTPUT_CLASS), out.shape

    ref = reference_forward(params, x)
    err = float(jnp.max(jnp.abs(out - ref)))
    assert err < 2e-2, f"max abs error vs reference: {err}"

    print("KERNEL_OK")
</pallas_src>

<mosaic_0001>
module attributes {stable_mosaic.version = 11 : i64} {
  func.func @fused_forward_kernel(%arg0: i32, %arg1: memref<8x784xbf16, #tpu.memory_space<vmem>>, %arg2: memref<4x784x576xbf16, #tpu.memory_space<vmem>>, %arg3: memref<1x576xf32, #tpu.memory_space<vmem>>, %arg4: memref<4x576x256xbf16, #tpu.memory_space<vmem>>, %arg5: memref<1x256xf32, #tpu.memory_space<vmem>>, %arg6: memref<256x128xbf16, #tpu.memory_space<vmem>>, %arg7: memref<1x128xf32, #tpu.memory_space<vmem>>, %arg8: memref<128x64xbf16, #tpu.memory_space<vmem>>, %arg9: memref<1x64xf32, #tpu.memory_space<vmem>>, %arg10: memref<64x128xbf16, #tpu.memory_space<vmem>>, %arg11: memref<1x128xf32, #tpu.memory_space<vmem>>, %arg12: memref<8x128xf32, #tpu.memory_space<vmem>>) attributes {dimension_semantics = [#tpu.dimension_semantics<parallel>], iteration_bounds = array<i64: 1>, scalar_prefetch = 0 : i64, scratch_operands = 0 : i64, tpu.core_type = #tpu.core_type<tc>, window_params = [{transform_indices = @transform_0, window_bounds = array<i64: 8, 784>}, {pipeline_mode = #tpu.pipeline_mode<synchronous>, transform_indices = @transform_1, window_bounds = array<i64: 4, 784, 576>}, {pipeline_mode = #tpu.pipeline_mode<synchronous>, transform_indices = @transform_2, window_bounds = array<i64: 1, 576>}, {pipeline_mode = #tpu.pipeline_mode<synchronous>, transform_indices = @transform_3, window_bounds = array<i64: 4, 576, 256>}, {pipeline_mode = #tpu.pipeline_mode<synchronous>, transform_indices = @transform_4, window_bounds = array<i64: 1, 256>}, {pipeline_mode = #tpu.pipeline_mode<synchronous>, transform_indices = @transform_5, window_bounds = array<i64: 256, 128>}, {pipeline_mode = #tpu.pipeline_mode<synchronous>, transform_indices = @transform_6, window_bounds = array<i64: 1, 128>}, {pipeline_mode = #tpu.pipeline_mode<synchronous>, transform_indices = @transform_7, window_bounds = array<i64: 128, 64>}, {pipeline_mode = #tpu.pipeline_mode<synchronous>, transform_indices = @transform_8, window_bounds = array<i64: 1, 64>}, {pipeline_mode = #tpu.pipeline_mode<synchronous>, transform_indices = @transform_9, window_bounds = array<i64: 64, 128>}, {pipeline_mode = #tpu.pipeline_mode<synchronous>, transform_indices = @transform_10, window_bounds = array<i64: 1, 128>}, {transform_indices = @transform_11, window_bounds = array<i64: 8, 128>}]} {
    %c0 = arith.constant 0 : index
    %c0_0 = arith.constant 0 : index
    %0 = vector.load %arg1[%c0, %c0_0] : memref<8x784xbf16, #tpu.memory_space<vmem>>, vector<8x784xbf16>
    %c0_1 = arith.constant 0 : index
    %c0_2 = arith.constant 0 : index
    %c0_3 = arith.constant 0 : index
    %1 = vector.load %arg2[%c0_1, %c0_2, %c0_3] : memref<4x784x576xbf16, #tpu.memory_space<vmem>>, vector<1x784x576xbf16>
    %2 = vector.shape_cast %1 : vector<1x784x576xbf16> to vector<784x576xbf16>
    %cst = arith.constant dense<0.000000e+00> : vector<8x576xf32>
    %3 = tpu.matmul %0, %2, %cst {dimension_numbers = #tpu.dot_dimension_numbers<[1], [0], [0], [1], [0, 0, 1, 1], [], []>} : vector<8x784xbf16>, vector<784x576xbf16>, vector<8x576xf32> -> vector<8x576xf32>
    %c1 = arith.constant 1 : index
    %c0_4 = arith.constant 0 : index
    %c0_5 = arith.constant 0 : index
    %4 = vector.load %arg2[%c1, %c0_4, %c0_5] : memref<4x784x576xbf16, #tpu.memory_space<vmem>>, vector<1x784x576xbf16>
    %5 = vector.shape_cast %4 : vector<1x784x576xbf16> to vector<784x576xbf16>
    %cst_6 = arith.constant dense<0.000000e+00> : vector<8x576xf32>
    %6 = tpu.matmul %0, %5, %cst_6 {dimension_numbers = #tpu.dot_dimension_numbers<[1], [0], [0], [1], [0, 0, 1, 1], [], []>} : vector<8x784xbf16>, vector<784x576xbf16>, vector<8x576xf32> -> vector<8x576xf32>
    %c2 = arith.constant 2 : index
    %c0_7 = arith.constant 0 : index
    %c0_8 = arith.constant 0 : index
    %7 = vector.load %arg2[%c2, %c0_7, %c0_8] : memref<4x784x576xbf16, #tpu.memory_space<vmem>>, vector<1x784x576xbf16>
    %8 = vector.shape_cast %7 : vector<1x784x576xbf16> to vector<784x576xbf16>
    %cst_9 = arith.constant dense<0.000000e+00> : vector<8x576xf32>
    %9 = tpu.matmul %0, %8, %cst_9 {dimension_numbers = #tpu.dot_dimension_numbers<[1], [0], [0], [1], [0, 0, 1, 1], [], []>} : vector<8x784xbf16>, vector<784x576xbf16>, vector<8x576xf32> -> vector<8x576xf32>
    %c3 = arith.constant 3 : index
    %c0_10 = arith.constant 0 : index
    %c0_11 = arith.constant 0 : index
    %10 = vector.load %arg2[%c3, %c0_10, %c0_11] : memref<4x784x576xbf16, #tpu.memory_space<vmem>>, vector<1x784x576xbf16>
    %11 = vector.shape_cast %10 : vector<1x784x576xbf16> to vector<784x576xbf16>
    %cst_12 = arith.constant dense<0.000000e+00> : vector<8x576xf32>
    %12 = tpu.matmul %0, %11, %cst_12 {dimension_numbers = #tpu.dot_dimension_numbers<[1], [0], [0], [1], [0, 0, 1, 1], [], []>} : vector<8x784xbf16>, vector<784x576xbf16>, vector<8x576xf32> -> vector<8x576xf32>
    %13 = arith.maximumf %3, %6 : vector<8x576xf32>
    %14 = arith.maximumf %9, %12 : vector<8x576xf32>
    %15 = arith.maximumf %13, %14 : vector<8x576xf32>
    %c0_13 = arith.constant 0 : index
    %c0_14 = arith.constant 0 : index
    %16 = vector.load %arg3[%c0_13, %c0_14] : memref<1x576xf32, #tpu.memory_space<vmem>>, vector<1x576xf32>
    %17 = vector.broadcast %16 : vector<1x576xf32> to vector<8x576xf32>
    %18 = arith.addf %15, %17 : vector<8x576xf32>
    %19 = arith.truncf %18 : vector<8x576xf32> to vector<8x576xbf16>
    %c0_15 = arith.constant 0 : index
    %c0_16 = arith.constant 0 : index
    %c0_17 = arith.constant 0 : index
    %20 = vector.load %arg4[%c0_15, %c0_16, %c0_17] : memref<4x576x256xbf16, #tpu.memory_space<vmem>>, vector<1x576x256xbf16>
    %21 = vector.shape_cast %20 : vector<1x576x256xbf16> to vector<576x256xbf16>
    %cst_18 = arith.constant dense<0.000000e+00> : vector<8x256xf32>
    %22 = tpu.matmul %19, %21, %cst_18 {dimension_numbers = #tpu.dot_dimension_numbers<[1], [0], [0], [1], [0, 0, 1, 1], [], []>} : vector<8x576xbf16>, vector<576x256xbf16>, vector<8x256xf32> -> vector<8x256xf32>
    %c1_19 = arith.constant 1 : index
    %c0_20 = arith.constant 0 : index
    %c0_21 = arith.constant 0 : index
    %23 = vector.load %arg4[%c1_19, %c0_20, %c0_21] : memref<4x576x256xbf16, #tpu.memory_space<vmem>>, vector<1x576x256xbf16>
    %24 = vector.shape_cast %23 : vector<1x576x256xbf16> to vector<576x256xbf16>
    %cst_22 = arith.constant dense<0.000000e+00> : vector<8x256xf32>
    %25 = tpu.matmul %19, %24, %cst_22 {dimension_numbers = #tpu.dot_dimension_numbers<[1], [0], [0], [1], [0, 0, 1, 1], [], []>} : vector<8x576xbf16>, vector<576x256xbf16>, vector<8x256xf32> -> vector<8x256xf32>
    %c2_23 = arith.constant 2 : index
    %c0_24 = arith.constant 0 : index
    %c0_25 = arith.constant 0 : index
    %26 = vector.load %arg4[%c2_23, %c0_24, %c0_25] : memref<4x576x256xbf16, #tpu.memory_space<vmem>>, vector<1x576x256xbf16>
    %27 = vector.shape_cast %26 : vector<1x576x256xbf16> to vector<576x256xbf16>
    %cst_26 = arith.constant dense<0.000000e+00> : vector<8x256xf32>
    %28 = tpu.matmul %19, %27, %cst_26 {dimension_numbers = #tpu.dot_dimension_numbers<[1], [0], [0], [1], [0, 0, 1, 1], [], []>} : vector<8x576xbf16>, vector<576x256xbf16>, vector<8x256xf32> -> vector<8x256xf32>
    %c3_27 = arith.constant 3 : index
    %c0_28 = arith.constant 0 : index
    %c0_29 = arith.constant 0 : index
    %29 = vector.load %arg4[%c3_27, %c0_28, %c0_29] : memref<4x576x256xbf16, #tpu.memory_space<vmem>>, vector<1x576x256xbf16>
    %30 = vector.shape_cast %29 : vector<1x576x256xbf16> to vector<576x256xbf16>
    %cst_30 = arith.constant dense<0.000000e+00> : vector<8x256xf32>
    %31 = tpu.matmul %19, %30, %cst_30 {dimension_numbers = #tpu.dot_dimension_numbers<[1], [0], [0], [1], [0, 0, 1, 1], [], []>} : vector<8x576xbf16>, vector<576x256xbf16>, vector<8x256xf32> -> vector<8x256xf32>
    %32 = arith.maximumf %22, %25 : vector<8x256xf32>
    %33 = arith.maximumf %28, %31 : vector<8x256xf32>
    %34 = arith.maximumf %32, %33 : vector<8x256xf32>
    %c0_31 = arith.constant 0 : index
    %c0_32 = arith.constant 0 : index
    %35 = vector.load %arg5[%c0_31, %c0_32] : memref<1x256xf32, #tpu.memory_space<vmem>>, vector<1x256xf32>
    %36 = vector.broadcast %35 : vector<1x256xf32> to vector<8x256xf32>
    %37 = arith.addf %34, %36 : vector<8x256xf32>
    %38 = arith.truncf %37 : vector<8x256xf32> to vector<8x256xbf16>
    %c0_33 = arith.constant 0 : index
    %c0_34 = arith.constant 0 : index
    %39 = vector.load %arg6[%c0_33, %c0_34] : memref<256x128xbf16, #tpu.memory_space<vmem>>, vector<256x128xbf16>
    %cst_35 = arith.constant dense<0.000000e+00> : vector<8x128xf32>
    %40 = tpu.matmul %38, %39, %cst_35 {dimension_numbers = #tpu.dot_dimension_numbers<[1], [0], [0], [1], [0, 0, 1, 1], [], []>} : vector<8x256xbf16>, vector<256x128xbf16>, vector<8x128xf32> -> vector<8x128xf32>
    %c0_36 = arith.constant 0 : index
    %c0_37 = arith.constant 0 : index
    %41 = vector.load %arg7[%c0_36, %c0_37] : memref<1x128xf32, #tpu.memory_space<vmem>>, vector<1x128xf32>
    %42 = vector.broadcast %41 : vector<1x128xf32> to vector<8x128xf32>
    %43 = arith.addf %40, %42 : vector<8x128xf32>
    %cst_38 = arith.constant 0.000000e+00 : f32
    %44 = vector.broadcast %cst_38 : f32 to vector<8x128xf32>
    %45 = arith.maximumf %43, %44 : vector<8x128xf32>
    %46 = arith.truncf %45 : vector<8x128xf32> to vector<8x128xbf16>
    %c0_39 = arith.constant 0 : index
    %c0_40 = arith.constant 0 : index
    %47 = vector.load %arg8[%c0_39, %c0_40] : memref<128x64xbf16, #tpu.memory_space<vmem>>, vector<128x64xbf16>
    %cst_41 = arith.constant dense<0.000000e+00> : vector<8x64xf32>
    %48 = tpu.matmul %46, %47, %cst_41 {dimension_numbers = #tpu.dot_dimension_numbers<[1], [0], [0], [1], [0, 0, 1, 1], [], []>} : vector<8x128xbf16>, vector<128x64xbf16>, vector<8x64xf32> -> vector<8x64xf32>
    %c0_42 = arith.constant 0 : index
    %c0_43 = arith.constant 0 : index
    %49 = vector.load %arg9[%c0_42, %c0_43] : memref<1x64xf32, #tpu.memory_space<vmem>>, vector<1x64xf32>
    %50 = vector.broadcast %49 : vector<1x64xf32> to vector<8x64xf32>
    %51 = arith.addf %48, %50 : vector<8x64xf32>
    %cst_44 = arith.constant 0.000000e+00 : f32
    %52 = vector.broadcast %cst_44 : f32 to vector<8x64xf32>
    %53 = arith.maximumf %51, %52 : vector<8x64xf32>
    %54 = arith.truncf %53 : vector<8x64xf32> to vector<8x64xbf16>
    %c0_45 = arith.constant 0 : index
    %c0_46 = arith.constant 0 : index
    %55 = vector.load %arg10[%c0_45, %c0_46] : memref<64x128xbf16, #tpu.memory_space<vmem>>, vector<64x128xbf16>
    %cst_47 = arith.constant dense<0.000000e+00> : vector<8x128xf32>
    %56 = tpu.matmul %54, %55, %cst_47 {dimension_numbers = #tpu.dot_dimension_numbers<[1], [0], [0], [1], [0, 0, 1, 1], [], []>} : vector<8x64xbf16>, vector<64x128xbf16>, vector<8x128xf32> -> vector<8x128xf32>
    %c0_48 = arith.constant 0 : index
    %c0_49 = arith.constant 0 : index
    %57 = vector.load %arg11[%c0_48, %c0_49] : memref<1x128xf32, #tpu.memory_space<vmem>>, vector<1x128xf32>
    %58 = vector.broadcast %57 : vector<1x128xf32> to vector<8x128xf32>
    %59 = arith.addf %56, %58 : vector<8x128xf32>
    %c0_50 = arith.constant 0 : index
    %c0_51 = arith.constant 0 : index
    %60 = vector.load %arg12[%c0_50, %c0_51] : memref<8x128xf32, #tpu.memory_space<vmem>>, vector<8x128xf32>
    tpu.vector_store %arg12[%c0_50, %c0_51], %59 {strides = array<i32>} : memref<8x128xf32, #tpu.memory_space<vmem>>, vector<8x128xf32>,
    return
  }
  func.func @transform_0(%arg0: i32) -> (i32, i32) {
    %c0_i32 = arith.constant 0 : i32
    %c0_i32_0 = arith.constant 0 : i32
    return %arg0, %c0_i32 : i32, i32
  }
  func.func @transform_1(%arg0: i32) -> (i32, i32, i32) {
    %c0_i32 = arith.constant 0 : i32
    %c0_i32_0 = arith.constant 0 : i32
    %c0_i32_1 = arith.constant 0 : i32
    %c0_i32_2 = arith.constant 0 : i32
    return %c0_i32, %c0_i32_0, %c0_i32_1 : i32, i32, i32
  }
  func.func @transform_2(%arg0: i32) -> (i32, i32) {
    %c0_i32 = arith.constant 0 : i32
    %c0_i32_0 = arith.constant 0 : i32
    %c0_i32_1 = arith.constant 0 : i32
    return %c0_i32, %c0_i32_0 : i32, i32
  }
  func.func @transform_3(%arg0: i32) -> (i32, i32, i32) {
    %c0_i32 = arith.constant 0 : i32
    %c0_i32_0 = arith.constant 0 : i32
    %c0_i32_1 = arith.constant 0 : i32
    %c0_i32_2 = arith.constant 0 : i32
    return %c0_i32, %c0_i32_0, %c0_i32_1 : i32, i32, i32
  }
  func.func @transform_4(%arg0: i32) -> (i32, i32) {
    %c0_i32 = arith.constant 0 : i32
    %c0_i32_0 = arith.constant 0 : i32
    %c0_i32_1 = arith.constant 0 : i32
    return %c0_i32, %c0_i32_0 : i32, i32
  }
  func.func @transform_5(%arg0: i32) -> (i32, i32) {
    %c0_i32 = arith.constant 0 : i32
    %c0_i32_0 = arith.constant 0 : i32
    %c0_i32_1 = arith.constant 0 : i32
    return %c0_i32, %c0_i32_0 : i32, i32
  }
  func.func @transform_6(%arg0: i32) -> (i32, i32) {
    %c0_i32 = arith.constant 0 : i32
    %c0_i32_0 = arith.constant 0 : i32
    %c0_i32_1 = arith.constant 0 : i32
    return %c0_i32, %c0_i32_0 : i32, i32
  }
  func.func @transform_7(%arg0: i32) -> (i32, i32) {
    %c0_i32 = arith.constant 0 : i32
    %c0_i32_0 = arith.constant 0 : i32
    %c0_i32_1 = arith.constant 0 : i32
    return %c0_i32, %c0_i32_0 : i32, i32
  }
  func.func @transform_8(%arg0: i32) -> (i32, i32) {
    %c0_i32 = arith.constant 0 : i32
    %c0_i32_0 = arith.constant 0 : i32
    %c0_i32_1 = arith.constant 0 : i32
    return %c0_i32, %c0_i32_0 : i32, i32
  }
  func.func @transform_9(%arg0: i32) -> (i32, i32) {
    %c0_i32 = arith.constant 0 : i32
    %c0_i32_0 = arith.constant 0 : i32
    %c0_i32_1 = arith.constant 0 : i32
    return %c0_i32, %c0_i32_0 : i32, i32
  }
  func.func @transform_10(%arg0: i32) -> (i32, i32) {
    %c0_i32 = arith.constant 0 : i32
    %c0_i32_0 = arith.constant 0 : i32
    %c0_i32_1 = arith.constant 0 : i32
    return %c0_i32, %c0_i32_0 : i32, i32
  }
  func.func @transform_11(%arg0: i32) -> (i32, i32) {
    %c0_i32 = arith.constant 0 : i32
    %c0_i32_0 = arith.constant 0 : i32
    return %arg0, %c0_i32 : i32, i32
  }
}

</mosaic_0001>

<bundles_post_ra>
// kernel: sample_net_forward.1
= control target key start
LH: loop header
LB: loop body
LE: loop exit
PB: predicated region body
PF: predicated region fallthrough
CT: control target
= control target key end

     0   :  { %16 = vsyncpa [#allocation3], 0  ;;  %s15391_s0 = inlined_call_operand.vmem [shape: bf16[8,784], index: 0, kind: input, shape index: {}]   ;;  %s15392_s1 = inlined_call_operand.hbm [shape: bf16[4,784,576], index: 1, kind: input, shape index: {}]   ;;  %s15393_s2 = inlined_call_operand.hbm [shape: f32[1,576], index: 2, kind: input, shape index: {}]   ;;  %s15394_s3 = inlined_call_operand.hbm [shape: bf16[4,576,256], index: 3, kind: input, shape index: {}]   ;;  %s15395_s4 = inlined_call_operand.hbm [shape: f32[1,256], index: 4, kind: input, shape index: {}]   ;;  %s15396_s5 = inlined_call_operand.hbm [shape: bf16[256,128], index: 5, kind: input, shape index: {}]   ;;  %s15397_s6 = inlined_call_operand.hbm [shape: f32[1,128], index: 6, kind: input, shape index: {}]   ;;  %s15398_s7 = inlined_call_operand.hbm [shape: bf16[128,64], index: 7, kind: input, shape index: {}]   ;;  %s15399_s8 = inlined_call_operand.hbm [shape: f32[1,64], index: 8, kind: input, shape index: {}]   ;;  %s15400_s9 = inlined_call_operand.hbm [shape: bf16[64,128], index: 9, kind: input, shape index: {}]   ;;  %s15401_s10 = inlined_call_operand.hbm [shape: f32[1,128], index: 10, kind: input, shape index: {}]   ;;  %s15402_s11 = inlined_call_operand.vmem [shape: f32[8,128], index: 11, kind: output, shape index: {}]  }
   0x1   :  { %17 = vsyncpa [#allocation5], 0 }
   0x2   :  { %18 = vsyncpa [#allocation8], 0 }
   0x3   :  { %19 = vsyncpa [#allocation11], 0 }
   0x4   :  { %20 = vsyncpa [#allocation14], 0 }
   0x5   :  { %21 = vsyncpa [#allocation17], 0  ;;  %s14870_s17 = smov [#allocation4]   ;;  %s14871_s19 = smov [#allocation7]  }
   0x6   :  { %s42_s18 = sshll.u32 %s14870_s17, 4  ;;  %s64_s20 = sshll.u32 %s14871_s19, 4  ;;  %s43_s18 = int_to_ptr.vmem [resolvable:$true] %s42_s18  ;;  %s65_s20 = int_to_ptr.vmem [resolvable:$true] %s64_s20 }
   0x7   :  { %s14666_s21 = scalar_lea.vmem %s43_s18, 80  ;;  %s14670_s22 = scalar_lea.vmem %s43_s18, 96 }
   0x8   :  { %p14667_p0 = scmp.ne.s32.totalorder %s43_s18, %s14666_s21  ;;  %p14671_p1 = scmp.lt.s32.totalorder %s43_s18, %s43_s18 }
   0x9   :  { %p14672_p2 = scmp.lt.s32.totalorder %s14670_s22, %s14666_s21 }
   0xb   :  { %p14673_p3 = por %p14672_p2, %p14671_p1 }
   0xd   :  { %p14674_p4 = pnand %p14673_p3, %p14667_p0 }
   0xf   :  { %14677 = shalt.err (!%p14674_p4)
}
  0x10   :  { %45 = dma.hbm_to_vmem [thread:$0]  %s15393_s2, 80, %s43_s18, [#allocation5]  }
  0x11   :  { %s14686_s25 = scalar_lea.vmem %s65_s20, 32  ;;  %p14691_p6 = scmp.lt.s32.totalorder %s65_s20, %s65_s20 }
  0x12   :  { %p14687_p5 = scmp.ne.s32.totalorder %s65_s20, %s14686_s25  ;;  %p14692_p7 = scmp.lt.s32.totalorder %s14686_s25, %s14686_s25 }
  0x14   :  { %p14693_p8 = por %p14692_p7, %p14691_p6 }
  0x16   :  { %p14694_p9 = pnand %p14693_p8, %p14687_p5 }
  0x18   :  { %14697 = shalt.err (!%p14694_p9)
}
  0x19   :  { %67 = dma.hbm_to_vmem [thread:$0]  %s15395_s4, 32, %s65_s20, [#allocation8]  }
  0x1a   :  { %s14872_s28 = smov [#allocation10]   ;;  %s14873_s30 = smov [#allocation13]  }
  0x1b   :  { %s86_s29 = sshll.u32 %s14872_s28, 4  ;;  %s108_s12 = sshll.u32 %s14873_s30, 4  ;;  %s87_s29 = int_to_ptr.vmem [resolvable:$true] %s86_s29  ;;  %s109_s12 = int_to_ptr.vmem [resolvable:$true] %s108_s12 }
  0x1c   :  { %s14706_s13 = scalar_lea.vmem %s87_s29, 16  ;;  %s14710_s2 = scalar_lea.vmem %s87_s29, 32 }
  0x1d   :  { %p14707_p10 = scmp.ne.s32.totalorder %s87_s29, %s14706_s13  ;;  %p14711_p11 = scmp.lt.s32.totalorder %s87_s29, %s87_s29 }
  0x1e   :  { %p14712_p12 = scmp.lt.s32.totalorder %s14710_s2, %s14706_s13 }
  0x20   :  { %p14713_p13 = por %p14712_p12, %p14711_p11 }
  0x22   :  { %p14714_p0 = pnand %p14713_p13, %p14707_p10 }
  0x24   :  { %14717 = shalt.err (!%p14714_p0)
}
  0x25   :  { %89 = dma.hbm_to_vmem [thread:$0]  %s15397_s6, 16, %s87_s29, [#allocation11]  }
  0x26   :  { %s14726_s16 = scalar_lea.vmem %s109_s12, 16  ;;  %s14730_s4 = scalar_lea.vmem %s109_s12, 32 }
  0x27   :  { %p14727_p1 = scmp.ne.s32.totalorder %s109_s12, %s14726_s16  ;;  %p14731_p2 = scmp.lt.s32.totalorder %s109_s12, %s109_s12 }
  0x28   :  { %p14732_p3 = scmp.lt.s32.totalorder %s14730_s4, %s14726_s16 }
  0x2a   :  { %p14733_p4 = por %p14732_p3, %p14731_p2 }
  0x2c   :  { %p14734_p5 = pnand %p14733_p4, %p14727_p1 }
  0x2e   :  { %14737 = shalt.err (!%p14734_p5)
}
  0x2f   :  { %111 = dma.hbm_to_vmem [thread:$0]  %s15399_s8, 16, %s109_s12, [#allocation14]  }
  0x30   :  { %s14874_s19 = smov [#allocation2]  }
  0x31   :  { %s29_s20 = sshll.u32 %s14874_s19, 4  ;;  %s30_s20 = int_to_ptr.vmem [resolvable:$true] %s29_s20 }
  0x32   :  { %s14746_s21 = scalar_lea.vmem %s30_s20, 125440  ;;  %p14751_p7 = scmp.lt.s32.totalorder %s30_s20, %s30_s20 }
  0x33   :  { %p14747_p6 = scmp.ne.s32.totalorder %s30_s20, %s14746_s21  ;;  %p14752_p8 = scmp.lt.s32.totalorder %s14746_s21, %s14746_s21 }
  0x35   :  { %p14753_p9 = por %p14752_p8, %p14751_p7 }
  0x37   :  { %p14754_p10 = pnand %p14753_p9, %p14747_p6 }
  0x39   :  { %14757 = shalt.err (!%p14754_p10)
}
  0x3a   :  { %s14875_s6 = smov 320   ;;  %s14876_s22 = smov 20  }
  0x3b   :  { %35 = dma.hbm_to_vmem [thread:$0]  %s15392_s1, 125440, %s30_s20, [#allocation3], %s14875_s6, %s14875_s6, %s14876_s22  }
  0x3c   :  { %s14877_s25 = smov [#allocation6]  }
  0x3d   :  { %s51_s26 = sshll.u32 %s14877_s25, 4  ;;  %s52_s26 = int_to_ptr.vmem [resolvable:$true] %s51_s26 }
  0x3e   :  { %s14766_s8 = scalar_lea.vmem %s52_s26, 36864  ;;  %p14771_p12 = scmp.lt.s32.totalorder %s52_s26, %s52_s26 }
  0x3f   :  { %p14767_p11 = scmp.ne.s32.totalorder %s52_s26, %s14766_s8  ;;  %p14772_p13 = scmp.lt.s32.totalorder %s14766_s8, %s14766_s8 }
  0x41   :  { %p14773_p0 = por %p14772_p13, %p14771_p12 }
  0x43   :  { %p14774_p1 = pnand %p14773_p0, %p14767_p11 }
  0x45   :  { %14777 = shalt.err (!%p14774_p1)
}
  0x46   :  { %s14878_s27 = smov 128   ;;  %s14879_s28 = smov 8  }
  0x47   :  { %57 = dma.hbm_to_vmem [thread:$0]  %s15394_s3, 36864, %s52_s26, [#allocation5], %s14878_s27, %s14878_s27, %s14879_s28  }
  0x48   :  { %s14880_s12 = smov [#allocation9]  }
  0x49   :  { %s73_s13 = sshll.u32 %s14880_s12, 4  ;;  %s74_s13 = int_to_ptr.vmem [resolvable:$true] %s73_s13 }
  0x4a   :  { %s14786_s1 = scalar_lea.vmem %s74_s13, 2048  ;;  %p14791_p3 = scmp.lt.s32.totalorder %s74_s13, %s74_s13 }
  0x4b   :  { %p14787_p2 = scmp.ne.s32.totalorder %s74_s13, %s14786_s1  ;;  %p14792_p4 = scmp.lt.s32.totalorder %s14786_s1, %s14786_s1 }
  0x4d   :  { %p14793_p5 = por %p14792_p4, %p14791_p3 }
  0x4f   :  { %p14794_p6 = pnand %p14793_p5, %p14787_p2 }
  0x51   :  { %14797 = shalt.err (!%p14794_p6)
}
  0x52   :  { %s14881_s2 = smov 64   ;;  %s14882_s14 = smov 4  }
  0x53   :  { %79 = dma.hbm_to_vmem [thread:$0]  %s15396_s5, 2048, %s74_s13, [#allocation8], %s14881_s2, %s14881_s2, %s14882_s14  }
  0x54   :  { %s14883_s4 = smov [#allocation12]   ;;  %s14884_s3 = smov [#allocation15]  }
  0x55   :  { %s95_s17 = sshll.u32 %s14883_s4, 4  ;;  %s117_s18 = sshll.u32 %s14884_s3, 4  ;;  %s96_s17 = int_to_ptr.vmem [resolvable:$true] %s95_s17  ;;  %s118_s18 = int_to_ptr.vmem [resolvable:$true] %s117_s18 }
  0x56   :  { %s14806_s19 = scalar_lea.vmem %s96_s17, 1024  ;;  %p14811_p8 = scmp.lt.s32.totalorder %s96_s17, %s96_s17 }
  0x57   :  { %p14807_p7 = scmp.ne.s32.totalorder %s96_s17, %s14806_s19  ;;  %p14812_p9 = scmp.lt.s32.totalorder %s14806_s19, %s14806_s19 }
  0x59   :  { %p14813_p10 = por %p14812_p9, %p14811_p8 }
  0x5b   :  { %p14814_p11 = pnand %p14813_p10, %p14807_p7 }
  0x5d   :  { %14817 = shalt.err (!%p14814_p11)
}
  0x5e   :  { %101 = dma.hbm_to_vmem [thread:$0]  %s15398_s7, 1024, %s96_s17, [#allocation11], %s14881_s2, %s14881_s2, %s14882_s14  }
  0x5f   :  { %s14826_s6 = scalar_lea.vmem %s118_s18, 512  ;;  %p14831_p13 = scmp.lt.s32.totalorder %s118_s18, %s118_s18 }
  0x60   :  { %p14827_p12 = scmp.ne.s32.totalorder %s118_s18, %s14826_s6  ;;  %p14832_p0 = scmp.lt.s32.totalorder %s14826_s6, %s14826_s6 }
  0x62   :  { %p14833_p1 = por %p14832_p0, %p14831_p13 }
  0x64   :  { %p14834_p2 = pnand %p14833_p1, %p14827_p12 }
  0x66   :  { %14837 = shalt.err (!%p14834_p2)
}
  0x67   :  { %123 = dma.hbm_to_vmem [thread:$0]  %s15400_s9, 512, %s118_s18, [#allocation14], %s14881_s2, %s14881_s2, %s14882_s14  }
  0x68   :  { %s14885_s23 = smov [#allocation16]  }
  0x69   :  { %s130_s24 = sshll.u32 %s14885_s23, 4  ;;  %s131_s24 = int_to_ptr.vmem [resolvable:$true] %s130_s24 }
  0x6a   :  { %s14846_s25 = scalar_lea.vmem %s131_s24, 16  ;;  %s14850_s26 = scalar_lea.vmem %s131_s24, 32 }
  0x6b   :  { %p14847_p3 = scmp.ne.s32.totalorder %s131_s24, %s14846_s25  ;;  %p14851_p4 = scmp.lt.s32.totalorder %s131_s24, %s131_s24 }
  0x6c   :  { %p14852_p5 = scmp.lt.s32.totalorder %s14850_s26, %s14846_s25 }
  0x6e   :  { %p14853_p6 = por %p14852_p5, %p14851_p4 }
  0x70   :  { %p14854_p7 = pnand %p14853_p6, %p14847_p3 }
  0x72   :  { %14857 = shalt.err (!%p14854_p7)
}
  0x73   :  { %133 = dma.hbm_to_vmem [thread:$0]  %s15401_s10, 16, %s131_s24, [#allocation17]  }
  0x74   :  { %14858 = dma.done.wait [#allocation3], 125440  }
  0x75   :  { %14859 = vsyncadd [#allocation3], 4294841856 }
  0x76   :  { %14860 = dma.done.wait [#allocation5], 36944  }
  0x77   :  { %14861 = vsyncadd [#allocation5], 4294930352 }
  0x78   :  { %14862 = dma.done.wait [#allocation8], 2080  }
  0x79   :  { %14863 = vsyncadd [#allocation8], 4294965216 }
  0x7a   :  { %14864 = dma.done.wait [#allocation11], 1040  }
  0x7b   :  { %14865 = vsyncadd [#allocation11], 4294966256 }
  0x7c   :  { %14866 = dma.done.wait [#allocation14], 528  }
  0x7d   :  { %14867 = vsyncadd [#allocation14], 4294966768 }
  0x7e   :  { %14868 = dma.done.wait [#allocation17], 16  }
  0x7f   :  { %14869 = vsyncadd [#allocation17], 4294967280  ;;  %v12814_v0 = vld [vmem:[#allocation2 + $0x11c] ss:$20 sps:$4 sm:$0xff]   ;;  %v12818_v2 = vld [vmem:[#allocation2 + $0x118] ss:$20 sps:$4 sm:$0xff]  }
  0x80   :  { %v12816_v1 = vld [vmem:[#allocation2 + $0x39c] ss:$20 sps:$4 sm:$0xff]   ;;  %1765 = vmatprep.subr.bf16.mxu0 %v12814_v0  ;;  %v12819_v3 = vld [vmem:[#allocation2 + $0x398] ss:$20 sps:$4 sm:$0xff]   ;;  %v12820_v4 = vld [vmem:[#allocation2 + $0xf4] ss:$20 sps:$4 sm:$0xff]  }
  0x81   :  { %1806 = vmatprep.subr.bf16.mxu1 %v12816_v1  ;;  %1766 = vmatpush1.bf16.msra.mxu0 %v12818_v2  ;;  %v12822_v5 = vld [vmem:[#allocation2 + $0x374] ss:$20 sps:$4 sm:$0xff]   ;;  %v12824_v6 = vld [vmem:[#allocation2 + $0xf0] ss:$20 sps:$4 sm:$0xff]   ;;  %v12826_v8 = vld [vmem:[#allocation2 + $0xcc] ss:$20 sps:$4 sm:$0xff]  }
  0x82   :  { %1807 = vmatpush1.bf16.msra.mxu1 %v12819_v3  ;;  %1767 = vmatprep.subr.bf16.mxu0 %v12820_v4  ;;  %v12825_v7 = vld [vmem:[#allocation2 + $0x370] ss:$20 sps:$4 sm:$0xff]   ;;  %v12828_v9 = vld [vmem:[#allocation2 + $0x34c] ss:$20 sps:$4 sm:$0xff]   ;;  %v12830_v10 = vld [vmem:[#allocation2 + $0xc8] ss:$20 sps:$4 sm:$0xff]  }
  0x83   :  { %1808 = vmatprep.subr.bf16.mxu1 %v12822_v5  ;;  %v12831_v11 = vld [vmem:[#allocation2 + $0x348] ss:$20 sps:$4 sm:$0xff]   ;;  %v12832_v12 = vld [vmem:[#allocation2 + $0xa4] ss:$20 sps:$4 sm:$0xff]   ;;  %v12836_v14 = vld [vmem:[#allocation2 + $0xa0] ss:$20 sps:$4 sm:$0xff]  }
  0x84   :  { %v12834_v13 = vld [vmem:[#allocation2 + $0x324] ss:$20 sps:$4 sm:$0xff]   ;;  %v12837_v15 = vld [vmem:[#allocation2 + $0x320] ss:$20 sps:$4 sm:$0xff]   ;;  %v12838_v16 = vld [vmem:[#allocation2 + $0x7c] ss:$20 sps:$4 sm:$0xff]  }
  0x85   :  { %1768 = vmatpush1.bf16.msra.mxu0 %v12824_v6  ;;  %v12840_v17 = vld [vmem:[#allocation2 + $0x2fc] ss:$20 sps:$4 sm:$0xff]   ;;  %v12842_v18 = vld [vmem:[#allocation2 + $0x78] ss:$20 sps:$4 sm:$0xff]   ;;  %v12844_v20 = vld [vmem:[#allocation2 + $0x54] ss:$20 sps:$4 sm:$0xff]  }
  0x86   :  { %1809 = vmatpush1.bf16.msra.mxu1 %v12825_v7  ;;  %1769 = vmatprep.subr.bf16.mxu0 %v12826_v8  ;;  %v12843_v19 = vld [vmem:[#allocation2 + $0x2f8] ss:$20 sps:$4 sm:$0xff]   ;;  %v12846_v21 = vld [vmem:[#allocation2 + $0x2d4] ss:$20 sps:$4 sm:$0xff]   ;;  %v12848_v22 = vld [vmem:[#allocation2 + $0x50] ss:$20 sps:$4 sm:$0xff]  }
  0x87   :  { %1810 = vmatprep.subr.bf16.mxu1 %v12828_v9  ;;  %v12849_v23 = vld [vmem:[#allocation2 + $0x2d0] ss:$20 sps:$4 sm:$0xff]   ;;  %v12850_v24 = vld [vmem:[#allocation2 + $0x2c] ss:$20 sps:$4 sm:$0xff]   ;;  %v12854_v26 = vld [vmem:[#allocation2 + $0x28] ss:$20 sps:$4 sm:$0xff]  }
  0x88   :  { %v12852_v25 = vld [vmem:[#allocation2 + $0x2ac] ss:$20 sps:$4 sm:$0xff]   ;;  %v12855_v27 = vld [vmem:[#allocation2 + $0x2a8] ss:$20 sps:$4 sm:$0xff]   ;;  %v12856_v28 = vld [vmem:[#allocation2 + $0x4] ss:$20 sps:$4 sm:$0xff]  }
  0x89   :  { %1770 = vmatpush1.bf16.msra.mxu0 %v12830_v10  ;;  %v12858_v29 = vld [vmem:[#allocation2 + $0x284] ss:$20 sps:$4 sm:$0xff]   ;;  %v12860_v30 = vld [vmem:[#allocation2] ss:$20 sps:$4 sm:$0xff]   ;;  %v12862_v32 = vld [vmem:[#allocation2 + $0x25c] ss:$20 sps:$4 sm:$0xff]  }
  0x8a   :  { %1811 = vmatpush1.bf16.msra.mxu1 %v12831_v11  ;;  %1771 = vmatprep.subr.bf16.mxu0 %v12832_v12  ;;  %v12861_v31 = vld [vmem:[#allocation2 + $0x280] ss:$20 sps:$4 sm:$0xff]   ;;  %v12864_v33 = vld [vmem:[#allocation2 + $0x4dc] ss:$20 sps:$4 sm:$0xff]   ;;  %v12866_v34 = vld [vmem:[#allocation2 + $0x258] ss:$20 sps:$4 sm:$0xff]  }
  0x8b   :  { %1812 = vmatprep.subr.bf16.mxu1 %v12834_v13  ;;  %v12867_v35 = vld [vmem:[#allocation2 + $0x4d8] ss:$20 sps:$4 sm:$0xff]   ;;  %v12868_v36 = vld [vmem:[#allocation2 + $0x234] ss:$20 sps:$4 sm:$0xff]   ;;  %v12872_v38 = vld [vmem:[#allocation2 + $0x230] ss:$20 sps:$4 sm:$0xff]  }
  0x8c   :  { %v12870_v37 = vld [vmem:[#allocation2 + $0x4b4] ss:$20 sps:$4 sm:$0xff]   ;;  %v12873_v39 = vld [vmem:[#allocation2 + $0x4b0] ss:$20 sps:$4 sm:$0xff]   ;;  %v12874_v40 = vld [vmem:[#allocation2 + $0x20c] ss:$20 sps:$4 sm:$0xff]  }
  0x8d   :  { %1772 = vmatpush1.bf16.msra.mxu0 %v12836_v14  ;;  %v12876_v41 = vld [vmem:[#allocation2 + $0x48c] ss:$20 sps:$4 sm:$0xff]   ;;  %v12878_v42 = vld [vmem:[#allocation2 + $0x208] ss:$20 sps:$4 sm:$0xff]   ;;  %v12880_v44 = vld [vmem:[#allocation2 + $0x1e4] ss:$20 sps:$4 sm:$0xff]  }
  0x8e   :  { %1813 = vmatpush1.bf16.msra.mxu1 %v12837_v15  ;;  %1773 = vmatprep.subr.bf16.mxu0 %v12838_v16  ;;  %v12879_v43 = vld [vmem:[#allocation2 + $0x488] ss:$20 sps:$4 sm:$0xff]   ;;  %v12882_v45 = vld [vmem:[#allocation2 + $0x464] ss:$20 sps:$4 sm:$0xff]   ;;  %v12884_v49 = vld [vmem:[#allocation2 + $0x1e0] ss:$20 sps:$4 sm:$0xff]  }
  0x8f   :  { %1814 = vmatprep.subr.bf16.mxu1 %v12840_v17  ;;  %v165_v46 = vld [vmem:[%s15391_s0] sm:$0xff]  ;;  %v166_v48 = vld [vmem:[%s15391_s0 + $0x8] sm:$0xff]  ;;  %v12886_v52 = vld [vmem:[#allocation2 + $0x1bc] ss:$20 sps:$4 sm:$0xff]   ;;  %v14886_v13 = vmov 0   ;;  %vm1761_vm0 = vcmask 130048  }
  0x90   :  { %v14982_v47 = vcombine.high %v165_v46, %v165_v46  ;;  %v12885_v50 = vld [vmem:[#allocation2 + $0x460] ss:$20 sps:$4 sm:$0xff]   ;;  %v14987_v51 = vcombine.high %v166_v48, %v166_v48  ;;  %v12888_v53 = vld [vmem:[#allocation2 + $0x43c] ss:$20 sps:$4 sm:$0xff]   ;;  %v12890_v54 = vld [vmem:[#allocation2 + $0x1b8] ss:$20 sps:$4 sm:$0xff]   ;;  %v14991_v6 = vcombine.low %v165_v46, %v165_v46  ;;  %v14993_v7 = vcombine.low %v166_v48, %v166_v48 }
  0x91   :  { %1774 = vmatpush1.bf16.msra.mxu0 %v12842_v18  ;;  %v12891_v55 = vld [vmem:[#allocation2 + $0x438] ss:$20 sps:$4 sm:$0xff]   ;;  %v12892_v56 = vld [vmem:[#allocation2 + $0x194] ss:$20 sps:$4 sm:$0xff]   ;;  %v12896_v58 = vld [vmem:[#allocation2 + $0x190] ss:$20 sps:$4 sm:$0xff]  }
  0x92   :  { %1815 = vmatpush1.bf16.msra.mxu1 %v12843_v19  ;;  %1775 = vmatprep.subr.bf16.mxu0 %v12844_v20  ;;  %v12894_v57 = vld [vmem:[#allocation2 + $0x414] ss:$20 sps:$4 sm:$0xff]   ;;  %v12897_v59 = vld [vmem:[#allocation2 + $0x410] ss:$20 sps:$4 sm:$0xff]   ;;  %v12898_v60 = vld [vmem:[#allocation2 + $0x16c] ss:$20 sps:$4 sm:$0xff]  }
  0x93   :  { %1816 = vmatprep.subr.bf16.mxu1 %v12846_v21  ;;  %1797 = vmatprep.mubr.bf16.mxu0 %v14982_v47  ;;  %v12900_v61 = vld [vmem:[#allocation2 + $0x3ec] ss:$20 sps:$4 sm:$0xff]   ;;  %v12902_v62 = vld [vmem:[#allocation2 + $0x168] ss:$20 sps:$4 sm:$0xff]   ;;  %v12904_v0 = vld [vmem:[#allocation2 + $0x144] ss:$20 sps:$4 sm:$0xff]  }
  0x94   :  { %1838 = vmatprep.mubr.bf16.mxu1 %v14987_v51  ;;  %v12903_v63 = vld [vmem:[#allocation2 + $0x3e8] ss:$20 sps:$4 sm:$0xff]   ;;  %v12906_v1 = vld [vmem:[#allocation2 + $0x3c4] ss:$20 sps:$4 sm:$0xff]   ;;  %v12908_v2 = vld [vmem:[#allocation2 + $0x140] ss:$20 sps:$4 sm:$0xff]  }
  0x95   :  { %1776 = vmatpush1.bf16.msra.mxu0 %v12848_v22  ;;  %v12909_v3 = vld [vmem:[#allocation2 + $0x3c0] ss:$20 sps:$4 sm:$0xff]   ;;  %v12916_v4 = vld [vmem:[#allocation2 + $0x61c] ss:$20 sps:$4 sm:$0xff]   ;;  %v12919_v5 = vld [vmem:[#allocation2 + $0x784] ss:$20 sps:$4 sm:$0xff]  }
  0x96   :  { %1817 = vmatpush1.bf16.msra.mxu1 %v12849_v23  ;;  %1777 = vmatprep.subr.bf16.mxu0 %v12850_v24  ;;  %v12914_v8 = vld [vmem:[#allocation2 + $0x618] ss:$20 sps:$4 sm:$0xff]   ;;  %v12917_v9 = vld [vmem:[#allocation2 + $0x780] ss:$20 sps:$4 sm:$0xff]   ;;  %v12920_v12 = vld [vmem:[#allocation2 + $0x5f0] ss:$20 sps:$4 sm:$0xff]  }
  0x97   :  { %1818 = vmatprep.subr.bf16.mxu1 %v12852_v25  ;;  %v12922_v10 = vld [vmem:[#allocation2 + $0x5f4] ss:$20 sps:$4 sm:$0xff]   ;;  %v12925_v11 = vld [vmem:[#allocation2 + $0x124] ss:$20 sps:$4 sm:$0xff]   ;;  %v12928_v14 = vld [vmem:[#allocation2 + $0x5cc] ss:$20 sps:$4 sm:$0xff]  }
  0x98   :  { %v12923_v15 = vld [vmem:[#allocation2 + $0x120] ss:$20 sps:$4 sm:$0xff]   ;;  %v12926_v16 = vld [vmem:[#allocation2 + $0x5c8] ss:$20 sps:$4 sm:$0xff]   ;;  %v12929_v17 = vld [vmem:[%s15391_s0 + $0x18] ss:$0 sps:$4 sm:$0xff]  }
  0x99   :  { %1778 = vmatpush1.bf16.msra.mxu0 %v12854_v26  ;;  %v12932_v18 = vld [vmem:[#allocation2 + $0xfc] ss:$20 sps:$4 sm:$0xff]   ;;  %v12935_v19 = vld [vmem:[#allocation2 + $0x5a4] ss:$20 sps:$4 sm:$0xff]   ;;  %v12933_v21 = vld [vmem:[#allocation2 + $0x5a0] ss:$20 sps:$4 sm:$0xff]  }
  0x9a   :  { %1819 = vmatpush1.bf16.msra.mxu1 %v12855_v27  ;;  %1779 = vmatprep.subr.bf16.mxu0 %v12856_v28  ;;  %v12930_v20 = vld [vmem:[#allocation2 + $0xf8] ss:$20 sps:$4 sm:$0xff]   ;;  %v12938_v22 = vld [vmem:[#allocation2 + $0xd4] ss:$20 sps:$4 sm:$0xff]   ;;  %v12941_v23 = vld [vmem:[#allocation2 + $0x57c] ss:$20 sps:$4 sm:$0xff]  }
  0x9b   :  { %1820 = vmatprep.subr.bf16.mxu1 %v12858_v29  ;;  %v12936_v24 = vld [vmem:[#allocation2 + $0xd0] ss:$20 sps:$4 sm:$0xff]   ;;  %v12939_v25 = vld [vmem:[#allocation2 + $0x578] ss:$20 sps:$4 sm:$0xff]   ;;  %v12947_v27 = vld [vmem:[#allocation2 + $0x554] ss:$20 sps:$4 sm:$0xff]  }
  0x9c   :  { %v12944_v26 = vld [vmem:[#allocation2 + $0xac] ss:$20 sps:$4 sm:$0xff]   ;;  %v12942_v28 = vld [vmem:[#allocation2 + $0xa8] ss:$20 sps:$4 sm:$0xff]   ;;  %v12945_v29 = vld [vmem:[#allocation2 + $0x550] ss:$20 sps:$4 sm:$0xff]  }
  0x9d   :  { %1780 = vmatpush1.bf16.msra.mxu0 %v12860_v30  ;;  %v12950_v30 = vld [vmem:[#allocation2 + $0x84] ss:$20 sps:$4 sm:$0xff]   ;;  %v12966_v46 = vld [vmem:[#allocation2 + $0x8] ss:$20 sps:$4 sm:$0xff]   ;;  %vm14888_vm1 = vmmov 0   ;;  %vm8908_vm2 = vcmask 523264  }
  0x9e   :  { %1821 = vmatpush1.bf16.msra.mxu1 %v12861_v31  ;;  %1781 = vmatprep.subr.bf16.mxu0 %v12862_v32  ;;  %v12953_v31 = vld [vmem:[#allocation2 + $0x52c] ss:$20 sps:$4 sm:$0xff]   ;;  %v15006_v32 = vld [vmem:[%s15391_s0 + $0x10] sm:$0xff] }
  0x9f   :  { %1822 = vmatprep.subr.bf16.mxu1 %v12864_v33  ;;  %v15010_v33 = vcombine.high %v15006_v32, %v15006_v32  ;;  %v12969_v48 = vld [vmem:[#allocation2 + $0x730] ss:$20 sps:$4 sm:$0xff]  }
  0xa1   :  { %1782 = vmatpush2.bf16.msra.mxu0 %v12866_v34  ;;  %v12948_v34 = vld [vmem:[#allocation2 + $0x80] ss:$20 sps:$4 sm:$0xff]  }
  0xa2   :  { %1823 = vmatpush2.bf16.msra.mxu1 %v12867_v35  ;;  %1783 = vmatprep.subr.bf16.mxu0 %v12868_v36  ;;  %v12951_v35 = vld [vmem:[#allocation2 + $0x528] ss:$20 sps:$4 sm:$0xff]  }
  0xa3   :  { %1824 = vmatprep.subr.bf16.mxu1 %v12870_v37  ;;  %v12956_v36 = vld [vmem:[#allocation2 + $0x5c] ss:$20 sps:$4 sm:$0xff]   ;;  %v12959_v37 = vld [vmem:[#allocation2 + $0x504] ss:$20 sps:$4 sm:$0xff]  }
  0xa5   :  { %1784 = vmatpush2.bf16.msra.mxu0 %v12872_v38  ;;  %v12954_v38 = vld [vmem:[#allocation2 + $0x58] ss:$20 sps:$4 sm:$0xff]  }
  0xa6   :  { %1825 = vmatpush2.bf16.msra.mxu1 %v12873_v39  ;;  %1785 = vmatprep.subr.bf16.mxu0 %v12874_v40  ;;  %v12957_v39 = vld [vmem:[#allocation2 + $0x500] ss:$20 sps:$4 sm:$0xff]  }
  0xa7   :  { %1826 = vmatprep.subr.bf16.mxu1 %v12876_v41  ;;  %v12962_v40 = vld [vmem:[#allocation2 + $0x34] ss:$20 sps:$4 sm:$0xff]   ;;  %v12965_v41 = vld [vmem:[#allocation2 + $0x75c] ss:$20 sps:$4 sm:$0xff]  }
  0xa9   :  { %1786 = vmatpush2.bf16.msra.mxu0 %v12878_v42  ;;  %v12960_v42 = vld [vmem:[#allocation2 + $0x30] ss:$20 sps:$4 sm:$0xff]  }
  0xaa   :  { %1827 = vmatpush2.bf16.msra.mxu1 %v12879_v43  ;;  %1787 = vmatprep.subr.bf16.mxu0 %v12880_v44  ;;  %v12963_v43 = vld [vmem:[#allocation2 + $0x758] ss:$20 sps:$4 sm:$0xff]  }
  0xab   :  { %1828 = vmatprep.subr.bf16.mxu1 %v12882_v45  ;;  %v12968_v44 = vld [vmem:[#allocation2 + $0xc] ss:$20 sps:$4 sm:$0xff]   ;;  %v12971_v45 = vld [vmem:[#allocation2 + $0x734] ss:$20 sps:$4 sm:$0xff]  }
  0xad   :  { %1788 = vmatpush2.bf16.msra.mxu0 %v12884_v49  ;;  %v12974_v49 = vld [vmem:[#allocation2 + $0x264] ss:$20 sps:$4 sm:$0xff]  }
  0xae   :  { %1829 = vmatpush2.bf16.msra.mxu1 %v12885_v50  ;;  %1789 = vmatprep.subr.bf16.mxu0 %v12886_v52  ;;  %v12977_v50 = vld [vmem:[#allocation2 + $0x70c] ss:$20 sps:$4 sm:$0xff]  }
  0xaf   :  { %1830 = vmatprep.subr.bf16.mxu1 %v12888_v53  ;;  %v12972_v52 = vld [vmem:[#allocation2 + $0x260] ss:$20 sps:$4 sm:$0xff]   ;;  %v12975_v53 = vld [vmem:[#allocation2 + $0x708] ss:$20 sps:$4 sm:$0xff]  }
  0xb1   :  { %1790 = vmatpush2.bf16.msra.mxu0 %v12890_v54  ;;  %v12980_v54 = vld [vmem:[#allocation2 + $0x23c] ss:$20 sps:$4 sm:$0xff]  }
  0xb2   :  { %1831 = vmatpush2.bf16.msra.mxu1 %v12891_v55  ;;  %1791 = vmatprep.subr.bf16.mxu0 %v12892_v56  ;;  %v12983_v55 = vld [vmem:[#allocation2 + $0x6e4] ss:$20 sps:$4 sm:$0xff]  }
  0xb3   :  { %1832 = vmatprep.subr.bf16.mxu1 %v12894_v57  ;;  %v12978_v56 = vld [vmem:[#allocation2 + $0x238] ss:$20 sps:$4 sm:$0xff]   ;;  %v12981_v57 = vld [vmem:[#allocation2 + $0x6e0] ss:$20 sps:$4 sm:$0xff]  }
  0xb5   :  { %1792 = vmatpush2.bf16.msra.mxu0 %v12896_v58  ;;  %v12986_v58 = vld [vmem:[#allocation2 + $0x214] ss:$20 sps:$4 sm:$0xff]  }
  0xb6   :  { %1833 = vmatpush2.bf16.msra.mxu1 %v12897_v59  ;;  %1793 = vmatprep.subr.bf16.mxu0 %v12898_v60  ;;  %v12989_v59 = vld [vmem:[#allocation2 + $0x6bc] ss:$20 sps:$4 sm:$0xff]  }
  0xb7   :  { %1834 = vmatprep.subr.bf16.mxu1 %v12900_v61  ;;  %v12984_v60 = vld [vmem:[#allocation2 + $0x210] ss:$20 sps:$4 sm:$0xff]   ;;  %v12987_v61 = vld [vmem:[#allocation2 + $0x6b8] ss:$20 sps:$4 sm:$0xff]  }
  0xb9   :  { %1794 = vmatpush2.bf16.msra.mxu0 %v12902_v62  ;;  %v12992_v62 = vld [vmem:[#allocation2 + $0x1ec] ss:$20 sps:$4 sm:$0xff]  }
  0xba   :  { %1835 = vmatpush2.bf16.msra.mxu1 %v12903_v63  ;;  %1795 = vmatprep.subr.bf16.mxu0 %v12904_v0  ;;  %v12995_v63 = vld [vmem:[#allocation2 + $0x694] ss:$20 sps:$4 sm:$0xff]  }
  0xbb   :  { %1836 = vmatprep.subr.bf16.mxu1 %v12906_v1  ;;  %v12990_v0 = vld [vmem:[#allocation2 + $0x1e8] ss:$20 sps:$4 sm:$0xff]   ;;  %v12993_v1 = vld [vmem:[#allocation2 + $0x690] ss:$20 sps:$4 sm:$0xff]  }
  0xbd   :  { %1796 = vmatpush2.bf16.msra.mxu0 %v12908_v2  ;;  %v12998_v2 = vld [vmem:[#allocation2 + $0x1c4] ss:$20 sps:$4 sm:$0xff]  }
  0xbe   :  { %1837 = vmatpush2.bf16.msra.mxu1 %v12909_v3  ;;  %1847 = vmatprep.subr.bf16.mxu0 %v12916_v4  ;;  %v13001_v3 = vld [vmem:[#allocation2 + $0x66c] ss:$20 sps:$4 sm:$0xff]  }
  0xbf   :  { %1902 = vmatprep.subr.bf16.mxu1 %v12919_v5  ;;  %v12996_v4 = vld [vmem:[#allocation2 + $0x1c0] ss:$20 sps:$4 sm:$0xff]   ;;  %v12999_v5 = vld [vmem:[#allocation2 + $0x668] ss:$20 sps:$4 sm:$0xff]  }
  0xc0   :  { %1798 = vmatmul.mubr.bf16.vlgmr.msra.gmra.mxu0 %v14991_v6 }
  0xc1   :  { %1839 = vmatmul.mubr.bf16.vlgmr.msra.gmra.mxu1 %v14993_v7  ;;  %1848 = vmatpush1.bf16.msra.mxu0 %v12914_v8  ;;  %v13004_v8 = vld [vmem:[#allocation2 + $0x19c] ss:$20 sps:$4 sm:$0xff]  }
  0xc2   :  { %1903 = vmatpush1.bf16.msra.mxu1 %v12917_v9  ;;  %1849 = vmatprep.subr.bf16.mxu0 %v12922_v10  ;;  %v13007_v9 = vld [vmem:[#allocation2 + $0x644] ss:$20 sps:$4 sm:$0xff]  }
  0xc3   :  { %1920 = vmatprep.mubr.bf16.mxu1 %v14886_v13  ;;  %1929 = vmatprep.subr.bf16.mxu1 %v12925_v11  ;;  %v13002_v10 = vld [vmem:[#allocation2 + $0x198] ss:$20 sps:$4 sm:$0xff]   ;;  %v13005_v11 = vld [vmem:[#allocation2 + $0x640] ss:$20 sps:$4 sm:$0xff]  }
  0xc4   :  { %1879 = vmatprep.mubr.bf16.mxu0 %v15010_v33 }
  0xc5   :  { %1850 = vmatpush1.bf16.msra.mxu0 %v12920_v12  ;;  %v13011_v12 = vld [vmem:[#allocation2 + $0x174] ss:$20 sps:$4 sm:$0xff]  }
  0xc6   :  { %1851 = vmatprep.subr.bf16.mxu0 %v12928_v14  ;;  %v13015_v14 = vld [vmem:[#allocation2 + $0x3a4] ss:$20 sps:$4 sm:$0xff]  }
  0xc9   :  { %11360 = vmatmul.mubr.msk.bf16.vlgmr.msra.gmra.mxu1 %vm1761_vm0, %v12929_v17  ;;  %1852 = vmatpush1.bf16.msra.mxu0 %v12926_v16  ;;  %v15015_v16 = vcombine.low %v15006_v32, %v15006_v32  ;;  %v13013_v17 = vld [vmem:[#allocation2 + $0x3a0] ss:$20 sps:$4 sm:$0xff]   ;;  %v13034_v32 = vld [vmem:[#allocation2 + $0x5d0] ss:$20 sps:$4 sm:$0xff]  }
  0xca   :  { %1930 = vmatpush1.bf16.msra.mxu1 %v12923_v15  ;;  %1853 = vmatprep.subr.bf16.mxu0 %v12935_v19  ;;  %v13009_v15 = vld [vmem:[#allocation2 + $0x170] ss:$20 sps:$4 sm:$0xff]  }
  0xcb   :  { %1931 = vmatprep.subr.bf16.mxu1 %v12932_v18  ;;  %1961 = vmatprep.mubr.bf16.mxu1 %v14982_v47  ;;  %v13018_v18 = vld [vmem:[#allocation2 + $0x14c] ss:$20 sps:$4 sm:$0xff]   ;;  %v13021_v19 = vld [vmem:[#allocation2 + $0x37c] ss:$20 sps:$4 sm:$0xff]  }
  0xcd   :  { %1854 = vmatpush1.bf16.msra.mxu0 %v12933_v21  ;;  %v13019_v21 = vld [vmem:[#allocation2 + $0x378] ss:$20 sps:$4 sm:$0xff]  }
  0xce   :  { %1932 = vmatpush1.bf16.msra.mxu1 %v12930_v20  ;;  %1855 = vmatprep.subr.bf16.mxu0 %v12941_v23  ;;  %v13016_v20 = vld [vmem:[#allocation2 + $0x148] ss:$20 sps:$4 sm:$0xff]  }
  0xcf   :  { %1933 = vmatprep.subr.bf16.mxu1 %v12938_v22  ;;  %v13024_v22 = vld [vmem:[#allocation2 + $0x624] ss:$20 sps:$4 sm:$0xff]   ;;  %v13027_v23 = vld [vmem:[#allocation2 + $0x354] ss:$20 sps:$4 sm:$0xff]  }
  0xd1   :  { %1856 = vmatpush1.bf16.msra.mxu0 %v12939_v25  ;;  %v13025_v25 = vld [vmem:[#allocation2 + $0x350] ss:$20 sps:$4 sm:$0xff]  }
  0xd2   :  { %1934 = vmatpush1.bf16.msra.mxu1 %v12936_v24  ;;  %1857 = vmatprep.subr.bf16.mxu0 %v12947_v27  ;;  %v13022_v24 = vld [vmem:[#allocation2 + $0x620] ss:$20 sps:$4 sm:$0xff]  }
  0xd3   :  { %1935 = vmatprep.subr.bf16.mxu1 %v12944_v26  ;;  %v13030_v26 = vld [vmem:[#allocation2 + $0x5fc] ss:$20 sps:$4 sm:$0xff]   ;;  %v13033_v27 = vld [vmem:[#allocation2 + $0x32c] ss:$20 sps:$4 sm:$0xff]  }
  0xd5   :  { %1858 = vmatpush1.bf16.msra.mxu0 %v12945_v29  ;;  %v13031_v29 = vld [vmem:[#allocation2 + $0x328] ss:$20 sps:$4 sm:$0xff]  }
  0xd6   :  { %1936 = vmatpush1.bf16.msra.mxu1 %v12942_v28  ;;  %1859 = vmatprep.subr.bf16.mxu0 %v12953_v31  ;;  %v13028_v28 = vld [vmem:[#allocation2 + $0x5f8] ss:$20 sps:$4 sm:$0xff]  }
  0xd7   :  { %1937 = vmatprep.subr.bf16.mxu1 %v12950_v30  ;;  %v13036_v30 = vld [vmem:[#allocation2 + $0x5d4] ss:$20 sps:$4 sm:$0xff]   ;;  %v13039_v31 = vld [vmem:[#allocation2 + $0x304] ss:$20 sps:$4 sm:$0xff]  }
  0xd9   :  { %1860 = vmatpush1.bf16.msra.mxu0 %v12951_v35  ;;  %v13042_v35 = vld [vmem:[#allocation2 + $0x5ac] ss:$20 sps:$4 sm:$0xff]  }
  0xda   :  { %1938 = vmatpush1.bf16.msra.mxu1 %v12948_v34  ;;  %1861 = vmatprep.subr.bf16.mxu0 %v12959_v37  ;;  %v13037_v34 = vld [vmem:[#allocation2 + $0x300] ss:$20 sps:$4 sm:$0xff]   ;;  %v13040_v37 = vld [vmem:[#allocation2 + $0x5a8] ss:$20 sps:$4 sm:$0xff]  }
  0xdb   :  { %1939 = vmatprep.subr.bf16.mxu1 %v12956_v36  ;;  %v13045_v36 = vld [vmem:[#allocation2 + $0x2dc] ss:$20 sps:$4 sm:$0xff]  }
  0xdd   :  { %1862 = vmatpush1.bf16.msra.mxu0 %v12957_v39  ;;  %v13048_v39 = vld [vmem:[#allocation2 + $0x584] ss:$20 sps:$4 sm:$0xff]  }
  0xde   :  { %1940 = vmatpush1.bf16.msra.mxu1 %v12954_v38  ;;  %1863 = vmatprep.subr.bf16.mxu0 %v12965_v41  ;;  %v13043_v38 = vld [vmem:[#allocation2 + $0x2d8] ss:$20 sps:$4 sm:$0xff]   ;;  %v13046_v41 = vld [vmem:[#allocation2 + $0x580] ss:$20 sps:$4 sm:$0xff]  }
  0xdf   :  { %1941 = vmatprep.subr.bf16.mxu1 %v12962_v40  ;;  %v13051_v40 = vld [vmem:[#allocation2 + $0x2b4] ss:$20 sps:$4 sm:$0xff]  }
  0xe1   :  { %1864 = vmatpush2.bf16.msra.mxu0 %v12963_v43  ;;  %v13054_v43 = vld [vmem:[#allocation2 + $0x55c] ss:$20 sps:$4 sm:$0xff]  }
  0xe2   :  { %1942 = vmatpush1.bf16.msra.mxu1 %v12960_v42  ;;  %1865 = vmatprep.subr.bf16.mxu0 %v12971_v45  ;;  %v13049_v42 = vld [vmem:[#allocation2 + $0x2b0] ss:$20 sps:$4 sm:$0xff]   ;;  %v13052_v45 = vld [vmem:[#allocation2 + $0x558] ss:$20 sps:$4 sm:$0xff]  }
  0xe3   :  { %1943 = vmatprep.subr.bf16.mxu1 %v12968_v44  ;;  %v13057_v44 = vld [vmem:[#allocation2 + $0x28c] ss:$20 sps:$4 sm:$0xff]  }
  0xe5   :  { %1866 = vmatpush2.bf16.msra.mxu0 %v12969_v48  ;;  %v13060_v48 = vld [vmem:[#allocation2 + $0x534] ss:$20 sps:$4 sm:$0xff]  }
  0xe6   :  { %1944 = vmatpush1.bf16.msra.mxu1 %v12966_v46  ;;  %1867 = vmatprep.subr.bf16.mxu0 %v12977_v50  ;;  %v13055_v46 = vld [vmem:[#allocation2 + $0x288] ss:$20 sps:$4 sm:$0xff]   ;;  %v13058_v50 = vld [vmem:[#allocation2 + $0x530] ss:$20 sps:$4 sm:$0xff]  }
  0xe7   :  { %1945 = vmatprep.subr.bf16.mxu1 %v12974_v49  ;;  %v13063_v49 = vld [vmem:[#allocation2 + $0x4e4] ss:$20 sps:$4 sm:$0xff]  }
  0xe9   :  { %1868 = vmatpush2.bf16.msra.mxu0 %v12975_v53  ;;  %v13066_v53 = vld [vmem:[#allocation2 + $0x50c] ss:$20 sps:$4 sm:$0xff]  }
  0xea   :  { %1946 = vmatpush2.bf16.msra.mxu1 %v12972_v52  ;;  %1869 = vmatprep.subr.bf16.mxu0 %v12983_v55  ;;  %v13061_v52 = vld [vmem:[#allocation2 + $0x4e0] ss:$20 sps:$4 sm:$0xff]   ;;  %v13064_v55 = vld [vmem:[#allocation2 + $0x508] ss:$20 sps:$4 sm:$0xff]  }
  0xeb   :  { %1947 = vmatprep.subr.bf16.mxu1 %v12980_v54  ;;  %v13069_v54 = vld [vmem:[#allocation2 + $0x4bc] ss:$20 sps:$4 sm:$0xff]  }
  0xed   :  { %1870 = vmatpush2.bf16.msra.mxu0 %v12981_v57  ;;  %v13072_v57 = vld [vmem:[#allocation2 + $0x764] ss:$20 sps:$4 sm:$0xff]  }
  0xee   :  { %1948 = vmatpush2.bf16.msra.mxu1 %v12978_v56  ;;  %1871 = vmatprep.subr.bf16.mxu0 %v12989_v59  ;;  %v13067_v56 = vld [vmem:[#allocation2 + $0x4b8] ss:$20 sps:$4 sm:$0xff]   ;;  %v13070_v59 = vld [vmem:[#allocation2 + $0x760] ss:$20 sps:$4 sm:$0xff]  }
  0xef   :  { %1949 = vmatprep.subr.bf16.mxu1 %v12986_v58  ;;  %v13075_v58 = vld [vmem:[#allocation2 + $0x494] ss:$20 sps:$4 sm:$0xff]  }
  0xf1   :  { %1872 = vmatpush2.bf16.msra.mxu0 %v12987_v61  ;;  %v13078_v61 = vld [vmem:[#allocation2 + $0x73c] ss:$20 sps:$4 sm:$0xff]  }
  0xf2   :  { %1950 = vmatpush2.bf16.msra.mxu1 %v12984_v60  ;;  %1873 = vmatprep.subr.bf16.mxu0 %v12995_v63  ;;  %v13073_v60 = vld [vmem:[#allocation2 + $0x490] ss:$20 sps:$4 sm:$0xff]   ;;  %v13076_v63 = vld [vmem:[#allocation2 + $0x738] ss:$20 sps:$4 sm:$0xff]  }
  0xf3   :  { %1951 = vmatprep.subr.bf16.mxu1 %v12992_v62  ;;  %v13081_v62 = vld [vmem:[#allocation2 + $0x46c] ss:$20 sps:$4 sm:$0xff]  }
  0xf5   :  { %1874 = vmatpush2.bf16.msra.mxu0 %v12993_v1  ;;  %v13084_v1 = vld [vmem:[#allocation2 + $0x714] ss:$20 sps:$4 sm:$0xff]  }
  0xf6   :  { %1952 = vmatpush2.bf16.msra.mxu1 %v12990_v0  ;;  %1875 = vmatprep.subr.bf16.mxu0 %v13001_v3  ;;  %v13079_v0 = vld [vmem:[#allocation2 + $0x468] ss:$20 sps:$4 sm:$0xff]   ;;  %v13082_v3 = vld [vmem:[#allocation2 + $0x710] ss:$20 sps:$4 sm:$0xff]  }
  0xf7   :  { %1953 = vmatprep.subr.bf16.mxu1 %v12998_v2  ;;  %v13087_v2 = vld [vmem:[#allocation2 + $0x444] ss:$20 sps:$4 sm:$0xff]  }
  0xf9   :  { %1876 = vmatpush2.bf16.msra.mxu0 %v12999_v5  ;;  %v13090_v5 = vld [vmem:[#allocation2 + $0x6ec] ss:$20 sps:$4 sm:$0xff]  }
  0xfa   :  { %1954 = vmatpush2.bf16.msra.mxu1 %v12996_v4  ;;  %1877 = vmatprep.subr.bf16.mxu0 %v13007_v9  ;;  %v13085_v4 = vld [vmem:[#allocation2 + $0x440] ss:$20 sps:$4 sm:$0xff]   ;;  %v13088_v9 = vld [vmem:[#allocation2 + $0x6e8] ss:$20 sps:$4 sm:$0xff]  }
  0xfb   :  { %1955 = vmatprep.subr.bf16.mxu1 %v13004_v8  ;;  %v13093_v8 = vld [vmem:[#allocation2 + $0x41c] ss:$20 sps:$4 sm:$0xff]  }
  0xfd   :  { %1878 = vmatpush2.bf16.msra.mxu0 %v13005_v11  ;;  %v13096_v11 = vld [vmem:[#allocation2 + $0x6c4] ss:$20 sps:$4 sm:$0xff]  }
  0xfe   :  { %1956 = vmatpush2.bf16.msra.mxu1 %v13002_v10  ;;  %1970 = vmatprep.subr.bf16.mxu0 %v13015_v14  ;;  %v13091_v10 = vld [vmem:[#allocation2 + $0x418] ss:$20 sps:$4 sm:$0xff]   ;;  %v13094_v14 = vld [vmem:[#allocation2 + $0x6c0] ss:$20 sps:$4 sm:$0xff]  }
  0xff   :  { %1957 = vmatprep.subr.bf16.mxu1 %v13011_v12  ;;  %v13099_v12 = vld [vmem:[#allocation2 + $0x3f4] ss:$20 sps:$4 sm:$0xff]  }
 0x100   :  { %1880 = vmatmul.mubr.bf16.vlgmr.msra.gmra.mxu0 %v15015_v16 }
 0x101   :  { %1971 = vmatpush1.bf16.msra.mxu0 %v13013_v17  ;;  %2002 = vmatprep.mubr.bf16.mxu0 %v14987_v51  ;;  %v13102_v17 = vld [vmem:[#allocation2 + $0x69c] ss:$20 sps:$4 sm:$0xff]  }
 0x102   :  { %1958 = vmatpush2.bf16.msra.mxu1 %v13009_v15  ;;  %1972 = vmatprep.subr.bf16.mxu0 %v13021_v19  ;;  %v13097_v15 = vld [vmem:[#allocation2 + $0x3f0] ss:$20 sps:$4 sm:$0xff]   ;;  %v13100_v19 = vld [vmem:[#allocation2 + $0x698] ss:$20 sps:$4 sm:$0xff]  }
 0x103   :  { %1959 = vmatprep.subr.bf16.mxu1 %v13018_v18  ;;  %v13105_v18 = vld [vmem:[#allocation2 + $0x3cc] ss:$20 sps:$4 sm:$0xff]  }
 0x105   :  { %1973 = vmatpush1.bf16.msra.mxu0 %v13019_v21  ;;  %v13108_v21 = vld [vmem:[#allocation2 + $0x674] ss:$20 sps:$4 sm:$0xff]  }
 0x106   :  { %1960 = vmatpush2.bf16.msra.mxu1 %v13016_v20  ;;  %1974 = vmatprep.subr.bf16.mxu0 %v13027_v23  ;;  %v13103_v20 = vld [vmem:[#allocation2 + $0x3c8] ss:$20 sps:$4 sm:$0xff]   ;;  %v13106_v23 = vld [vmem:[#allocation2 + $0x670] ss:$20 sps:$4 sm:$0xff]  }
 0x107   :  { %2011 = vmatprep.subr.bf16.mxu1 %v13024_v22  ;;  %v13109_v22 = vld [vmem:[#allocation2 + $0x268] ss:$20 sps:$4 sm:$0xff]  }
 0x109   :  { %1962 = vmatmul.mubr.bf16.vlgmr.msra.gmra.mxu1 %v14991_v6  ;;  %1975 = vmatpush1.bf16.msra.mxu0 %v13025_v25  ;;  %v13113_v25 = vld [vmem:[#allocation2 + $0x64c] ss:$20 sps:$4 sm:$0xff]  }
 0x10a   :  { %2012 = vmatpush1.bf16.msra.mxu1 %v13022_v24  ;;  %1976 = vmatprep.subr.bf16.mxu0 %v13033_v27  ;;  %v13110_v24 = vld [vmem:[#allocation2 + $0x128] ss:$20 sps:$4 sm:$0xff]  }
 0x10b   :  { %2013 = vmatprep.subr.bf16.mxu1 %v13030_v26  ;;  %2043 = vmatprep.mubr.bf16.mxu1 %v15010_v33  ;;  %v13114_v26 = vld [vmem:[#allocation2 + $0x240] ss:$20 sps:$4 sm:$0xff]   ;;  %v13111_v27 = vld [vmem:[#allocation2 + $0x648] ss:$20 sps:$4 sm:$0xff]  }
 0x10d   :  { %1977 = vmatpush1.bf16.msra.mxu0 %v13031_v29  ;;  %v13118_v29 = vld [vmem:[#allocation2 + $0x78c] ss:$20 sps:$4 sm:$0xff]  }
 0x10e   :  { %2014 = vmatpush1.bf16.msra.mxu1 %v13028_v28  ;;  %1978 = vmatprep.subr.bf16.mxu0 %v13039_v31  ;;  %v13115_v28 = vld [vmem:[#allocation2 + $0x100] ss:$20 sps:$4 sm:$0xff]   ;;  %v13116_v31 = vld [vmem:[#allocation2 + $0x788] ss:$20 sps:$4 sm:$0xff]  }
 0x10f   :  { %2015 = vmatprep.subr.bf16.mxu1 %v13036_v30  ;;  %v13119_v30 = vld [vmem:[#allocation2 + $0x218] ss:$20 sps:$4 sm:$0xff]  }
 0x111   :  { %1979 = vmatpush1.bf16.msra.mxu0 %v13037_v34  ;;  %v13121_v34 = vld [vmem:[#allocation2 + $0x1f0] ss:$20 sps:$4 sm:$0xff]  }
 0x112   :  { %2016 = vmatpush1.bf16.msra.mxu1 %v13034_v32  ;;  %1980 = vmatprep.subr.bf16.mxu0 %v13045_v36  ;;  %v13120_v32 = vld [vmem:[#allocation2 + $0xd8] ss:$20 sps:$4 sm:$0xff]   ;;  %v13122_v36 = vld [vmem:[#allocation2 + $0xb0] ss:$20 sps:$4 sm:$0xff]  }
 0x113   :  { %2017 = vmatprep.subr.bf16.mxu1 %v13042_v35  ;;  %v13123_v35 = vld [vmem:[#allocation2 + $0x4e8] ss:$20 sps:$4 sm:$0xff]  }
 0x115   :  { %1981 = vmatpush1.bf16.msra.mxu0 %v13043_v38  ;;  %v13124_v38 = vld [vmem:[#allocation2 + $0x3a8] ss:$20 sps:$4 sm:$0xff]  }
 0x116   :  { %2018 = vmatpush1.bf16.msra.mxu1 %v13040_v37  ;;  %1982 = vmatprep.subr.bf16.mxu0 %v13051_v40  ;;  %v13125_v37 = vld [vmem:[#allocation2 + $0x1c8] ss:$20 sps:$4 sm:$0xff]   ;;  %v13127_v40 = vld [vmem:[#allocation2 + $0x4c0] ss:$20 sps:$4 sm:$0xff]  }
 0x117   :  { %2019 = vmatprep.subr.bf16.mxu1 %v13048_v39  ;;  %v13126_v39 = vld [vmem:[#allocation2 + $0x88] ss:$20 sps:$4 sm:$0xff]  }
 0x119   :  { %1983 = vmatpush1.bf16.msra.mxu0 %v13049_v42  ;;  %v15028_v42 = vld [vmem:[%s15391_s0 + $0x18] ss:$0 sps:$4 sm:$0xff]  }
 0x11a   :  { %2020 = vmatpush1.bf16.msra.mxu1 %v13046_v41  ;;  %1984 = vmatprep.subr.bf16.mxu0 %v13057_v44  ;;  %v13129_v41 = vld [vmem:[#allocation2 + $0x1a0] ss:$20 sps:$4 sm:$0xff]  }
 0x11b   :  { %2021 = vmatprep.subr.bf16.mxu1 %v13054_v43  ;;  %v13128_v43 = vld [vmem:[#allocation2 + $0x380] ss:$20 sps:$4 sm:$0xff]  }
 0x11c   :  { %v13130_v44 = vld [vmem:[#allocation2 + $0x60] ss:$20 sps:$4 sm:$0xff]  }
 0x11d   :  { %1985 = vmatpush1.bf16.msra.mxu0 %v13055_v46  ;;  %v13133_v46 = vld [vmem:[#allocation2 + $0x178] ss:$20 sps:$4 sm:$0xff]  }
 0x11e   :  { %2022 = vmatpush1.bf16.msra.mxu1 %v13052_v45  ;;  %1986 = vmatprep.subr.bf16.mxu0 %v13063_v49  ;;  %v13131_v45 = vld [vmem:[#allocation2 + $0x498] ss:$20 sps:$4 sm:$0xff]  }
 0x11f   :  { %2023 = vmatprep.subr.bf16.mxu1 %v13060_v48  ;;  %v13132_v48 = vld [vmem:[#allocation2 + $0x358] ss:$20 sps:$4 sm:$0xff]  }
 0x120   :  { %v13134_v49 = vld [vmem:[#allocation2 + $0x38] ss:$20 sps:$4 sm:$0xff]  }
 0x121   :  { %1987 = vmatpush2.bf16.msra.mxu0 %v13061_v52  ;;  %v13137_v52 = vld [vmem:[#allocation2 + $0x150] ss:$20 sps:$4 sm:$0xff]  }
 0x122   :  { %2024 = vmatpush1.bf16.msra.mxu1 %v13058_v50  ;;  %1988 = vmatprep.subr.bf16.mxu0 %v13069_v54  ;;  %v13135_v50 = vld [vmem:[#allocation2 + $0x470] ss:$20 sps:$4 sm:$0xff]  }
 0x123   :  { %2025 = vmatprep.subr.bf16.mxu1 %v13066_v53  ;;  %v13136_v53 = vld [vmem:[#allocation2 + $0x330] ss:$20 sps:$4 sm:$0xff]  }
 0x124   :  { %v13138_v54 = vld [vmem:[#allocation2 + $0x10] ss:$20 sps:$4 sm:$0xff]  }
 0x125   :  { %1989 = vmatpush2.bf16.msra.mxu0 %v13067_v56  ;;  %v13141_v56 = vld [vmem:[#allocation2 + $0x768] ss:$20 sps:$4 sm:$0xff]  }
 0x126   :  { %2026 = vmatpush1.bf16.msra.mxu1 %v13064_v55  ;;  %1990 = vmatprep.subr.bf16.mxu0 %v13075_v58  ;;  %v13139_v55 = vld [vmem:[#allocation2 + $0x448] ss:$20 sps:$4 sm:$0xff]  }
 0x127   :  { %2027 = vmatprep.subr.bf16.mxu1 %v13072_v57  ;;  %v13140_v57 = vld [vmem:[#allocation2 + $0x308] ss:$20 sps:$4 sm:$0xff]  }
 0x128   :  { %v13142_v58 = vld [vmem:[#allocation2 + $0x628] ss:$20 sps:$4 sm:$0xff]  }
 0x129   :  { %1991 = vmatpush2.bf16.msra.mxu0 %v13073_v60  ;;  %v13145_v60 = vld [vmem:[#allocation2 + $0x740] ss:$20 sps:$4 sm:$0xff]  }
 0x12a   :  { %2028 = vmatpush2.bf16.msra.mxu1 %v13070_v59  ;;  %1992 = vmatprep.subr.bf16.mxu0 %v13081_v62  ;;  %v13143_v59 = vld [vmem:[#allocation2 + $0x420] ss:$20 sps:$4 sm:$0xff]  }
 0x12b   :  { %2029 = vmatprep.subr.bf16.mxu1 %v13078_v61  ;;  %v13144_v61 = vld [vmem:[#allocation2 + $0x2e0] ss:$20 sps:$4 sm:$0xff]  }
 0x12c   :  { %v13146_v62 = vld [vmem:[#allocation2 + $0x600] ss:$20 sps:$4 sm:$0xff]  }
 0x12d   :  { %1993 = vmatpush2.bf16.msra.mxu0 %v13079_v0  ;;  %v13149_v0 = vld [vmem:[#allocation2 + $0x718] ss:$20 sps:$4 sm:$0xff]  }
 0x12e   :  { %2030 = vmatpush2.bf16.msra.mxu1 %v13076_v63  ;;  %1994 = vmatprep.subr.bf16.mxu0 %v13087_v2  ;;  %v13147_v63 = vld [vmem:[#allocation2 + $0x3f8] ss:$20 sps:$4 sm:$0xff]  }
 0x12f   :  { %2031 = vmatprep.subr.bf16.mxu1 %v13084_v1  ;;  %v13148_v1 = vld [vmem:[#allocation2 + $0x2b8] ss:$20 sps:$4 sm:$0xff]  }
 0x130   :  { %v13150_v2 = vld [vmem:[#allocation2 + $0x5d8] ss:$20 sps:$4 sm:$0xff]  }
 0x131   :  { %1995 = vmatpush2.bf16.msra.mxu0 %v13085_v4  ;;  %v13153_v4 = vld [vmem:[#allocation2 + $0x6f0] ss:$20 sps:$4 sm:$0xff]  }
 0x132   :  { %2032 = vmatpush2.bf16.msra.mxu1 %v13082_v3  ;;  %1996 = vmatprep.subr.bf16.mxu0 %v13093_v8  ;;  %v13151_v3 = vld [vmem:[#allocation2 + $0x3d0] ss:$20 sps:$4 sm:$0xff]  }
 0x133   :  { %2033 = vmatprep.subr.bf16.mxu1 %v13090_v5  ;;  %v13152_v5 = vld [vmem:[#allocation2 + $0x290] ss:$20 sps:$4 sm:$0xff]  }
 0x134   :  { %v13154_v8 = vld [vmem:[#allocation2 + $0x5b0] ss:$20 sps:$4 sm:$0xff]  }
 0x135   :  { %1997 = vmatpush2.bf16.msra.mxu0 %v13091_v10  ;;  %v13155_v10 = vld [vmem:[#allocation2 + $0x790] ss:$20 sps:$4 sm:$0xff]  }
 0x136   :  { %2034 = vmatpush2.bf16.msra.mxu1 %v13088_v9  ;;  %1998 = vmatprep.subr.bf16.mxu0 %v13099_v12  ;;  %v13156_v9 = vld [vmem:[#allocation2 + $0x6c8] ss:$20 sps:$4 sm:$0xff]   ;;  %v14887_v12 = vmov 0.0  }
 0x137   :  { %2035 = vmatprep.subr.bf16.mxu1 %v13096_v11  ;;  %v13157_v11 = vld [vmem:[#allocation2 + $0x588] ss:$20 sps:$4 sm:$0xff]  }
 0x139   :  { %1999 = vmatpush2.bf16.msra.mxu0 %v13097_v15  ;;  %v13162_v15 = vld [vmem:[#allocation2 + $0x8c4] ss:$20 sps:$4 sm:$0xff]  }
 0x13a   :  { %2036 = vmatpush2.bf16.msra.mxu1 %v13094_v14  ;;  %2000 = vmatprep.subr.bf16.mxu0 %v13105_v18  ;;  %v13158_v14 = vld [vmem:[#allocation2 + $0x6a0] ss:$20 sps:$4 sm:$0xff]   ;;  %v13163_v18 = vld [vmem:[#allocation2 + $0x678] ss:$20 sps:$4 sm:$0xff]  }
 0x13b   :  { %2037 = vmatprep.subr.bf16.mxu1 %v13102_v17  ;;  %v13159_v17 = vld [vmem:[#allocation2 + $0x560] ss:$20 sps:$4 sm:$0xff]  }
 0x13d   :  { %2001 = vmatpush2.bf16.msra.mxu0 %v13103_v20  ;;  %v13164_v20 = vld [vmem:[#allocation2 + $0x538] ss:$20 sps:$4 sm:$0xff]  }
 0x13e   :  { %2038 = vmatpush2.bf16.msra.mxu1 %v13100_v19  ;;  %12431 = vmatprep.subr.bf16.mxu0 %v13109_v22  ;;  %v13160_v19 = vld [vmem:[#allocation2 + $0x8c0] ss:$20 sps:$4 sm:$0xff]   ;;  %v13168_v22 = vld [vmem:[#allocation2 + $0x650] ss:$20 sps:$4 sm:$0xff]  }
 0x13f   :  { %2039 = vmatprep.subr.bf16.mxu1 %v13108_v21  ;;  %v13167_v21 = vld [vmem:[#allocation2 + $0x89c] ss:$20 sps:$4 sm:$0xff]  }
 0x140   :  { %2003 = vmatmul.mubr.bf16.vlgmr.msra.gmra.mxu0 %v14993_v7 }
 0x141   :  { %12432 = vmatpush3.bf16.msra.mxu0 %v13110_v24  ;;  %2125 = vmatprep.mubr.bf16.mxu0 %v14982_v47  ;;  %v13169_v24 = vld [vmem:[#allocation2 + $0x510] ss:$20 sps:$4 sm:$0xff]  }
 0x142   :  { %2040 = vmatpush2.bf16.msra.mxu1 %v13106_v23  ;;  %12433 = vmatprep.subr.bf16.mxu0 %v13114_v26  ;;  %v13165_v23 = vld [vmem:[#allocation2 + $0x898] ss:$20 sps:$4 sm:$0xff]  }
 0x143   :  { %2041 = vmatprep.subr.bf16.mxu1 %v13113_v25  ;;  %v13172_v25 = vld [vmem:[#allocation2 + $0x874] ss:$20 sps:$4 sm:$0xff]   ;;  %v13175_v26 = vld [vmem:[#allocation2 + $0xb44] ss:$20 sps:$4 sm:$0xff]  }
 0x145   :  { %12434 = vmatpush3.bf16.msra.mxu0 %v13115_v28  ;;  %v13173_v28 = vld [vmem:[#allocation2 + $0xb40] ss:$20 sps:$4 sm:$0xff]  }
 0x146   :  { %2042 = vmatpush2.bf16.msra.mxu1 %v13111_v27  ;;  %12435 = vmatprep.subr.bf16.mxu0 %v13119_v30  ;;  %v13170_v27 = vld [vmem:[#allocation2 + $0x870] ss:$20 sps:$4 sm:$0xff]  }
 0x147   :  { %2066 = vmatprep.subr.bf16.mxu1 %v13118_v29  ;;  %v13178_v29 = vld [vmem:[#allocation2 + $0x84c] ss:$20 sps:$4 sm:$0xff]   ;;  %v13181_v30 = vld [vmem:[#allocation2 + $0xb1c] ss:$20 sps:$4 sm:$0xff]  }
 0x149   :  { %2044 = vmatmul.mubr.bf16.vlgmr.msra.gmra.mxu1 %v15015_v16  ;;  %12436 = vmatpush3.bf16.msra.mxu0 %v13120_v32 }
 0x14a   :  { %2067 = vmatpush1.bf16.msra.mxu1 %v13116_v31  ;;  %12437 = vmatprep.subr.bf16.mxu0 %v13121_v34  ;;  %v13176_v34 = vld [vmem:[#allocation2 + $0x848] ss:$20 sps:$4 sm:$0xff]  }
 0x14b   :  { %2084 = vmatprep.mubr.bf16.mxu1 %v14886_v13  ;;  %12453 = vmatprep.subr.bf16.mxu1 %v13123_v35  ;;  %v13179_v35 = vld [vmem:[#allocation2 + $0xb18] ss:$20 sps:$4 sm:$0xff]  }
 0x14d   :  { %12438 = vmatpush3.bf16.msra.mxu0 %v13122_v36 }
 0x14e   :  { %12439 = vmatprep.subr.bf16.mxu0 %v13125_v37  ;;  %v13184_v37 = vld [vmem:[#allocation2 + $0x824] ss:$20 sps:$4 sm:$0xff]  }
 0x151   :  { %11361 = vmatmul.mubr.msk.bf16.vlgmr.msra.gmra.mxu1 %vm1761_vm0, %v15028_v42  ;;  %12440 = vmatpush3.bf16.msra.mxu0 %v13126_v39 }
 0x152   :  { %12454 = vmatpush3.bf16.msra.mxu1 %v13124_v38  ;;  %12441 = vmatprep.subr.bf16.mxu0 %v13129_v41 }
 0x153   :  { %12455 = vmatprep.subr.bf16.mxu1 %v13127_v40  ;;  %2165 = vmatprep.mubr.bf16.mxu1 %v14987_v51  ;;  %v13187_v40 = vld [vmem:[#allocation2 + $0xaf4] ss:$20 sps:$4 sm:$0xff]  }
 0x155   :  { %12442 = vmatpush3.bf16.msra.mxu0 %v13130_v44  ;;  %v13182_v44 = vld [vmem:[#allocation2 + $0x820] ss:$20 sps:$4 sm:$0xff]  }
 0x156   :  { %12456 = vmatpush3.bf16.msra.mxu1 %v13128_v43  ;;  %12443 = vmatprep.subr.bf16.mxu0 %v13133_v46 }
 0x157   :  { %12457 = vmatprep.subr.bf16.mxu1 %v13131_v45  ;;  %v13185_v45 = vld [vmem:[#allocation2 + $0xaf0] ss:$20 sps:$4 sm:$0xff]  }
 0x159   :  { %12444 = vmatpush3.bf16.msra.mxu0 %v13134_v49 }
 0x15a   :  { %12458 = vmatpush3.bf16.msra.mxu1 %v13132_v48  ;;  %12445 = vmatprep.subr.bf16.mxu0 %v13137_v52  ;;  %v13190_v48 = vld [vmem:[#allocation2 + $0x7fc] ss:$20 sps:$4 sm:$0xff]  }
 0x15b   :  { %12459 = vmatprep.subr.bf16.mxu1 %v13135_v50  ;;  %v13193_v50 = vld [vmem:[#allocation2 + $0xacc] ss:$20 sps:$4 sm:$0xff]  }
 0x15d   :  { %12446 = vmatpush3.bf16.msra.mxu0 %v13138_v54  ;;  %v13188_v54 = vld [vmem:[#allocation2 + $0x7f8] ss:$20 sps:$4 sm:$0xff]  }
 0x15e   :  { %12460 = vmatpush3.bf16.msra.mxu1 %v13136_v53  ;;  %12475 = vmatprep.subr.bf16.mxu0 %v13141_v56  ;;  %v13196_v56 = vld [vmem:[#allocation2 + $0x7d4] ss:$20 sps:$4 sm:$0xff]  }
 0x15f   :  { %12461 = vmatprep.subr.bf16.mxu1 %v13139_v55  ;;  %v13191_v55 = vld [vmem:[#allocation2 + $0xac8] ss:$20 sps:$4 sm:$0xff]  }
 0x160   :  { %2126 = vmatmul.mubr.bf16.vlgmr.msra.gmra.mxu0 %v14991_v6 }
 0x161   :  { %12476 = vmatpush3.bf16.msra.mxu0 %v13142_v58  ;;  %2205 = vmatprep.mubr.bf16.mxu0 %v15010_v33  ;;  %v13199_v58 = vld [vmem:[#allocation2 + $0xaa4] ss:$20 sps:$4 sm:$0xff]  }
 0x162   :  { %12462 = vmatpush3.bf16.msra.mxu1 %v13140_v57  ;;  %12477 = vmatprep.subr.bf16.mxu0 %v13145_v60  ;;  %v13194_v60 = vld [vmem:[#allocation2 + $0x7d0] ss:$20 sps:$4 sm:$0xff]  }
 0x163   :  { %12463 = vmatprep.subr.bf16.mxu1 %v13143_v59 }
 0x165   :  { %12478 = vmatpush3.bf16.msra.mxu0 %v13146_v62  ;;  %v13202_v62 = vld [vmem:[#allocation2 + $0x7ac] ss:$20 sps:$4 sm:$0xff]  }
 0x166   :  { %12464 = vmatpush3.bf16.msra.mxu1 %v13144_v61  ;;  %12479 = vmatprep.subr.bf16.mxu0 %v13149_v0  ;;  %v13197_v61 = vld [vmem:[#allocation2 + $0xaa0] ss:$20 sps:$4 sm:$0xff]   ;;  %v13205_v0 = vld [vmem:[#allocation2 + $0xa7c] ss:$20 sps:$4 sm:$0xff]  }
 0x167   :  { %12465 = vmatprep.subr.bf16.mxu1 %v13147_v63 }
 0x169   :  { %12480 = vmatpush3.bf16.msra.mxu0 %v13150_v2  ;;  %v13203_v2 = vld [vmem:[#allocation2 + $0xa78] ss:$20 sps:$4 sm:$0xff]  }
 0x16a   :  { %12466 = vmatpush3.bf16.msra.mxu1 %v13148_v1  ;;  %12481 = vmatprep.subr.bf16.mxu0 %v13153_v4  ;;  %v13200_v1 = vld [vmem:[#allocation2 + $0x7a8] ss:$20 sps:$4 sm:$0xff]  }
 0x16b   :  { %12467 = vmatprep.subr.bf16.mxu1 %v13151_v3  ;;  %v13208_v3 = vld [vmem:[#allocation2 + $0xa04] ss:$20 sps:$4 sm:$0xff]   ;;  %v13211_v4 = vld [vmem:[#allocation2 + $0xa54] ss:$20 sps:$4 sm:$0xff]  }
 0x16d   :  { %12482 = vmatpush3.bf16.msra.mxu0 %v13154_v8  ;;  %v13209_v8 = vld [vmem:[#allocation2 + $0xa50] ss:$20 sps:$4 sm:$0xff]  }
 0x16e   :  { %12468 = vmatpush3.bf16.msra.mxu1 %v13152_v5  ;;  %12483 = vmatprep.subr.bf16.mxu0 %v13156_v9  ;;  %v13206_v5 = vld [vmem:[#allocation2 + $0xa00] ss:$20 sps:$4 sm:$0xff]   ;;  %v13214_v9 = vld [vmem:[#allocation2 + $0x9dc] ss:$20 sps:$4 sm:$0xff]  }
 0x16f   :  { %12739 = vmatprep.subr.bf16.mxu1 %v14887_v12 }
 0x171   :  { %2166 = vmatmul.mubr.bf16.vlgmr.msra.gmra.mxu1 %v14993_v7  ;;  %12484 = vmatpush3.bf16.msra.mxu0 %v13157_v11  ;;  %v13212_v11 = vld [vmem:[#allocation2 + $0x9d8] ss:$20 sps:$4 sm:$0xff]  }
 0x172   :  { %12740 = vmatpush3.bf16.msra.mxu1 %v13155_v10  ;;  %12485 = vmatprep.subr.bf16.mxu0 %v13158_v14  ;;  %v13217_v10 = vld [vmem:[#allocation2 + $0xa2c] ss:$20 sps:$4 sm:$0xff]   ;;  %v13215_v14 = vld [vmem:[#allocation2 + $0xa28] ss:$20 sps:$4 sm:$0xff]  }
 0x173   :  { %12741 = vmatprep.mubr.msk.bf16.mxu1 %vm14888_vm1, %v14887_v12  ;;  %3822 = vmatprep.subr.bf16.mxu1 %v13162_v15  ;;  %v13220_v15 = vld [vmem:[#allocation2 + $0x9b4] ss:$20 sps:$4 sm:$0xff]  }
 0x175   :  { %12486 = vmatpush3.bf16.msra.mxu0 %v13159_v17  ;;  %v13223_v17 = vld [vmem:[#allocation2 + $0xc84] ss:$20 sps:$4 sm:$0xff]  }
 0x176   :  { %12487 = vmatprep.subr.bf16.mxu0 %v13163_v18  ;;  %v13218_v18 = vld [vmem:[#allocation2 + $0x9b0] ss:$20 sps:$4 sm:$0xff]  }
 0x179   :  { %12742 = vmatmul.mubr.msk.bf16.vlgmr.msra.gmra.mxu1 %vm1761_vm0, %v15028_v42  ;;  %12488 = vmatpush3.bf16.msra.mxu0 %v13164_v20  ;;  %v13226_v20 = vld [vmem:[#allocation2 + $0x98c] ss:$20 sps:$4 sm:$0xff]  }
 0x17a   :  { %3823 = vmatpush1.bf16.msra.mxu1 %v13160_v19  ;;  %12489 = vmatprep.subr.bf16.mxu0 %v13168_v22  ;;  %v13221_v19 = vld [vmem:[#allocation2 + $0xc80] ss:$20 sps:$4 sm:$0xff]   ;;  %v13224_v22 = vld [vmem:[#allocation2 + $0x988] ss:$20 sps:$4 sm:$0xff]  }
 0x17b   :  { %3824 = vmatprep.subr.bf16.mxu1 %v13167_v21  ;;  %3854 = vmatprep.mubr.bf16.mxu1 %v14982_v47  ;;  %v13229_v21 = vld [vmem:[#allocation2 + $0xc5c] ss:$20 sps:$4 sm:$0xff]  }
 0x17d   :  { %12490 = vmatpush3.bf16.msra.mxu0 %v13169_v24  ;;  %v13232_v24 = vld [vmem:[#allocation2 + $0x964] ss:$20 sps:$4 sm:$0xff]  }
 0x17e   :  { %3825 = vmatpush1.bf16.msra.mxu1 %v13165_v23  ;;  %3863 = vmatprep.subr.bf16.mxu0 %v13175_v26  ;;  %v13227_v23 = vld [vmem:[#allocation2 + $0xc58] ss:$20 sps:$4 sm:$0xff]   ;;  %v13230_v26 = vld [vmem:[#allocation2 + $0x960] ss:$20 sps:$4 sm:$0xff]  }
 0x17f   :  { %3826 = vmatprep.subr.bf16.mxu1 %v13172_v25  ;;  %v13235_v25 = vld [vmem:[#allocation2 + $0xc34] ss:$20 sps:$4 sm:$0xff]  }
 0x180   :  { %v1799_v31 = vpop.f32.mrf.mxu0  ;;  %2206 = vmatmul.mubr.bf16.vlgmr.msra.gmra.mxu0 %v15015_v16 }
 0x181   :  { %v1840_v32 = vpop.f32.mrf.mxu1  ;;  %3864 = vmatpush1.bf16.msra.mxu0 %v13173_v28  ;;  %3895 = vmatprep.mubr.bf16.mxu0 %v14987_v51  ;;  %v13238_v28 = vld [vmem:[#allocation2 + $0x93c] ss:$20 sps:$4 sm:$0xff]  }
 0x182   :  { %3827 = vmatpush1.bf16.msra.mxu1 %v13170_v27  ;;  %v15043_v36 = vadd.f32 %v1840_v32, %v1799_v31  ;;  %v1801_v38 = vpop.f32.mrf.mxu0  ;;  %3865 = vmatprep.subr.bf16.mxu0 %v13181_v30  ;;  %v13233_v27 = vld [vmem:[#allocation2 + $0xc30] ss:$20 sps:$4 sm:$0xff]   ;;  %v13236_v30 = vld [vmem:[#allocation2 + $0x938] ss:$20 sps:$4 sm:$0xff]   ;;  %v13239_v31 = vld [vmem:[#allocation2 + $0xc08] ss:$20 sps:$4 sm:$0xff]  }
 0x183   :  { %3828 = vmatprep.subr.bf16.mxu1 %v13178_v29  ;;  %v1842_v39 = vpop.f32.mrf.mxu1  ;;  %v13241_v29 = vld [vmem:[#allocation2 + $0xc0c] ss:$20 sps:$4 sm:$0xff]   ;;  %v13244_v32 = vld [vmem:[#allocation2 + $0x914] ss:$20 sps:$4 sm:$0xff]  }
 0x184   :  { %v15045_v41 = vadd.f32 %v1842_v39, %v1801_v38  ;;  %v1803_v46 = vpop.f32.mrf.mxu0  ;;  %v13250_v38 = vld [vmem:[#allocation2 + $0x8ec] ss:$20 sps:$4 sm:$0xff]   ;;  %v13253_v39 = vld [vmem:[#allocation2 + $0xbbc] ss:$20 sps:$4 sm:$0xff]  }
 0x185   :  { %v1844_v43 = vpop.f32.mrf.mxu1  ;;  %3866 = vmatpush1.bf16.msra.mxu0 %v13179_v35  ;;  %v13242_v35 = vld [vmem:[#allocation2 + $0x910] ss:$20 sps:$4 sm:$0xff]   ;;  %v13254_v46 = vld [vmem:[#allocation2 + $0xdc0] ss:$20 sps:$4 sm:$0xff]  }
 0x186   :  { %3829 = vmatpush1.bf16.msra.mxu1 %v13176_v34  ;;  %3867 = vmatprep.subr.bf16.mxu0 %v13187_v40  ;;  %v1804_v52 = vpop.f32.mrf.mxu0  ;;  %v13247_v34 = vld [vmem:[#allocation2 + $0xbe4] ss:$20 sps:$4 sm:$0xff]   ;;  %v13248_v40 = vld [vmem:[#allocation2 + $0x8e8] ss:$20 sps:$4 sm:$0xff]  }
 0x187   :  { %3830 = vmatprep.subr.bf16.mxu1 %v13184_v37  ;;  %v1845_v49 = vpop.f32.mrf.mxu1  ;;  %v13245_v37 = vld [vmem:[#allocation2 + $0xbe0] ss:$20 sps:$4 sm:$0xff]   ;;  %v13251_v43 = vld [vmem:[#allocation2 + $0xbb8] ss:$20 sps:$4 sm:$0xff]  }
 0x188   :  { %v13262_v49 = vld [vmem:[#allocation2 + $0xd9c] ss:$20 sps:$4 sm:$0xff]   ;;  %v13260_v52 = vld [vmem:[#allocation2 + $0xd98] ss:$20 sps:$4 sm:$0xff]  }
 0x189   :  { %v15048_v53 = vpop.f32.mrf.mxu1  ;;  %3868 = vmatpush1.bf16.msra.mxu0 %v13185_v45  ;;  %v13259_v45 = vld [vmem:[#allocation2 + $0xb94] ss:$20 sps:$4 sm:$0xff]  }
 0x18a   :  { %3831 = vmatpush1.bf16.msra.mxu1 %v13182_v44  ;;  %3869 = vmatprep.subr.bf16.mxu0 %v13193_v50  ;;  %v13256_v44 = vld [vmem:[#allocation2 + $0xdc4] ss:$20 sps:$4 sm:$0xff]   ;;  %v13265_v50 = vld [vmem:[#allocation2 + $0xb6c] ss:$20 sps:$4 sm:$0xff]  }
 0x18b   :  { %3832 = vmatprep.subr.bf16.mxu1 %v13190_v48  ;;  %v15050_v57 = vpop.f32.mrf.mxu1  ;;  %v13257_v48 = vld [vmem:[#allocation2 + $0xb90] ss:$20 sps:$4 sm:$0xff]  }
 0x18d   :  { %v1926_v59 = vpop.f32.mrf.mxu1  ;;  %3870 = vmatpush1.bf16.msra.mxu0 %v13191_v55  ;;  %v13268_v55 = vld [vmem:[#allocation2 + $0xd74] ss:$20 sps:$4 sm:$0xff]  }
 0x18e   :  { %3833 = vmatpush1.bf16.msra.mxu1 %v13188_v54  ;;  %3871 = vmatprep.subr.bf16.mxu0 %v13199_v58  ;;  %v13263_v54 = vld [vmem:[#allocation2 + $0xb68] ss:$20 sps:$4 sm:$0xff]   ;;  %v13266_v58 = vld [vmem:[#allocation2 + $0xd70] ss:$20 sps:$4 sm:$0xff]   ;;  %v13271_v59 = vld [vmem:[#allocation2 + $0xd4c] ss:$20 sps:$4 sm:$0xff]  }
 0x18f   :  { %3834 = vmatprep.subr.bf16.mxu1 %v13196_v56  ;;  %v1927_v63 = vpop.f32.mrf.mxu1  ;;  %v13274_v56 = vld [vmem:[#allocation2 + $0xf2c] ss:$20 sps:$4 sm:$0xff]  }
 0x191   :  { %3872 = vmatpush1.bf16.msra.mxu0 %v13197_v61  ;;  %v13280_v61 = vld [vmem:[#allocation2 + $0x8cc] ss:$20 sps:$4 sm:$0xff]  }
 0x192   :  { %3835 = vmatpush1.bf16.msra.mxu1 %v13194_v60  ;;  %3873 = vmatprep.subr.bf16.mxu0 %v13205_v0  ;;  %v13272_v60 = vld [vmem:[#allocation2 + $0xf28] ss:$20 sps:$4 sm:$0xff]  }
 0x193   :  { %3836 = vmatprep.subr.bf16.mxu1 %v13202_v62  ;;  %v13269_v0 = vld [vmem:[#allocation2 + $0xd48] ss:$20 sps:$4 sm:$0xff]  }
 0x195   :  { %3874 = vmatpush1.bf16.msra.mxu0 %v13203_v2  ;;  %v13277_v2 = vld [vmem:[#allocation2 + $0xd24] ss:$20 sps:$4 sm:$0xff]  }
 0x196   :  { %3837 = vmatpush1.bf16.msra.mxu1 %v13200_v1  ;;  %3875 = vmatprep.subr.bf16.mxu0 %v13211_v4 }
 0x197   :  { %3838 = vmatprep.subr.bf16.mxu1 %v13208_v3 }
 0x199   :  { %3876 = vmatpush1.bf16.msra.mxu0 %v13209_v8 }
 0x19a   :  { %3839 = vmatpush2.bf16.msra.mxu1 %v13206_v5  ;;  %3877 = vmatprep.subr.bf16.mxu0 %v13217_v10  ;;  %v13275_v5 = vld [vmem:[#allocation2 + $0xd20] ss:$20 sps:$4 sm:$0xff]   ;;  %v13283_v10 = vld [vmem:[#allocation2 + $0xcfc] ss:$20 sps:$4 sm:$0xff]  }
 0x19b   :  { %3840 = vmatprep.subr.bf16.mxu1 %v13214_v9 }
 0x19d   :  { %3878 = vmatpush1.bf16.msra.mxu0 %v13215_v14 }
 0x19e   :  { %3841 = vmatpush2.bf16.msra.mxu1 %v13212_v11  ;;  %3879 = vmatprep.subr.bf16.mxu0 %v13223_v17  ;;  %v13286_v11 = vld [vmem:[#allocation2 + $0x8a4] ss:$20 sps:$4 sm:$0xff]  }
 0x19f   :  { %3842 = vmatprep.subr.bf16.mxu1 %v13220_v15 }
 0x1a1   :  { %3880 = vmatpush2.bf16.msra.mxu0 %v13221_v19 }
 0x1a2   :  { %3843 = vmatpush2.bf16.msra.mxu1 %v13218_v18  ;;  %3881 = vmatprep.subr.bf16.mxu0 %v13229_v21  ;;  %v13292_v18 = vld [vmem:[#allocation2 + $0x87c] ss:$20 sps:$4 sm:$0xff]   ;;  %v13290_v21 = vld [vmem:[#allocation2 + $0x878] ss:$20 sps:$4 sm:$0xff]  }
 0x1a3   :  { %3844 = vmatprep.subr.bf16.mxu1 %v13226_v20  ;;  %v13287_v20 = vld [vmem:[#allocation2 + $0xcd0] ss:$20 sps:$4 sm:$0xff]  }
 0x1a5   :  { %3882 = vmatpush2.bf16.msra.mxu0 %v13227_v23  ;;  %v13298_v23 = vld [vmem:[#allocation2 + $0x854] ss:$20 sps:$4 sm:$0xff]  }
 0x1a6   :  { %3845 = vmatpush2.bf16.msra.mxu1 %v13224_v22  ;;  %3883 = vmatprep.subr.bf16.mxu0 %v13235_v25  ;;  %v13296_v25 = vld [vmem:[#allocation2 + $0x850] ss:$20 sps:$4 sm:$0xff]  }
 0x1a7   :  { %3846 = vmatprep.subr.bf16.mxu1 %v13232_v24  ;;  %v13293_v24 = vld [vmem:[#allocation2 + $0xca8] ss:$20 sps:$4 sm:$0xff]  }
 0x1a9   :  { %3884 = vmatpush2.bf16.msra.mxu0 %v13233_v27  ;;  %v13304_v27 = vld [vmem:[#allocation2 + $0x82c] ss:$20 sps:$4 sm:$0xff]  }
 0x1aa   :  { %3847 = vmatpush2.bf16.msra.mxu1 %v13230_v26  ;;  %3885 = vmatprep.subr.bf16.mxu0 %v13241_v29  ;;  %v13301_v26 = vld [vmem:[#allocation2 + $0xf04] ss:$20 sps:$4 sm:$0xff]   ;;  %v13302_v29 = vld [vmem:[#allocation2 + $0x828] ss:$20 sps:$4 sm:$0xff]  }
 0x1ab   :  { %3848 = vmatprep.subr.bf16.mxu1 %v13238_v28  ;;  %v13299_v28 = vld [vmem:[#allocation2 + $0xf00] ss:$20 sps:$4 sm:$0xff]  }
 0x1ad   :  { %3886 = vmatpush2.bf16.msra.mxu0 %v13239_v31  ;;  %v13310_v31 = vld [vmem:[#allocation2 + $0x804] ss:$20 sps:$4 sm:$0xff]  }
 0x1ae   :  { %3849 = vmatpush2.bf16.msra.mxu1 %v13236_v30  ;;  %3887 = vmatprep.subr.bf16.mxu0 %v13247_v34  ;;  %v13307_v30 = vld [vmem:[#allocation2 + $0xedc] ss:$20 sps:$4 sm:$0xff]   ;;  %v13308_v34 = vld [vmem:[#allocation2 + $0x800] ss:$20 sps:$4 sm:$0xff]  }
 0x1af   :  { %3850 = vmatprep.subr.bf16.mxu1 %v13244_v32  ;;  %v13305_v32 = vld [vmem:[#allocation2 + $0xed8] ss:$20 sps:$4 sm:$0xff]  }
 0x1b1   :  { %3888 = vmatpush2.bf16.msra.mxu0 %v13245_v37  ;;  %v13316_v37 = vld [vmem:[#allocation2 + $0x7dc] ss:$20 sps:$4 sm:$0xff]  }
 0x1b2   :  { %3851 = vmatpush2.bf16.msra.mxu1 %v13242_v35  ;;  %3889 = vmatprep.subr.bf16.mxu0 %v13253_v39  ;;  %v13313_v35 = vld [vmem:[#allocation2 + $0xeb4] ss:$20 sps:$4 sm:$0xff]   ;;  %v13314_v39 = vld [vmem:[#allocation2 + $0x7d8] ss:$20 sps:$4 sm:$0xff]  }
 0x1b3   :  { %3852 = vmatprep.subr.bf16.mxu1 %v13250_v38  ;;  %v13311_v38 = vld [vmem:[#allocation2 + $0xeb0] ss:$20 sps:$4 sm:$0xff]  }
 0x1b5   :  { %3890 = vmatpush2.bf16.msra.mxu0 %v13251_v43  ;;  %v13322_v43 = vld [vmem:[#allocation2 + $0x7b4] ss:$20 sps:$4 sm:$0xff]  }
 0x1b6   :  { %3853 = vmatpush2.bf16.msra.mxu1 %v13248_v40  ;;  %3891 = vmatprep.subr.bf16.mxu0 %v13259_v45  ;;  %v13319_v40 = vld [vmem:[#allocation2 + $0xe8c] ss:$20 sps:$4 sm:$0xff]   ;;  %v13320_v45 = vld [vmem:[#allocation2 + $0x7b0] ss:$20 sps:$4 sm:$0xff]  }
 0x1b7   :  { %3904 = vmatprep.subr.bf16.mxu1 %v13256_v44  ;;  %v13317_v44 = vld [vmem:[#allocation2 + $0xe88] ss:$20 sps:$4 sm:$0xff]  }
 0x1b9   :  { %3855 = vmatmul.mubr.bf16.vlgmr.msra.gmra.mxu1 %v14991_v6  ;;  %3892 = vmatpush2.bf16.msra.mxu0 %v13257_v48  ;;  %v13328_v48 = vld [vmem:[#allocation2 + $0xa0c] ss:$20 sps:$4 sm:$0xff]  }
 0x1ba   :  { %3905 = vmatpush1.bf16.msra.mxu1 %v13254_v46  ;;  %3893 = vmatprep.subr.bf16.mxu0 %v13265_v50  ;;  %v13325_v46 = vld [vmem:[#allocation2 + $0xe64] ss:$20 sps:$4 sm:$0xff]   ;;  %v13326_v50 = vld [vmem:[#allocation2 + $0xa08] ss:$20 sps:$4 sm:$0xff]  }
 0x1bb   :  { %3906 = vmatprep.subr.bf16.mxu1 %v13262_v49  ;;  %3936 = vmatprep.mubr.bf16.mxu1 %v15010_v33  ;;  %v13323_v49 = vld [vmem:[#allocation2 + $0xe60] ss:$20 sps:$4 sm:$0xff]  }
 0x1bd   :  { %3894 = vmatpush2.bf16.msra.mxu0 %v13263_v54  ;;  %v13334_v54 = vld [vmem:[#allocation2 + $0x9e4] ss:$20 sps:$4 sm:$0xff]  }
 0x1be   :  { %3907 = vmatpush1.bf16.msra.mxu1 %v13260_v52  ;;  %3959 = vmatprep.subr.bf16.mxu0 %v13274_v56  ;;  %v13331_v52 = vld [vmem:[#allocation2 + $0xe3c] ss:$20 sps:$4 sm:$0xff]   ;;  %v13332_v56 = vld [vmem:[#allocation2 + $0x9e0] ss:$20 sps:$4 sm:$0xff]  }
 0x1bf   :  { %3908 = vmatprep.subr.bf16.mxu1 %v13268_v55  ;;  %v13329_v55 = vld [vmem:[#allocation2 + $0xe38] ss:$20 sps:$4 sm:$0xff]  }
 0x1c0   :  { %v1881_v62 = vpop.f32.mrf.mxu0  ;;  %3896 = vmatmul.mubr.bf16.vlgmr.msra.gmra.mxu0 %v14993_v7 }
 0x1c1   :  { %v1882_v63 = vadd.f32 %v1881_v62, %v15043_v36  ;;  %3960 = vmatpush1.bf16.msra.mxu0 %v13272_v60  ;;  %3977 = vmatprep.mubr.bf16.mxu0 %v14886_v13  ;;  %v13278_v36 = vld [vmem:[#allocation2 + $0x8c8] ss:$20 sps:$4 sm:$0xff]   ;;  %v13335_v60 = vld [vmem:[#allocation2 + $0xe10] ss:$20 sps:$4 sm:$0xff]   ;;  %v13343_v62 = vld [vmem:[#allocation2 + $0xdec] ss:$20 sps:$4 sm:$0xff]  }
 0x1c2   :  { %3909 = vmatpush1.bf16.msra.mxu1 %v13266_v58  ;;  %v1883_v1 = vpop.f32.mrf.mxu0  ;;  %3986 = vmatprep.subr.bf16.mxu0 %v13280_v61  ;;  %v13337_v58 = vld [vmem:[#allocation2 + $0xe14] ss:$20 sps:$4 sm:$0xff]   ;;  %v13338_v61 = vld [vmem:[#allocation2 + $0x9b8] ss:$20 sps:$4 sm:$0xff]  }
 0x1c3   :  { %3910 = vmatprep.subr.bf16.mxu1 %v13271_v59  ;;  %v15058_v3 = vadd.f32 %v15048_v53, %v1882_v63  ;;  %v1884_v4 = vadd.f32 %v1883_v1, %v15045_v41  ;;  %v13281_v41 = vld [vmem:[#allocation2 + $0xcf8] ss:$20 sps:$4 sm:$0xff]   ;;  %v13284_v53 = vld [vmem:[#allocation2 + $0x8a0] ss:$20 sps:$4 sm:$0xff]   ;;  %v13340_v59 = vld [vmem:[#allocation2 + $0x9bc] ss:$20 sps:$4 sm:$0xff]  }
 0x1c4   :  { %v1885_v8 = vpop.f32.mrf.mxu0  ;;  %v13346_v63 = vld [vmem:[#allocation2 + $0x994] ss:$20 sps:$4 sm:$0xff]   ;;  %v13344_v1 = vld [vmem:[#allocation2 + $0x990] ss:$20 sps:$4 sm:$0xff]  }
 0x1c5   :  { %v15062_v9 = vadd.f32 %v15050_v57, %v1884_v4  ;;  %v13289_v57 = vld [vmem:[#allocation2 + $0xcd4] ss:$20 sps:$4 sm:$0xff]   ;;  %v13352_v4 = vld [vmem:[#allocation2 + $0x96c] ss:$20 sps:$4 sm:$0xff]  }
 0x1c6   :  { %3911 = vmatpush1.bf16.msra.mxu1 %v13269_v0  ;;  %v1886_v14 = vpop.f32.mrf.mxu0  ;;  %v13341_v0 = vld [vmem:[#allocation2 + $0xde8] ss:$20 sps:$4 sm:$0xff]  }
 0x1c7   :  { %3912 = vmatprep.subr.bf16.mxu1 %v13277_v2  ;;  %v13349_v2 = vld [vmem:[#allocation2 + $0xb4c] ss:$20 sps:$4 sm:$0xff]   ;;  %v13350_v8 = vld [vmem:[#allocation2 + $0x968] ss:$20 sps:$4 sm:$0xff]  }
 0x1c8   :  { %11608 = vmatmul.mubr.msk.bf16.vlgmr.msra.gmra.mxu0 %vm1761_vm0, %v15028_v42  ;;  %v13295_v42 = vld [vmem:[#allocation2 + $0xcac] ss:$20 sps:$4 sm:$0xff]  }
 0x1c9   :  { %v15064_v15 = vpop.f32.mrf.mxu1  ;;  %3987 = vmatpush1.bf16.msra.mxu0 %v13278_v36  ;;  %4018 = vmatprep.mubr.bf16.mxu0 %v14982_v47  ;;  %v13355_v36 = vld [vmem:[#allocation2 + $0xb24] ss:$20 sps:$4 sm:$0xff]   ;;  %v13356_v14 = vld [vmem:[#allocation2 + $0x940] ss:$20 sps:$4 sm:$0xff]  }
 0x1ca   :  { %3913 = vmatpush1.bf16.msra.mxu1 %v13275_v5  ;;  %3988 = vmatprep.subr.bf16.mxu0 %v13286_v11  ;;  %v13347_v5 = vld [vmem:[#allocation2 + $0xb48] ss:$20 sps:$4 sm:$0xff]   ;;  %v13353_v11 = vld [vmem:[#allocation2 + $0xb20] ss:$20 sps:$4 sm:$0xff]  }
 0x1cb   :  { %v15068_v17 = vpop.f32.mrf.mxu1  ;;  %3914 = vmatprep.subr.bf16.mxu1 %v13283_v10  ;;  %v13358_v10 = vld [vmem:[#allocation2 + $0x944] ss:$20 sps:$4 sm:$0xff]  }
 0x1cd   :  { %v1967_v19 = vpop.f32.mrf.mxu1  ;;  %3989 = vmatpush1.bf16.msra.mxu0 %v13284_v53  ;;  %v13364_v53 = vld [vmem:[#allocation2 + $0x91c] ss:$20 sps:$4 sm:$0xff]  }
 0x1ce   :  { %3915 = vmatpush1.bf16.msra.mxu1 %v13281_v41  ;;  %3990 = vmatprep.subr.bf16.mxu0 %v13292_v18  ;;  %v13361_v41 = vld [vmem:[#allocation2 + $0xafc] ss:$20 sps:$4 sm:$0xff]   ;;  %v13362_v18 = vld [vmem:[#allocation2 + $0x918] ss:$20 sps:$4 sm:$0xff]   ;;  %v13367_v19 = vld [vmem:[#allocation2 + $0xad4] ss:$20 sps:$4 sm:$0xff]  }
 0x1cf   :  { %v1968_v22 = vpop.f32.mrf.mxu1  ;;  %3916 = vmatprep.subr.bf16.mxu1 %v13289_v57  ;;  %v13359_v57 = vld [vmem:[#allocation2 + $0xaf8] ss:$20 sps:$4 sm:$0xff]  }
 0x1d0   :  { %v13365_v22 = vld [vmem:[#allocation2 + $0xad0] ss:$20 sps:$4 sm:$0xff]  }
 0x1d1   :  { %3991 = vmatpush1.bf16.msra.mxu0 %v13290_v21 }
 0x1d2   :  { %3917 = vmatpush1.bf16.msra.mxu1 %v13287_v20  ;;  %3992 = vmatprep.subr.bf16.mxu0 %v13298_v23  ;;  %v13370_v20 = vld [vmem:[#allocation2 + $0x8f4] ss:$20 sps:$4 sm:$0xff]   ;;  %v13368_v23 = vld [vmem:[#allocation2 + $0x8f0] ss:$20 sps:$4 sm:$0xff]  }
 0x1d3   :  { %3918 = vmatprep.subr.bf16.mxu1 %v13295_v42 }
 0x1d5   :  { %3993 = vmatpush1.bf16.msra.mxu0 %v13296_v25  ;;  %v13376_v25 = vld [vmem:[#allocation2 + $0xdcc] ss:$20 sps:$4 sm:$0xff]  }
 0x1d6   :  { %3919 = vmatpush1.bf16.msra.mxu1 %v13293_v24  ;;  %3994 = vmatprep.subr.bf16.mxu0 %v13304_v27  ;;  %v13373_v24 = vld [vmem:[#allocation2 + $0xaac] ss:$20 sps:$4 sm:$0xff]  }
 0x1d7   :  { %3920 = vmatprep.subr.bf16.mxu1 %v13301_v26 }
 0x1d9   :  { %3995 = vmatpush1.bf16.msra.mxu0 %v13302_v29 }
 0x1da   :  { %3921 = vmatpush2.bf16.msra.mxu1 %v13299_v28  ;;  %3996 = vmatprep.subr.bf16.mxu0 %v13310_v31  ;;  %v13371_v28 = vld [vmem:[#allocation2 + $0xaa8] ss:$20 sps:$4 sm:$0xff]   ;;  %v13379_v31 = vld [vmem:[#allocation2 + $0xa84] ss:$20 sps:$4 sm:$0xff]  }
 0x1db   :  { %3922 = vmatprep.subr.bf16.mxu1 %v13307_v30  ;;  %v13374_v30 = vld [vmem:[#allocation2 + $0xdc8] ss:$20 sps:$4 sm:$0xff]  }
 0x1dd   :  { %3997 = vmatpush1.bf16.msra.mxu0 %v13308_v34 }
 0x1de   :  { %3923 = vmatpush2.bf16.msra.mxu1 %v13305_v32  ;;  %3998 = vmatprep.subr.bf16.mxu0 %v13316_v37  ;;  %v13382_v32 = vld [vmem:[#allocation2 + $0xda4] ss:$20 sps:$4 sm:$0xff]  }
 0x1df   :  { %3924 = vmatprep.subr.bf16.mxu1 %v13313_v35  ;;  %v13377_v35 = vld [vmem:[#allocation2 + $0xa80] ss:$20 sps:$4 sm:$0xff]  }
 0x1e1   :  { %3999 = vmatpush1.bf16.msra.mxu0 %v13314_v39  ;;  %v13385_v39 = vld [vmem:[#allocation2 + $0xa5c] ss:$20 sps:$4 sm:$0xff]  }
 0x1e2   :  { %3925 = vmatpush2.bf16.msra.mxu1 %v13311_v38  ;;  %4000 = vmatprep.subr.bf16.mxu0 %v13322_v43  ;;  %v13380_v38 = vld [vmem:[#allocation2 + $0xda0] ss:$20 sps:$4 sm:$0xff]  }
 0x1e3   :  { %3926 = vmatprep.subr.bf16.mxu1 %v13319_v40 }
 0x1e5   :  { %4001 = vmatpush1.bf16.msra.mxu0 %v13320_v45  ;;  %v13383_v45 = vld [vmem:[#allocation2 + $0xa58] ss:$20 sps:$4 sm:$0xff]  }
 0x1e6   :  { %3927 = vmatpush2.bf16.msra.mxu1 %v13317_v44  ;;  %4002 = vmatprep.subr.bf16.mxu0 %v13328_v48  ;;  %v13391_v48 = vld [vmem:[#allocation2 + $0xa34] ss:$20 sps:$4 sm:$0xff]  }
 0x1e7   :  { %3928 = vmatprep.subr.bf16.mxu1 %v13325_v46  ;;  %v13386_v46 = vld [vmem:[#allocation2 + $0xd78] ss:$20 sps:$4 sm:$0xff]  }
 0x1e9   :  { %4003 = vmatpush2.bf16.msra.mxu0 %v13326_v50 }
 0x1ea   :  { %3929 = vmatpush2.bf16.msra.mxu1 %v13323_v49  ;;  %4004 = vmatprep.subr.bf16.mxu0 %v13334_v54  ;;  %v13394_v49 = vld [vmem:[#allocation2 + $0xd54] ss:$20 sps:$4 sm:$0xff]   ;;  %v13389_v54 = vld [vmem:[#allocation2 + $0xa30] ss:$20 sps:$4 sm:$0xff]  }
 0x1eb   :  { %3930 = vmatprep.subr.bf16.mxu1 %v13331_v52 }
 0x1ed   :  { %4005 = vmatpush2.bf16.msra.mxu0 %v13332_v56  ;;  %v13392_v56 = vld [vmem:[#allocation2 + $0xd50] ss:$20 sps:$4 sm:$0xff]  }
 0x1ee   :  { %3931 = vmatpush2.bf16.msra.mxu1 %v13329_v55  ;;  %4006 = vmatprep.subr.bf16.mxu0 %v13340_v59  ;;  %v13400_v59 = vld [vmem:[#allocation2 + $0xd2c] ss:$20 sps:$4 sm:$0xff]  }
 0x1ef   :  { %3932 = vmatprep.subr.bf16.mxu1 %v13337_v58  ;;  %v13397_v58 = vld [vmem:[#allocation2 + $0xc8c] ss:$20 sps:$4 sm:$0xff]  }
 0x1f1   :  { %4007 = vmatpush2.bf16.msra.mxu0 %v13338_v61 }
 0x1f2   :  { %3933 = vmatpush2.bf16.msra.mxu1 %v13335_v60  ;;  %4008 = vmatprep.subr.bf16.mxu0 %v13346_v63  ;;  %v13395_v63 = vld [vmem:[#allocation2 + $0xc88] ss:$20 sps:$4 sm:$0xff]  }
 0x1f3   :  { %3934 = vmatprep.subr.bf16.mxu1 %v13343_v62 }
 0x1f5   :  { %4009 = vmatpush2.bf16.msra.mxu0 %v13344_v1  ;;  %v13403_v1 = vld [vmem:[#allocation2 + $0xc64] ss:$20 sps:$4 sm:$0xff]  }
 0x1f6   :  { %3935 = vmatpush2.bf16.msra.mxu1 %v13341_v0  ;;  %4010 = vmatprep.subr.bf16.mxu0 %v13352_v4  ;;  %v13398_v0 = vld [vmem:[#allocation2 + $0xd28] ss:$20 sps:$4 sm:$0xff]  }
 0x1f7   :  { %4027 = vmatprep.subr.bf16.mxu1 %v13349_v2  ;;  %v13406_v2 = vld [vmem:[#allocation2 + $0xd04] ss:$20 sps:$4 sm:$0xff]  }
 0x1f9   :  { %3937 = vmatmul.mubr.bf16.vlgmr.msra.gmra.mxu1 %v15015_v16  ;;  %4011 = vmatpush2.bf16.msra.mxu0 %v13350_v8  ;;  %v13404_v8 = vld [vmem:[#allocation2 + $0xd00] ss:$20 sps:$4 sm:$0xff]  }
 0x1fa   :  { %4028 = vmatpush1.bf16.msra.mxu1 %v13347_v5  ;;  %4012 = vmatprep.subr.bf16.mxu0 %v13358_v10  ;;  %v13401_v5 = vld [vmem:[#allocation2 + $0xc60] ss:$20 sps:$4 sm:$0xff]   ;;  %v13412_v10 = vld [vmem:[#allocation2 + $0xcdc] ss:$20 sps:$4 sm:$0xff]  }
 0x1fb   :  { %4029 = vmatprep.subr.bf16.mxu1 %v13355_v36  ;;  %4059 = vmatprep.mubr.bf16.mxu1 %v14987_v51  ;;  %v13409_v36 = vld [vmem:[#allocation2 + $0xc3c] ss:$20 sps:$4 sm:$0xff]  }
 0x1fd   :  { %4013 = vmatpush2.bf16.msra.mxu0 %v13356_v14  ;;  %v13410_v14 = vld [vmem:[#allocation2 + $0xcd8] ss:$20 sps:$4 sm:$0xff]  }
 0x1fe   :  { %4030 = vmatpush1.bf16.msra.mxu1 %v13353_v11  ;;  %4014 = vmatprep.subr.bf16.mxu0 %v13364_v53  ;;  %v13407_v11 = vld [vmem:[#allocation2 + $0xc38] ss:$20 sps:$4 sm:$0xff]   ;;  %v13418_v53 = vld [vmem:[#allocation2 + $0xcb4] ss:$20 sps:$4 sm:$0xff]  }
 0x1ff   :  { %4031 = vmatprep.subr.bf16.mxu1 %v13361_v41  ;;  %v13415_v41 = vld [vmem:[#allocation2 + $0xc14] ss:$20 sps:$4 sm:$0xff]  }
 0x200   :  { %v2004_v21 = vpop.f32.mrf.mxu0 }
 0x201   :  { %v2005_v42 = vadd.f32 %v2004_v21, %v15064_v15  ;;  %4015 = vmatpush2.bf16.msra.mxu0 %v13362_v18  ;;  %v13424_v21 = vld [vmem:[#allocation2 + $0xf0c] ss:$20 sps:$4 sm:$0xff]  }
 0x202   :  { %4032 = vmatpush1.bf16.msra.mxu1 %v13359_v57  ;;  %v2006_v26 = vpop.f32.mrf.mxu0  ;;  %4016 = vmatprep.subr.bf16.mxu0 %v13370_v20  ;;  %v13413_v57 = vld [vmem:[#allocation2 + $0xc10] ss:$20 sps:$4 sm:$0xff]   ;;  %v13421_v20 = vld [vmem:[#allocation2 + $0xbec] ss:$20 sps:$4 sm:$0xff]  }
 0x203   :  { %4033 = vmatprep.subr.bf16.mxu1 %v13367_v19  ;;  %v2007_v27 = vadd.f32 %v2006_v26, %v15068_v17  ;;  %v13388_v17 = vld [vmem:[#allocation2 + $0xd7c] ss:$20 sps:$4 sm:$0xff]   ;;  %v13427_v26 = vld [vmem:[#allocation2 + $0xbc4] ss:$20 sps:$4 sm:$0xff]  }
 0x204   :  { %v2008_v29 = vpop.f32.mrf.mxu0  ;;  %v13416_v19 = vld [vmem:[#allocation2 + $0xcb0] ss:$20 sps:$4 sm:$0xff]  }
 0x205   :  { %4017 = vmatpush2.bf16.msra.mxu0 %v13368_v23  ;;  %v13419_v23 = vld [vmem:[#allocation2 + $0xbe8] ss:$20 sps:$4 sm:$0xff]   ;;  %v13425_v29 = vld [vmem:[#allocation2 + $0xbc0] ss:$20 sps:$4 sm:$0xff]  }
 0x206   :  { %4034 = vmatpush1.bf16.msra.mxu1 %v13365_v22  ;;  %4068 = vmatprep.subr.bf16.mxu0 %v13376_v25  ;;  %v2009_v34 = vpop.f32.mrf.mxu0  ;;  %v13422_v25 = vld [vmem:[#allocation2 + $0xf08] ss:$20 sps:$4 sm:$0xff]  }
 0x207   :  { %4035 = vmatprep.subr.bf16.mxu1 %v13373_v24  ;;  %v13431_v34 = vld [vmem:[#allocation2 + $0xb98] ss:$20 sps:$4 sm:$0xff]  }
 0x208   :  { %4019 = vmatmul.mubr.bf16.vlgmr.msra.gmra.mxu0 %v14991_v6 }
 0x209   :  { %v2045_v15 = vpop.f32.mrf.mxu1  ;;  %4069 = vmatpush1.bf16.msra.mxu0 %v13374_v30  ;;  %4100 = vmatprep.mubr.bf16.mxu0 %v15010_v33  ;;  %v13428_v30 = vld [vmem:[#allocation2 + $0xee0] ss:$20 sps:$4 sm:$0xff]  }
 0x20a   :  { %4036 = vmatpush1.bf16.msra.mxu1 %v13371_v28  ;;  %v2046_v37 = vadd.f32 %v2045_v15, %v2005_v42  ;;  %4070 = vmatprep.subr.bf16.mxu0 %v13382_v32  ;;  %v13436_v32 = vld [vmem:[#allocation2 + $0xebc] ss:$20 sps:$4 sm:$0xff]   ;;  %v13434_v15 = vld [vmem:[#allocation2 + $0xeb8] ss:$20 sps:$4 sm:$0xff]  }
 0x20b   :  { %v2047_v40 = vpop.f32.mrf.mxu1  ;;  %4037 = vmatprep.subr.bf16.mxu1 %v13379_v31  ;;  %v13433_v31 = vld [vmem:[#allocation2 + $0xb9c] ss:$20 sps:$4 sm:$0xff]  }
 0x20c   :  { %v2048_v43 = vadd.f32 %v2047_v40, %v2007_v27  ;;  %v13430_v27 = vld [vmem:[#allocation2 + $0xee4] ss:$20 sps:$4 sm:$0xff]   ;;  %v13445_v40 = vld [vmem:[#allocation2 + $0xf34] ss:$20 sps:$4 sm:$0xff]  }
 0x20d   :  { %v2049_v44 = vpop.f32.mrf.mxu1  ;;  %4071 = vmatpush1.bf16.msra.mxu0 %v13380_v38 }
 0x20e   :  { %4038 = vmatpush1.bf16.msra.mxu1 %v13377_v35  ;;  %4072 = vmatprep.subr.bf16.mxu0 %v13388_v17  ;;  %v13439_v35 = vld [vmem:[#allocation2 + $0xb74] ss:$20 sps:$4 sm:$0xff]   ;;  %v13440_v17 = vld [vmem:[#allocation2 + $0xe90] ss:$20 sps:$4 sm:$0xff]  }
 0x20f   :  { %v2050_v50 = vpop.f32.mrf.mxu1  ;;  %4039 = vmatprep.subr.bf16.mxu1 %v13385_v39  ;;  %v13437_v39 = vld [vmem:[#allocation2 + $0xb70] ss:$20 sps:$4 sm:$0xff]  }
 0x210   :  { %v13446_v50 = vld [vmem:[#allocation2 + $0xe68] ss:$20 sps:$4 sm:$0xff]  }
 0x211   :  { %v2086_v52 = vpop.f32.mrf.mxu1  ;;  %4073 = vmatpush1.bf16.msra.mxu0 %v13386_v46 }
 0x212   :  { %4040 = vmatpush1.bf16.msra.mxu1 %v13383_v45  ;;  %v15077_v55 = vadd.f32 %v2086_v52, %v2046_v37  ;;  %4074 = vmatprep.subr.bf16.mxu0 %v13394_v49  ;;  %v13442_v37 = vld [vmem:[#allocation2 + $0xe94] ss:$20 sps:$4 sm:$0xff]   ;;  %v13451_v52 = vld [vmem:[#allocation2 + $0xe44] ss:$20 sps:$4 sm:$0xff]  }
 0x213   :  { %v2088_v60 = vpop.f32.mrf.mxu1  ;;  %4041 = vmatprep.subr.bf16.mxu1 %v13391_v48  ;;  %v13443_v48 = vld [vmem:[#allocation2 + $0xf30] ss:$20 sps:$4 sm:$0xff]  }
 0x214   :  { %v15079_v61 = vadd.f32 %v2088_v60, %v2048_v43  ;;  %v13448_v43 = vld [vmem:[#allocation2 + $0xe6c] ss:$20 sps:$4 sm:$0xff]  }
 0x215   :  { %v2090_v62 = vpop.f32.mrf.mxu1  ;;  %4075 = vmatpush1.bf16.msra.mxu0 %v13392_v56 }
 0x216   :  { %4042 = vmatpush1.bf16.msra.mxu1 %v13389_v54  ;;  %4076 = vmatprep.subr.bf16.mxu0 %v13400_v59  ;;  %v13452_v54 = vld [vmem:[#allocation2 + $0xa10] ss:$20 sps:$4 sm:$0xff]   ;;  %v13449_v59 = vld [vmem:[#allocation2 + $0xe40] ss:$20 sps:$4 sm:$0xff]  }
 0x217   :  { %v2091_v4 = vpop.f32.mrf.mxu1  ;;  %4043 = vmatprep.subr.bf16.mxu1 %v13397_v58  ;;  %v13456_v62 = vld [vmem:[#allocation2 + $0xe1c] ss:$20 sps:$4 sm:$0xff]  }
 0x218   :  { %v13461_v4 = vld [vmem:[#allocation2 + $0xdf4] ss:$20 sps:$4 sm:$0xff]  }
 0x219   :  { %4077 = vmatpush1.bf16.msra.mxu0 %v13398_v0  ;;  %v13454_v0 = vld [vmem:[#allocation2 + $0xe18] ss:$20 sps:$4 sm:$0xff]  }
 0x21a   :  { %4044 = vmatpush2.bf16.msra.mxu1 %v13395_v63  ;;  %4078 = vmatprep.subr.bf16.mxu0 %v13406_v2  ;;  %v13453_v63 = vld [vmem:[#allocation2 + $0x8d0] ss:$20 sps:$4 sm:$0xff]   ;;  %v13457_v2 = vld [vmem:[#allocation2 + $0x9e8] ss:$20 sps:$4 sm:$0xff]  }
 0x21b   :  { %4045 = vmatprep.subr.bf16.mxu1 %v13403_v1 }
 0x21d   :  { %4079 = vmatpush1.bf16.msra.mxu0 %v13404_v8  ;;  %v15086_v8 = vld [vmem:[%s15391_s0 + $0x18] ss:$0 sps:$4 sm:$0xff]  }
 0x21e   :  { %4046 = vmatpush2.bf16.msra.mxu1 %v13401_v5  ;;  %4080 = vmatprep.subr.bf16.mxu0 %v13412_v10  ;;  %v13458_v10 = vld [vmem:[#allocation2 + $0x8a8] ss:$20 sps:$4 sm:$0xff]  }
 0x21f   :  { %4047 = vmatprep.subr.bf16.mxu1 %v13409_v36 }
 0x220   :  { %v12447_v18 = vpop.f32.mrf.mxu0 }
 0x221   :  { %4081 = vmatpush1.bf16.msra.mxu0 %v13410_v14  ;;  %v13462_v14 = vld [vmem:[#allocation2 + $0x9c0] ss:$20 sps:$4 sm:$0xff]  }
 0x222   :  { %4048 = vmatpush2.bf16.msra.mxu1 %v13407_v11  ;;  %4082 = vmatprep.subr.bf16.mxu0 %v13418_v53  ;;  %v12448_v22 = vpop.f32.mrf.mxu0  ;;  %v13459_v11 = vld [vmem:[#allocation2 + $0xdf0] ss:$20 sps:$4 sm:$0xff]  }
 0x223   :  { %4049 = vmatprep.subr.bf16.mxu1 %v13415_v41  ;;  %v12449_v42 = vadd.f32 %v12448_v22, %v12447_v18  ;;  %v13464_v41 = vld [vmem:[#allocation2 + $0xc90] ss:$20 sps:$4 sm:$0xff]   ;;  %v13463_v18 = vld [vmem:[#allocation2 + $0x880] ss:$20 sps:$4 sm:$0xff]  }
 0x224   :  { %v12450_v24 = vpop.f32.mrf.mxu0  ;;  %v13466_v22 = vld [vmem:[#allocation2 + $0xb50] ss:$20 sps:$4 sm:$0xff]  }
 0x225   :  { %4083 = vmatpush1.bf16.msra.mxu0 %v13416_v19  ;;  %v13465_v19 = vld [vmem:[#allocation2 + $0x998] ss:$20 sps:$4 sm:$0xff]  }
 0x226   :  { %4050 = vmatpush2.bf16.msra.mxu1 %v13413_v57  ;;  %4084 = vmatprep.subr.bf16.mxu0 %v13424_v21  ;;  %v12451_v28 = vpop.f32.mrf.mxu0 }
 0x227   :  { %4051 = vmatprep.subr.bf16.mxu1 %v13421_v20  ;;  %v13472_v28 = vld [vmem:[#allocation2 + $0xc40] ss:$20 sps:$4 sm:$0xff]  }
 0x229   :  { %4085 = vmatpush2.bf16.msra.mxu0 %v13422_v25  ;;  %v13467_v25 = vld [vmem:[#allocation2 + $0x858] ss:$20 sps:$4 sm:$0xff]  }
 0x22a   :  { %4052 = vmatpush2.bf16.msra.mxu1 %v13419_v23  ;;  %4086 = vmatprep.subr.bf16.mxu0 %v13430_v27  ;;  %v13470_v27 = vld [vmem:[#allocation2 + $0xb28] ss:$20 sps:$4 sm:$0xff]  }
 0x22b   :  { %4053 = vmatprep.subr.bf16.mxu1 %v13427_v26  ;;  %v13469_v26 = vld [vmem:[#allocation2 + $0x970] ss:$20 sps:$4 sm:$0xff]  }
 0x22d   :  { %4087 = vmatpush2.bf16.msra.mxu0 %v13428_v30  ;;  %v13473_v30 = vld [vmem:[#allocation2 + $0x948] ss:$20 sps:$4 sm:$0xff]  }
 0x22e   :  { %4054 = vmatpush2.bf16.msra.mxu1 %v13425_v29  ;;  %4088 = vmatprep.subr.bf16.mxu0 %v13436_v32  ;;  %v13471_v29 = vld [vmem:[#allocation2 + $0x830] ss:$20 sps:$4 sm:$0xff]   ;;  %v13476_v32 = vld [vmem:[#allocation2 + $0xc18] ss:$20 sps:$4 sm:$0xff]  }
 0x22f   :  { %4055 = vmatprep.subr.bf16.mxu1 %v13433_v31  ;;  %v13474_v31 = vld [vmem:[#allocation2 + $0xb00] ss:$20 sps:$4 sm:$0xff]  }
 0x231   :  { %v12469_v38 = vpop.f32.mrf.mxu1  ;;  %4089 = vmatpush2.bf16.msra.mxu0 %v13434_v15  ;;  %v13477_v15 = vld [vmem:[#allocation2 + $0x920] ss:$20 sps:$4 sm:$0xff]  }
 0x232   :  { %4056 = vmatpush2.bf16.msra.mxu1 %v13431_v34  ;;  %4090 = vmatprep.subr.bf16.mxu0 %v13442_v37  ;;  %v13475_v34 = vld [vmem:[#allocation2 + $0x808] ss:$20 sps:$4 sm:$0xff]   ;;  %v13480_v37 = vld [vmem:[#allocation2 + $0xbf0] ss:$20 sps:$4 sm:$0xff]  }
 0x233   :  { %v12470_v44 = vpop.f32.mrf.mxu1  ;;  %4057 = vmatprep.subr.bf16.mxu1 %v13439_v35  ;;  %v13478_v35 = vld [vmem:[#allocation2 + $0xad8] ss:$20 sps:$4 sm:$0xff]  }
 0x234   :  { %v12471_v45 = vadd.f32 %v12470_v44, %v12469_v38  ;;  %v13479_v38 = vld [vmem:[#allocation2 + $0x7e0] ss:$20 sps:$4 sm:$0xff]   ;;  %v13485_v44 = vld [vmem:[#allocation2 + $0xa88] ss:$20 sps:$4 sm:$0xff]  }
 0x235   :  { %v12472_v46 = vpop.f32.mrf.mxu1  ;;  %4091 = vmatpush2.bf16.msra.mxu0 %v13440_v17  ;;  %v13482_v17 = vld [vmem:[#allocation2 + $0xab0] ss:$20 sps:$4 sm:$0xff]  }
 0x236   :  { %v2168_v49 = vadd.f32 %v12471_v45, %v12449_v42  ;;  %4058 = vmatpush2.bf16.msra.mxu1 %v13437_v39  ;;  %4092 = vmatprep.subr.bf16.mxu0 %v13448_v43  ;;  %v13468_v42 = vld [vmem:[#allocation2 + $0xc68] ss:$20 sps:$4 sm:$0xff]   ;;  %v13481_v39 = vld [vmem:[#allocation2 + $0x8f8] ss:$20 sps:$4 sm:$0xff]   ;;  %v13486_v45 = vld [vmem:[#allocation2 + $0xf10] ss:$20 sps:$4 sm:$0xff]  }
 0x237   :  { %v12473_v56 = vpop.f32.mrf.mxu1  ;;  %4123 = vmatprep.subr.bf16.mxu1 %v13445_v40  ;;  %v13484_v40 = vld [vmem:[#allocation2 + $0xbc8] ss:$20 sps:$4 sm:$0xff]   ;;  %v13483_v43 = vld [vmem:[#allocation2 + $0x7b8] ss:$20 sps:$4 sm:$0xff]   ;;  %v13488_v46 = vld [vmem:[#allocation2 + $0xba0] ss:$20 sps:$4 sm:$0xff]  }
 0x238   :  { %v13493_v56 = vld [vmem:[#allocation2 + $0xa38] ss:$20 sps:$4 sm:$0xff]  }
 0x239   :  { %4060 = vmatmul.mubr.bf16.vlgmr.msra.gmra.mxu1 %v14993_v7  ;;  %v2247_v58 = vpop.f32.mrf.mxu1  ;;  %4093 = vmatpush2.bf16.msra.mxu0 %v13446_v50  ;;  %v13490_v50 = vld [vmem:[#allocation2 + $0xee8] ss:$20 sps:$4 sm:$0xff]  }
 0x23a   :  { %4124 = vmatpush1.bf16.msra.mxu1 %v13443_v48  ;;  %4094 = vmatprep.subr.bf16.mxu0 %v13451_v52  ;;  %v13487_v48 = vld [vmem:[#allocation2 + $0xdd0] ss:$20 sps:$4 sm:$0xff]   ;;  %v13492_v52 = vld [vmem:[#allocation2 + $0xb78] ss:$20 sps:$4 sm:$0xff]  }
 0x23b   :  { %v12743_v60 = vpop.f32.mrf.mxu1  ;;  %4141 = vmatprep.mubr.bf16.mxu1 %v14886_v13  ;;  %12499 = vmatprep.subr.bf16.mxu1 %v13452_v54  ;;  %v13491_v54 = vld [vmem:[#allocation2 + $0xda8] ss:$20 sps:$4 sm:$0xff]  }
 0x23c   :  { %v13496_v60 = vld [vmem:[#allocation2 + $0xe98] ss:$20 sps:$4 sm:$0xff]  }
 0x23d   :  { %v2250_v1 = vpop.f32.mrf.mxu1  ;;  %4095 = vmatpush2.bf16.msra.mxu0 %v13449_v59  ;;  %v13495_v59 = vld [vmem:[#allocation2 + $0xd80] ss:$20 sps:$4 sm:$0xff]  }
 0x23e   :  { %4096 = vmatprep.subr.bf16.mxu0 %v13456_v62  ;;  %v13498_v62 = vld [vmem:[#allocation2 + $0xf38] ss:$20 sps:$4 sm:$0xff]   ;;  %v13499_v1 = vld [vmem:[#allocation2 + $0xe70] ss:$20 sps:$4 sm:$0xff]  }
 0x23f   :  { %v12744_v5 = vpop.f32.mrf.mxu1 }
 0x240   :  { %v12491_v36 = vpop.f32.mrf.mxu0  ;;  %v13504_v5 = vld [vmem:[#allocation2 + $0xe48] ss:$20 sps:$4 sm:$0xff]  }
 0x241   :  { %11609 = vmatmul.mubr.msk.bf16.vlgmr.msra.gmra.mxu1 %vm1761_vm0, %v15086_v8  ;;  %4097 = vmatpush2.bf16.msra.mxu0 %v13454_v0  ;;  %v13497_v0 = vld [vmem:[#allocation2 + $0xd58] ss:$20 sps:$4 sm:$0xff]  }
 0x242   :  { %12500 = vmatpush3.bf16.msra.mxu1 %v13453_v63  ;;  %v12492_v53 = vpop.f32.mrf.mxu0  ;;  %4098 = vmatprep.subr.bf16.mxu0 %v13461_v4  ;;  %v13503_v63 = vld [vmem:[#allocation2 + $0x106c] ss:$20 sps:$4 sm:$0xff]   ;;  %v13501_v4 = vld [vmem:[#allocation2 + $0x1068] ss:$20 sps:$4 sm:$0xff]  }
 0x243   :  { %12501 = vmatprep.subr.bf16.mxu1 %v13457_v2  ;;  %v12493_v57 = vadd.f32 %v12492_v53, %v12491_v36  ;;  %4182 = vmatprep.mubr.bf16.mxu1 %v14982_v47  ;;  %v13500_v2 = vld [vmem:[#allocation2 + $0xd30] ss:$20 sps:$4 sm:$0xff]   ;;  %v13510_v53 = vld [vmem:[#allocation2 + $0xce0] ss:$20 sps:$4 sm:$0xff]  }
 0x244   :  { %v12494_v20 = vpop.f32.mrf.mxu0  ;;  %v13508_v36 = vld [vmem:[#allocation2 + $0x1044] ss:$20 sps:$4 sm:$0xff]  }
 0x245   :  { %v2208_v21 = vadd.f32 %v12493_v57, %v2168_v49  ;;  %4099 = vmatpush2.bf16.msra.mxu0 %v13459_v11  ;;  %v13489_v49 = vld [vmem:[#allocation2 + $0xa60] ss:$20 sps:$4 sm:$0xff]   ;;  %v13511_v57 = vld [vmem:[#allocation2 + $0x1018] ss:$20 sps:$4 sm:$0xff]  }
 0x246   :  { %12502 = vmatpush3.bf16.msra.mxu1 %v13458_v10  ;;  %12521 = vmatprep.subr.bf16.mxu0 %v13464_v41  ;;  %v12495_v23 = vpop.f32.mrf.mxu0  ;;  %v13505_v10 = vld [vmem:[#allocation2 + $0xd08] ss:$20 sps:$4 sm:$0xff]   ;;  %v13506_v11 = vld [vmem:[#allocation2 + $0x1040] ss:$20 sps:$4 sm:$0xff]   ;;  %v13515_v20 = vld [vmem:[#allocation2 + $0xcb8] ss:$20 sps:$4 sm:$0xff]  }
 0x247   :  { %12503 = vmatprep.subr.bf16.mxu1 %v13462_v14  ;;  %v15091_v24 = vadd.f32 %v2247_v58, %v2208_v21  ;;  %v13494_v58 = vld [vmem:[#allocation2 + $0xec0] ss:$20 sps:$4 sm:$0xff]   ;;  %v13513_v41 = vld [vmem:[#allocation2 + $0x101c] ss:$20 sps:$4 sm:$0xff]  }
 0x248   :  { %4101 = vmatmul.mubr.bf16.vlgmr.msra.gmra.mxu0 %v15015_v16  ;;  %v13509_v14 = vld [vmem:[#allocation2 + $0xe20] ss:$20 sps:$4 sm:$0xff]   ;;  %v13516_v21 = vld [vmem:[#allocation2 + $0xff0] ss:$20 sps:$4 sm:$0xff]  }
 0x249   :  { %12522 = vmatpush3.bf16.msra.mxu0 %v13466_v22  ;;  %4222 = vmatprep.mubr.bf16.mxu0 %v14987_v51  ;;  %v13521_v22 = vld [vmem:[#allocation2 + $0x12ec] ss:$20 sps:$4 sm:$0xff]  }
 0x24a   :  { %12504 = vmatpush3.bf16.msra.mxu1 %v13463_v18  ;;  %12523 = vmatprep.subr.bf16.mxu0 %v13468_v42  ;;  %v13514_v18 = vld [vmem:[#allocation2 + $0xdf8] ss:$20 sps:$4 sm:$0xff]  }
 0x24b   :  { %12505 = vmatprep.subr.bf16.mxu1 %v13465_v19  ;;  %v13518_v19 = vld [vmem:[#allocation2 + $0xff4] ss:$20 sps:$4 sm:$0xff]   ;;  %v13524_v23 = vld [vmem:[#allocation2 + $0xfcc] ss:$20 sps:$4 sm:$0xff]  }
 0x24d   :  { %12524 = vmatpush3.bf16.msra.mxu0 %v13470_v27  ;;  %v13522_v27 = vld [vmem:[#allocation2 + $0xfc8] ss:$20 sps:$4 sm:$0xff]  }
 0x24e   :  { %12506 = vmatpush3.bf16.msra.mxu1 %v13467_v25  ;;  %12525 = vmatprep.subr.bf16.mxu0 %v13472_v28 }
 0x24f   :  { %12507 = vmatprep.subr.bf16.mxu1 %v13469_v26  ;;  %v13519_v26 = vld [vmem:[#allocation2 + $0x12e8] ss:$20 sps:$4 sm:$0xff]  }
 0x251   :  { %12526 = vmatpush3.bf16.msra.mxu0 %v13474_v31 }
 0x252   :  { %12508 = vmatpush3.bf16.msra.mxu1 %v13471_v29  ;;  %12527 = vmatprep.subr.bf16.mxu0 %v13476_v32  ;;  %v13527_v29 = vld [vmem:[#allocation2 + $0x12c4] ss:$20 sps:$4 sm:$0xff]  }
 0x253   :  { %12509 = vmatprep.subr.bf16.mxu1 %v13473_v30  ;;  %v13530_v30 = vld [vmem:[#allocation2 + $0xfa4] ss:$20 sps:$4 sm:$0xff]  }
 0x255   :  { %12528 = vmatpush3.bf16.msra.mxu0 %v13478_v35 }
 0x256   :  { %12510 = vmatpush3.bf16.msra.mxu1 %v13475_v34  ;;  %12529 = vmatprep.subr.bf16.mxu0 %v13480_v37  ;;  %v13525_v34 = vld [vmem:[#allocation2 + $0x12c0] ss:$20 sps:$4 sm:$0xff]   ;;  %v13533_v37 = vld [vmem:[#allocation2 + $0x129c] ss:$20 sps:$4 sm:$0xff]  }
 0x257   :  { %12511 = vmatprep.subr.bf16.mxu1 %v13477_v15  ;;  %v13528_v15 = vld [vmem:[#allocation2 + $0xfa0] ss:$20 sps:$4 sm:$0xff]  }
 0x259   :  { %12530 = vmatpush3.bf16.msra.mxu0 %v13482_v17  ;;  %v13531_v17 = vld [vmem:[#allocation2 + $0x1298] ss:$20 sps:$4 sm:$0xff]  }
 0x25a   :  { %12512 = vmatpush3.bf16.msra.mxu1 %v13479_v38  ;;  %12531 = vmatprep.subr.bf16.mxu0 %v13484_v40  ;;  %v13536_v38 = vld [vmem:[#allocation2 + $0xf7c] ss:$20 sps:$4 sm:$0xff]  }
 0x25b   :  { %12513 = vmatprep.subr.bf16.mxu1 %v13481_v39 }
 0x25d   :  { %12532 = vmatpush3.bf16.msra.mxu0 %v13485_v44  ;;  %v13539_v44 = vld [vmem:[#allocation2 + $0x1274] ss:$20 sps:$4 sm:$0xff]  }
 0x25e   :  { %12514 = vmatpush3.bf16.msra.mxu1 %v13483_v43  ;;  %12533 = vmatprep.subr.bf16.mxu0 %v13488_v46  ;;  %v13534_v43 = vld [vmem:[#allocation2 + $0xf78] ss:$20 sps:$4 sm:$0xff]  }
 0x25f   :  { %12543 = vmatprep.subr.bf16.mxu1 %v13486_v45  ;;  %v13542_v45 = vld [vmem:[#allocation2 + $0xf54] ss:$20 sps:$4 sm:$0xff]  }
 0x261   :  { %4183 = vmatmul.mubr.bf16.vlgmr.msra.gmra.mxu1 %v14991_v6  ;;  %12534 = vmatpush3.bf16.msra.mxu0 %v13489_v49 }
 0x262   :  { %12544 = vmatpush3.bf16.msra.mxu1 %v13487_v48  ;;  %12535 = vmatprep.subr.bf16.mxu0 %v13492_v52  ;;  %v13537_v48 = vld [vmem:[#allocation2 + $0x1270] ss:$20 sps:$4 sm:$0xff]   ;;  %v13545_v52 = vld [vmem:[#allocation2 + $0x124c] ss:$20 sps:$4 sm:$0xff]  }
 0x263   :  { %12545 = vmatprep.subr.bf16.mxu1 %v13490_v50  ;;  %4262 = vmatprep.mubr.bf16.mxu1 %v15010_v33  ;;  %v13540_v50 = vld [vmem:[#allocation2 + $0xf50] ss:$20 sps:$4 sm:$0xff]  }
 0x265   :  { %12536 = vmatpush3.bf16.msra.mxu0 %v13493_v56 }
 0x266   :  { %12546 = vmatpush3.bf16.msra.mxu1 %v13491_v54  ;;  %12745 = vmatprep.subr.bf16.mxu0 %v14887_v12  ;;  %v13548_v54 = vld [vmem:[#allocation2 + $0x11ac] ss:$20 sps:$4 sm:$0xff]  }
 0x267   :  { %12547 = vmatprep.subr.bf16.mxu1 %v13494_v58  ;;  %v13543_v58 = vld [vmem:[#allocation2 + $0x1248] ss:$20 sps:$4 sm:$0xff]  }
 0x268   :  { %4223 = vmatmul.mubr.bf16.vlgmr.msra.gmra.mxu0 %v14993_v7 }
 0x269   :  { %12746 = vmatpush3.bf16.msra.mxu0 %v13498_v62  ;;  %12747 = vmatprep.mubr.msk.bf16.mxu0 %vm14888_vm1, %v14887_v12  ;;  %v13551_v62 = vld [vmem:[#allocation2 + $0x1224] ss:$20 sps:$4 sm:$0xff]  }
 0x26a   :  { %12548 = vmatpush3.bf16.msra.mxu1 %v13495_v59  ;;  %5879 = vmatprep.subr.bf16.mxu0 %v13503_v63  ;;  %v13554_v63 = vld [vmem:[#allocation2 + $0x1184] ss:$20 sps:$4 sm:$0xff]  }
 0x26b   :  { %12549 = vmatprep.subr.bf16.mxu1 %v13496_v60  ;;  %v13546_v60 = vld [vmem:[#allocation2 + $0x11a8] ss:$20 sps:$4 sm:$0xff]  }
 0x26e   :  { %12550 = vmatpush3.bf16.msra.mxu1 %v13497_v0 }
 0x26f   :  { %12551 = vmatprep.subr.bf16.mxu1 %v13499_v1  ;;  %v13549_v1 = vld [vmem:[#allocation2 + $0x1220] ss:$20 sps:$4 sm:$0xff]  }
 0x270   :  { %12748 = vmatmul.mubr.msk.bf16.vlgmr.msra.gmra.mxu0 %vm1761_vm0, %v15086_v8 }
 0x271   :  { %5880 = vmatpush1.bf16.msra.mxu0 %v13501_v4  ;;  %5911 = vmatprep.mubr.bf16.mxu0 %v14982_v47  ;;  %v13557_v4 = vld [vmem:[#allocation2 + $0x11fc] ss:$20 sps:$4 sm:$0xff]  }
 0x272   :  { %12552 = vmatpush3.bf16.msra.mxu1 %v13500_v2  ;;  %5881 = vmatprep.subr.bf16.mxu0 %v13508_v36  ;;  %v13552_v2 = vld [vmem:[#allocation2 + $0x1180] ss:$20 sps:$4 sm:$0xff]   ;;  %v13555_v36 = vld [vmem:[#allocation2 + $0x11f8] ss:$20 sps:$4 sm:$0xff]  }
 0x273   :  { %12553 = vmatprep.subr.bf16.mxu1 %v13504_v5  ;;  %v13560_v5 = vld [vmem:[#allocation2 + $0x115c] ss:$20 sps:$4 sm:$0xff]  }
 0x275   :  { %5882 = vmatpush1.bf16.msra.mxu0 %v13506_v11  ;;  %v13563_v11 = vld [vmem:[#allocation2 + $0x11d4] ss:$20 sps:$4 sm:$0xff]  }
 0x276   :  { %12554 = vmatpush3.bf16.msra.mxu1 %v13505_v10  ;;  %5883 = vmatprep.subr.bf16.mxu0 %v13513_v41  ;;  %v13558_v10 = vld [vmem:[#allocation2 + $0x1158] ss:$20 sps:$4 sm:$0xff]   ;;  %v13561_v41 = vld [vmem:[#allocation2 + $0x11d0] ss:$20 sps:$4 sm:$0xff]  }
 0x277   :  { %12555 = vmatprep.subr.bf16.mxu1 %v13509_v14  ;;  %v13566_v14 = vld [vmem:[#allocation2 + $0x1134] ss:$20 sps:$4 sm:$0xff]  }
 0x279   :  { %v3856_v8 = vpop.f32.mrf.mxu1  ;;  %5884 = vmatpush1.bf16.msra.mxu0 %v13511_v57  ;;  %v13569_v57 = vld [vmem:[#allocation2 + $0x142c] ss:$20 sps:$4 sm:$0xff]  }
 0x27a   :  { %12556 = vmatpush3.bf16.msra.mxu1 %v13510_v53  ;;  %5885 = vmatprep.subr.bf16.mxu0 %v13518_v19  ;;  %v13564_v53 = vld [vmem:[#allocation2 + $0x1130] ss:$20 sps:$4 sm:$0xff]   ;;  %v13567_v19 = vld [vmem:[#allocation2 + $0x1428] ss:$20 sps:$4 sm:$0xff]  }
 0x27b   :  { %v3858_v42 = vpop.f32.mrf.mxu1  ;;  %12557 = vmatprep.subr.bf16.mxu1 %v13514_v18  ;;  %v13572_v18 = vld [vmem:[#allocation2 + $0x110c] ss:$20 sps:$4 sm:$0xff]  }
 0x27d   :  { %v3860_v25 = vpop.f32.mrf.mxu1  ;;  %5886 = vmatpush1.bf16.msra.mxu0 %v13516_v21  ;;  %v13578_v21 = vld [vmem:[#allocation2 + $0x10e4] ss:$20 sps:$4 sm:$0xff]  }
 0x27e   :  { %12558 = vmatpush3.bf16.msra.mxu1 %v13515_v20  ;;  %5887 = vmatprep.subr.bf16.mxu0 %v13524_v23  ;;  %v13570_v20 = vld [vmem:[#allocation2 + $0x1108] ss:$20 sps:$4 sm:$0xff]  }
 0x27f   :  { %v3861_v28 = vpop.f32.mrf.mxu1  ;;  %5920 = vmatprep.subr.bf16.mxu1 %v13521_v22  ;;  %v13573_v22 = vld [vmem:[#allocation2 + $0x1400] ss:$20 sps:$4 sm:$0xff]   ;;  %v13581_v23 = vld [vmem:[#allocation2 + $0x13dc] ss:$20 sps:$4 sm:$0xff]  }
 0x280   :  { %v3897_v31 = vpop.f32.mrf.mxu0  ;;  %v13584_v25 = vld [vmem:[#allocation2 + $0x10bc] ss:$20 sps:$4 sm:$0xff]   ;;  %v13587_v28 = vld [vmem:[#allocation2 + $0x13b4] ss:$20 sps:$4 sm:$0xff]  }
 0x281   :  { %4263 = vmatmul.mubr.bf16.vlgmr.msra.gmra.mxu1 %v15015_v16  ;;  %5888 = vmatpush1.bf16.msra.mxu0 %v13522_v27  ;;  %v15105_v32 = vadd.f32 %v3897_v31, %v3856_v8  ;;  %v13575_v8 = vld [vmem:[#allocation2 + $0x1404] ss:$20 sps:$4 sm:$0xff]  }
 0x282   :  { %5921 = vmatpush1.bf16.msra.mxu1 %v13519_v26  ;;  %v3899_v35 = vpop.f32.mrf.mxu0  ;;  %5889 = vmatprep.subr.bf16.mxu0 %v13530_v30  ;;  %v13579_v26 = vld [vmem:[#allocation2 + $0x13d8] ss:$20 sps:$4 sm:$0xff]   ;;  %v13585_v30 = vld [vmem:[#allocation2 + $0x13b0] ss:$20 sps:$4 sm:$0xff]  }
 0x283   :  { %5922 = vmatprep.subr.bf16.mxu1 %v13527_v29  ;;  %v15107_v39 = vadd.f32 %v3899_v35, %v3858_v42  ;;  %5952 = vmatprep.mubr.bf16.mxu1 %v14987_v51  ;;  %v13576_v42 = vld [vmem:[#allocation2 + $0x10e0] ss:$20 sps:$4 sm:$0xff]   ;;  %v13582_v27 = vld [vmem:[#allocation2 + $0x10b8] ss:$20 sps:$4 sm:$0xff]   ;;  %v13588_v31 = vld [vmem:[#allocation2 + $0x1090] ss:$20 sps:$4 sm:$0xff]  }
 0x284   :  { %v3901_v40 = vpop.f32.mrf.mxu0  ;;  %v13590_v29 = vld [vmem:[#allocation2 + $0x1094] ss:$20 sps:$4 sm:$0xff]  }
 0x285   :  { %5890 = vmatpush1.bf16.msra.mxu0 %v13528_v15  ;;  %v13596_v15 = vld [vmem:[#allocation2 + $0x156c] ss:$20 sps:$4 sm:$0xff]   ;;  %v13591_v35 = vld [vmem:[#allocation2 + $0x1388] ss:$20 sps:$4 sm:$0xff]  }
 0x286   :  { %5923 = vmatpush1.bf16.msra.mxu1 %v13525_v34  ;;  %5891 = vmatprep.subr.bf16.mxu0 %v13536_v38  ;;  %v3902_v46 = vpop.f32.mrf.mxu0  ;;  %v13593_v34 = vld [vmem:[#allocation2 + $0x138c] ss:$20 sps:$4 sm:$0xff]   ;;  %v13599_v38 = vld [vmem:[#allocation2 + $0x1364] ss:$20 sps:$4 sm:$0xff]  }
 0x287   :  { %5924 = vmatprep.subr.bf16.mxu1 %v13533_v37  ;;  %v13594_v37 = vld [vmem:[#allocation2 + $0x1568] ss:$20 sps:$4 sm:$0xff]   ;;  %v13597_v40 = vld [vmem:[#allocation2 + $0x1360] ss:$20 sps:$4 sm:$0xff]   ;;  %v13603_v46 = vld [vmem:[#allocation2 + $0x1338] ss:$20 sps:$4 sm:$0xff]  }
 0x288   :  { %v15110_v49 = vpop.f32.mrf.mxu0 }
 0x289   :  { %5892 = vmatpush1.bf16.msra.mxu0 %v13534_v43  ;;  %v13600_v43 = vld [vmem:[#allocation2 + $0x1540] ss:$20 sps:$4 sm:$0xff]  }
 0x28a   :  { %5925 = vmatpush1.bf16.msra.mxu1 %v13531_v17  ;;  %5893 = vmatprep.subr.bf16.mxu0 %v13542_v45  ;;  %v15112_v56 = vpop.f32.mrf.mxu0  ;;  %v13602_v17 = vld [vmem:[#allocation2 + $0x1544] ss:$20 sps:$4 sm:$0xff]   ;;  %v13608_v45 = vld [vmem:[#allocation2 + $0x151c] ss:$20 sps:$4 sm:$0xff]  }
 0x28b   :  { %5926 = vmatprep.subr.bf16.mxu1 %v13539_v44  ;;  %v13605_v44 = vld [vmem:[#allocation2 + $0x133c] ss:$20 sps:$4 sm:$0xff]  }
 0x28c   :  { %v3983_v59 = vpop.f32.mrf.mxu0 }
 0x28d   :  { %5894 = vmatpush1.bf16.msra.mxu0 %v13540_v50  ;;  %v13611_v50 = vld [vmem:[#allocation2 + $0x1314] ss:$20 sps:$4 sm:$0xff]  }
 0x28e   :  { %5927 = vmatpush1.bf16.msra.mxu1 %v13537_v48  ;;  %5895 = vmatprep.subr.bf16.mxu0 %v13548_v54  ;;  %v3984_v0 = vpop.f32.mrf.mxu0  ;;  %v13606_v48 = vld [vmem:[#allocation2 + $0x1518] ss:$20 sps:$4 sm:$0xff]  }
 0x28f   :  { %5928 = vmatprep.subr.bf16.mxu1 %v13545_v52  ;;  %v13614_v52 = vld [vmem:[#allocation2 + $0x14f4] ss:$20 sps:$4 sm:$0xff]  }
 0x291   :  { %5896 = vmatpush2.bf16.msra.mxu0 %v13546_v60  ;;  %v13612_v60 = vld [vmem:[#allocation2 + $0x14f0] ss:$20 sps:$4 sm:$0xff]  }
 0x292   :  { %5929 = vmatpush1.bf16.msra.mxu1 %v13543_v58  ;;  %5897 = vmatprep.subr.bf16.mxu0 %v13554_v63  ;;  %v13609_v58 = vld [vmem:[#allocation2 + $0x1310] ss:$20 sps:$4 sm:$0xff]   ;;  %v13620_v63 = vld [vmem:[#allocation2 + $0x14cc] ss:$20 sps:$4 sm:$0xff]  }
 0x293   :  { %5930 = vmatprep.subr.bf16.mxu1 %v13551_v62  ;;  %v13617_v62 = vld [vmem:[#allocation2 + $0x16d4] ss:$20 sps:$4 sm:$0xff]  }
 0x295   :  { %5898 = vmatpush2.bf16.msra.mxu0 %v13552_v2 }
 0x296   :  { %5931 = vmatpush1.bf16.msra.mxu1 %v13549_v1  ;;  %5899 = vmatprep.subr.bf16.mxu0 %v13560_v5  ;;  %v13615_v5 = vld [vmem:[#allocation2 + $0x16d0] ss:$20 sps:$4 sm:$0xff]  }
 0x297   :  { %5932 = vmatprep.subr.bf16.mxu1 %v13557_v4 }
 0x299   :  { %5900 = vmatpush2.bf16.msra.mxu0 %v13558_v10  ;;  %v13618_v10 = vld [vmem:[#allocation2 + $0x14c8] ss:$20 sps:$4 sm:$0xff]  }
 0x29a   :  { %5933 = vmatpush1.bf16.msra.mxu1 %v13555_v36  ;;  %5901 = vmatprep.subr.bf16.mxu0 %v13566_v14  ;;  %v13626_v14 = vld [vmem:[#allocation2 + $0x1074] ss:$20 sps:$4 sm:$0xff]  }
 0x29b   :  { %5934 = vmatprep.subr.bf16.mxu1 %v13563_v11  ;;  %v13623_v11 = vld [vmem:[#allocation2 + $0x14a4] ss:$20 sps:$4 sm:$0xff]  }
 0x29d   :  { %5902 = vmatpush2.bf16.msra.mxu0 %v13564_v53  ;;  %v13624_v53 = vld [vmem:[#allocation2 + $0x1070] ss:$20 sps:$4 sm:$0xff]  }
 0x29e   :  { %5935 = vmatpush1.bf16.msra.mxu1 %v13561_v41  ;;  %5903 = vmatprep.subr.bf16.mxu0 %v13572_v18  ;;  %v13632_v18 = vld [vmem:[#allocation2 + $0x104c] ss:$20 sps:$4 sm:$0xff]  }
 0x29f   :  { %5936 = vmatprep.subr.bf16.mxu1 %v13569_v57  ;;  %v13627_v57 = vld [vmem:[#allocation2 + $0x1478] ss:$20 sps:$4 sm:$0xff]  }
 0x2a1   :  { %5904 = vmatpush2.bf16.msra.mxu0 %v13570_v20  ;;  %v15133_v20 = vld [vmem:[%s15391_s0 + $0x18] ss:$0 sps:$4 sm:$0xff]  }
 0x2a2   :  { %5937 = vmatpush2.bf16.msra.mxu1 %v13567_v19  ;;  %5905 = vmatprep.subr.bf16.mxu0 %v13578_v21  ;;  %v13635_v19 = vld [vmem:[#allocation2 + $0x1454] ss:$20 sps:$4 sm:$0xff]  }
 0x2a3   :  { %5938 = vmatprep.subr.bf16.mxu1 %v13575_v8  ;;  %v13630_v8 = vld [vmem:[#allocation2 + $0x1048] ss:$20 sps:$4 sm:$0xff]  }
 0x2a5   :  { %5906 = vmatpush2.bf16.msra.mxu0 %v13576_v42  ;;  %v13638_v42 = vld [vmem:[#allocation2 + $0x1024] ss:$20 sps:$4 sm:$0xff]  }
 0x2a6   :  { %5939 = vmatpush2.bf16.msra.mxu1 %v13573_v22  ;;  %5907 = vmatprep.subr.bf16.mxu0 %v13584_v25  ;;  %v13633_v22 = vld [vmem:[#allocation2 + $0x1450] ss:$20 sps:$4 sm:$0xff]  }
 0x2a7   :  { %5940 = vmatprep.subr.bf16.mxu1 %v13581_v23  ;;  %v13641_v23 = vld [vmem:[#allocation2 + $0x16ac] ss:$20 sps:$4 sm:$0xff]  }
 0x2a9   :  { %5908 = vmatpush2.bf16.msra.mxu0 %v13582_v27 }
 0x2aa   :  { %5941 = vmatpush2.bf16.msra.mxu1 %v13579_v26  ;;  %5909 = vmatprep.subr.bf16.mxu0 %v13590_v29  ;;  %v13636_v26 = vld [vmem:[#allocation2 + $0x1020] ss:$20 sps:$4 sm:$0xff]   ;;  %v13644_v29 = vld [vmem:[#allocation2 + $0xffc] ss:$20 sps:$4 sm:$0xff]  }
 0x2ab   :  { %5942 = vmatprep.subr.bf16.mxu1 %v13587_v28  ;;  %v13639_v28 = vld [vmem:[#allocation2 + $0x16a8] ss:$20 sps:$4 sm:$0xff]  }
 0x2ad   :  { %5910 = vmatpush2.bf16.msra.mxu0 %v13588_v31 }
 0x2ae   :  { %5943 = vmatpush2.bf16.msra.mxu1 %v13585_v30  ;;  %5961 = vmatprep.subr.bf16.mxu0 %v13596_v15  ;;  %v13647_v30 = vld [vmem:[#allocation2 + $0x1684] ss:$20 sps:$4 sm:$0xff]   ;;  %v13645_v15 = vld [vmem:[#allocation2 + $0x1680] ss:$20 sps:$4 sm:$0xff]  }
 0x2af   :  { %5944 = vmatprep.subr.bf16.mxu1 %v13593_v34  ;;  %v13642_v34 = vld [vmem:[#allocation2 + $0xff8] ss:$20 sps:$4 sm:$0xff]  }
 0x2b0   :  { %5912 = vmatmul.mubr.bf16.vlgmr.msra.gmra.mxu0 %v14991_v6 }
 0x2b1   :  { %5962 = vmatpush1.bf16.msra.mxu0 %v13594_v37  ;;  %5993 = vmatprep.mubr.bf16.mxu0 %v15010_v33  ;;  %v13653_v37 = vld [vmem:[#allocation2 + $0x165c] ss:$20 sps:$4 sm:$0xff]  }
 0x2b2   :  { %5945 = vmatpush2.bf16.msra.mxu1 %v13591_v35  ;;  %5963 = vmatprep.subr.bf16.mxu0 %v13602_v17  ;;  %v13650_v35 = vld [vmem:[#allocation2 + $0xfd4] ss:$20 sps:$4 sm:$0xff]   ;;  %v13651_v17 = vld [vmem:[#allocation2 + $0x1658] ss:$20 sps:$4 sm:$0xff]  }
 0x2b3   :  { %5946 = vmatprep.subr.bf16.mxu1 %v13599_v38  ;;  %v13648_v38 = vld [vmem:[#allocation2 + $0xfd0] ss:$20 sps:$4 sm:$0xff]  }
 0x2b5   :  { %5964 = vmatpush1.bf16.msra.mxu0 %v13600_v43  ;;  %v13659_v43 = vld [vmem:[#allocation2 + $0x1634] ss:$20 sps:$4 sm:$0xff]  }
 0x2b6   :  { %5947 = vmatpush2.bf16.msra.mxu1 %v13597_v40  ;;  %5965 = vmatprep.subr.bf16.mxu0 %v13608_v45  ;;  %v13656_v40 = vld [vmem:[#allocation2 + $0xfac] ss:$20 sps:$4 sm:$0xff]   ;;  %v13657_v45 = vld [vmem:[#allocation2 + $0x1630] ss:$20 sps:$4 sm:$0xff]  }
 0x2b7   :  { %5948 = vmatprep.subr.bf16.mxu1 %v13605_v44  ;;  %v13654_v44 = vld [vmem:[#allocation2 + $0xfa8] ss:$20 sps:$4 sm:$0xff]  }
 0x2b9   :  { %v3938_v54 = vpop.f32.mrf.mxu1  ;;  %5966 = vmatpush1.bf16.msra.mxu0 %v13606_v48  ;;  %v13665_v48 = vld [vmem:[#allocation2 + $0x160c] ss:$20 sps:$4 sm:$0xff]  }
 0x2ba   :  { %v3939_v59 = vadd.f32 %v3938_v54, %v15105_v32  ;;  %5949 = vmatpush2.bf16.msra.mxu1 %v13603_v46  ;;  %5967 = vmatprep.subr.bf16.mxu0 %v13614_v52  ;;  %v13662_v46 = vld [vmem:[#allocation2 + $0xf84] ss:$20 sps:$4 sm:$0xff]   ;;  %v13663_v52 = vld [vmem:[#allocation2 + $0x1608] ss:$20 sps:$4 sm:$0xff]  }
 0x2bb   :  { %v3940_v0 = vpop.f32.mrf.mxu1  ;;  %5950 = vmatprep.subr.bf16.mxu1 %v13611_v50  ;;  %v13660_v50 = vld [vmem:[#allocation2 + $0xf80] ss:$20 sps:$4 sm:$0xff]   ;;  %v13668_v54 = vld [vmem:[#allocation2 + $0xf5c] ss:$20 sps:$4 sm:$0xff]  }
 0x2bc   :  { %v15118_v1 = vadd.f32 %v15110_v49, %v3939_v59  ;;  %v3941_v2 = vadd.f32 %v3940_v0, %v15107_v39  ;;  %v13621_v39 = vld [vmem:[#allocation2 + $0x14a0] ss:$20 sps:$4 sm:$0xff]   ;;  %v13666_v59 = vld [vmem:[#allocation2 + $0xf58] ss:$20 sps:$4 sm:$0xff]   ;;  %v13672_v0 = vld [vmem:[#allocation2 + $0x11b0] ss:$20 sps:$4 sm:$0xff]  }
 0x2bd   :  { %v3942_v4 = vpop.f32.mrf.mxu1  ;;  %5968 = vmatpush1.bf16.msra.mxu0 %v13612_v60  ;;  %v13669_v60 = vld [vmem:[#allocation2 + $0x15e0] ss:$20 sps:$4 sm:$0xff]  }
 0x2be   :  { %v8424_v36 = vmax.f32 %v15058_v3, %v15118_v1  ;;  %v15124_v32 = vadd.f32 %v15112_v56, %v3941_v2  ;;  %5951 = vmatpush2.bf16.msra.mxu1 %v13609_v58  ;;  %5969 = vmatprep.subr.bf16.mxu0 %v13620_v63  ;;  %v13629_v56 = vld [vmem:[#allocation2 + $0x147c] ss:$20 sps:$4 sm:$0xff]   ;;  %v13671_v58 = vld [vmem:[#allocation2 + $0x15e4] ss:$20 sps:$4 sm:$0xff]   ;;  %v13680_v4 = vld [vmem:[#allocation2 + $0x118c] ss:$20 sps:$4 sm:$0xff]  }
 0x2bf   :  { %v3943_v41 = vpop.f32.mrf.mxu1  ;;  %6016 = vmatprep.subr.bf16.mxu1 %v13617_v62  ;;  %v13674_v62 = vld [vmem:[#allocation2 + $0x11b4] ss:$20 sps:$4 sm:$0xff]   ;;  %v13677_v63 = vld [vmem:[#allocation2 + $0x15bc] ss:$20 sps:$4 sm:$0xff]   ;;  %v13675_v2 = vld [vmem:[#allocation2 + $0x15b8] ss:$20 sps:$4 sm:$0xff]  }
 0x2c0   :  { %v8425_v49 = vmax.f32 %v15062_v9, %v15124_v32  ;;  %v13689_v41 = vld [vmem:[#allocation2 + $0x12f4] ss:$20 sps:$4 sm:$0xff]   ;;  %v14333_v9 = vld [vmem:[#allocation6 + $0x214] ss:$8 sps:$4 sm:$0xff]  }
 0x2c1   :  { %5953 = vmatmul.mubr.bf16.vlgmr.msra.gmra.mxu1 %v14993_v7  ;;  %5970 = vmatpush1.bf16.msra.mxu0 %v13618_v10  ;;  %v13678_v10 = vld [vmem:[#allocation2 + $0x1188] ss:$20 sps:$4 sm:$0xff]  }
 0x2c2   :  { %6017 = vmatpush1.bf16.msra.mxu1 %v13615_v5  ;;  %5971 = vmatprep.subr.bf16.mxu0 %v13623_v11  ;;  %v13683_v5 = vld [vmem:[#allocation2 + $0x1594] ss:$20 sps:$4 sm:$0xff]   ;;  %v13681_v11 = vld [vmem:[#allocation2 + $0x1590] ss:$20 sps:$4 sm:$0xff]  }
 0x2c3   :  { %6034 = vmatprep.mubr.bf16.mxu1 %v14886_v13  ;;  %6043 = vmatprep.subr.bf16.mxu1 %v13626_v14  ;;  %v13686_v14 = vld [vmem:[#allocation2 + $0x1164] ss:$20 sps:$4 sm:$0xff]   ;;  %v14327_v3 = vld [vmem:[#allocation6 + $0x224] ss:$8 sps:$4 sm:$0xff]  }
 0x2c5   :  { %5972 = vmatpush1.bf16.msra.mxu0 %v13621_v39  ;;  %v13684_v39 = vld [vmem:[#allocation2 + $0x1160] ss:$20 sps:$4 sm:$0xff]  }
 0x2c6   :  { %5973 = vmatprep.subr.bf16.mxu0 %v13629_v56  ;;  %v13687_v56 = vld [vmem:[#allocation2 + $0x12f0] ss:$20 sps:$4 sm:$0xff]  }
 0x2c8   :  { %v15137_v21 = vpop.f32.mrf.mxu0 }
 0x2c9   :  { %11856 = vmatmul.mubr.msk.bf16.vlgmr.msra.gmra.mxu1 %vm1761_vm0, %v15133_v20  ;;  %5974 = vmatpush1.bf16.msra.mxu0 %v13627_v57  ;;  %v13695_v57 = vld [vmem:[#allocation2 + $0x12cc] ss:$20 sps:$4 sm:$0xff]  }
 0x2ca   :  { %6044 = vmatpush1.bf16.msra.mxu1 %v13624_v53  ;;  %5975 = vmatprep.subr.bf16.mxu0 %v13635_v19  ;;  %v15139_v25 = vpop.f32.mrf.mxu0  ;;  %v13692_v53 = vld [vmem:[#allocation2 + $0x113c] ss:$20 sps:$4 sm:$0xff]  }
 0x2cb   :  { %6045 = vmatprep.subr.bf16.mxu1 %v13632_v18  ;;  %6075 = vmatprep.mubr.bf16.mxu1 %v14982_v47  ;;  %v13690_v18 = vld [vmem:[#allocation2 + $0x1138] ss:$20 sps:$4 sm:$0xff]   ;;  %v13693_v19 = vld [vmem:[#allocation2 + $0x12c8] ss:$20 sps:$4 sm:$0xff]  }
 0x2cc   :  { %v4024_v27 = vpop.f32.mrf.mxu0 }
 0x2cd   :  { %5976 = vmatpush1.bf16.msra.mxu0 %v13633_v22  ;;  %v13701_v22 = vld [vmem:[#allocation2 + $0x12a4] ss:$20 sps:$4 sm:$0xff]   ;;  %v13707_v27 = vld [vmem:[#allocation2 + $0x127c] ss:$20 sps:$4 sm:$0xff]  }
 0x2ce   :  { %6046 = vmatpush1.bf16.msra.mxu1 %v13630_v8  ;;  %5977 = vmatprep.subr.bf16.mxu0 %v13641_v23  ;;  %v4025_v31 = vpop.f32.mrf.mxu0  ;;  %v13698_v8 = vld [vmem:[#allocation2 + $0x1114] ss:$20 sps:$4 sm:$0xff]  }
 0x2cf   :  { %6047 = vmatprep.subr.bf16.mxu1 %v13638_v42  ;;  %v13696_v42 = vld [vmem:[#allocation2 + $0x1110] ss:$20 sps:$4 sm:$0xff]   ;;  %v13699_v23 = vld [vmem:[#allocation2 + $0x12a0] ss:$20 sps:$4 sm:$0xff]   ;;  %v13705_v31 = vld [vmem:[#allocation2 + $0x1278] ss:$20 sps:$4 sm:$0xff]  }
 0x2d1   :  { %5978 = vmatpush2.bf16.msra.mxu0 %v13639_v28 }
 0x2d2   :  { %6048 = vmatpush1.bf16.msra.mxu1 %v13636_v26  ;;  %5979 = vmatprep.subr.bf16.mxu0 %v13647_v30  ;;  %v13704_v26 = vld [vmem:[#allocation2 + $0x10ec] ss:$20 sps:$4 sm:$0xff]   ;;  %v13702_v30 = vld [vmem:[#allocation2 + $0x10e8] ss:$20 sps:$4 sm:$0xff]  }
 0x2d3   :  { %6049 = vmatprep.subr.bf16.mxu1 %v13644_v29 }
 0x2d5   :  { %5980 = vmatpush2.bf16.msra.mxu0 %v13645_v15 }
 0x2d6   :  { %6050 = vmatpush1.bf16.msra.mxu1 %v13642_v34  ;;  %5981 = vmatprep.subr.bf16.mxu0 %v13653_v37  ;;  %v13710_v34 = vld [vmem:[#allocation2 + $0x10c4] ss:$20 sps:$4 sm:$0xff]  }
 0x2d7   :  { %6051 = vmatprep.subr.bf16.mxu1 %v13650_v35  ;;  %v13713_v35 = vld [vmem:[#allocation2 + $0x1254] ss:$20 sps:$4 sm:$0xff]  }
 0x2d9   :  { %5982 = vmatpush2.bf16.msra.mxu0 %v13651_v17  ;;  %v13708_v17 = vld [vmem:[#allocation2 + $0x10c0] ss:$20 sps:$4 sm:$0xff]  }
 0x2da   :  { %6052 = vmatpush1.bf16.msra.mxu1 %v13648_v38  ;;  %5983 = vmatprep.subr.bf16.mxu0 %v13659_v43  ;;  %v13716_v43 = vld [vmem:[#allocation2 + $0x109c] ss:$20 sps:$4 sm:$0xff]  }
 0x2db   :  { %6053 = vmatprep.subr.bf16.mxu1 %v13656_v40  ;;  %v13711_v40 = vld [vmem:[#allocation2 + $0x1250] ss:$20 sps:$4 sm:$0xff]  }
 0x2dd   :  { %5984 = vmatpush2.bf16.msra.mxu0 %v13657_v45  ;;  %v13714_v45 = vld [vmem:[#allocation2 + $0x1098] ss:$20 sps:$4 sm:$0xff]  }
 0x2de   :  { %6054 = vmatpush1.bf16.msra.mxu1 %v13654_v44  ;;  %5985 = vmatprep.subr.bf16.mxu0 %v13665_v48  ;;  %v13717_v48 = vld [vmem:[#allocation2 + $0x1228] ss:$20 sps:$4 sm:$0xff]  }
 0x2df   :  { %6055 = vmatprep.subr.bf16.mxu1 %v13662_v46 }
 0x2e1   :  { %5986 = vmatpush2.bf16.msra.mxu0 %v13663_v52 }
 0x2e2   :  { %6056 = vmatpush1.bf16.msra.mxu1 %v13660_v50  ;;  %5987 = vmatprep.subr.bf16.mxu0 %v13671_v58  ;;  %v13722_v50 = vld [vmem:[#allocation2 + $0x1574] ss:$20 sps:$4 sm:$0xff]   ;;  %v13720_v58 = vld [vmem:[#allocation2 + $0x1570] ss:$20 sps:$4 sm:$0xff]  }
 0x2e3   :  { %6057 = vmatprep.subr.bf16.mxu1 %v13668_v54 }
 0x2e5   :  { %5988 = vmatpush2.bf16.msra.mxu0 %v13669_v60 }
 0x2e6   :  { %6058 = vmatpush1.bf16.msra.mxu1 %v13666_v59  ;;  %5989 = vmatprep.subr.bf16.mxu0 %v13677_v63  ;;  %v13723_v59 = vld [vmem:[#allocation2 + $0x1200] ss:$20 sps:$4 sm:$0xff]   ;;  %v13731_v63 = vld [vmem:[#allocation2 + $0x11dc] ss:$20 sps:$4 sm:$0xff]  }
 0x2e7   :  { %6059 = vmatprep.subr.bf16.mxu1 %v13674_v62  ;;  %v13728_v62 = vld [vmem:[#allocation2 + $0x154c] ss:$20 sps:$4 sm:$0xff]  }
 0x2e9   :  { %5990 = vmatpush2.bf16.msra.mxu0 %v13675_v2 }
 0x2ea   :  { %6060 = vmatpush2.bf16.msra.mxu1 %v13672_v0  ;;  %5991 = vmatprep.subr.bf16.mxu0 %v13683_v5  ;;  %v13729_v5 = vld [vmem:[#allocation2 + $0x11d8] ss:$20 sps:$4 sm:$0xff]  }
 0x2eb   :  { %6061 = vmatprep.subr.bf16.mxu1 %v13680_v4  ;;  %v13726_v4 = vld [vmem:[#allocation2 + $0x1548] ss:$20 sps:$4 sm:$0xff]  }
 0x2ed   :  { %5992 = vmatpush2.bf16.msra.mxu0 %v13681_v11  ;;  %v13734_v11 = vld [vmem:[#allocation2 + $0x1524] ss:$20 sps:$4 sm:$0xff]  }
 0x2ee   :  { %6062 = vmatpush2.bf16.msra.mxu1 %v13678_v10  ;;  %6084 = vmatprep.subr.bf16.mxu0 %v13689_v41 }
 0x2ef   :  { %6063 = vmatprep.subr.bf16.mxu1 %v13686_v14  ;;  %v13737_v14 = vld [vmem:[#allocation2 + $0x1434] ss:$20 sps:$4 sm:$0xff]  }
 0x2f0   :  { %5994 = vmatmul.mubr.bf16.vlgmr.msra.gmra.mxu0 %v15015_v16 }
 0x2f1   :  { %6085 = vmatpush1.bf16.msra.mxu0 %v13687_v56  ;;  %6116 = vmatprep.mubr.bf16.mxu0 %v14987_v51 }
 0x2f2   :  { %6064 = vmatpush2.bf16.msra.mxu1 %v13684_v39  ;;  %6086 = vmatprep.subr.bf16.mxu0 %v13695_v57 }
 0x2f3   :  { %6065 = vmatprep.subr.bf16.mxu1 %v13692_v53 }
 0x2f5   :  { %6087 = vmatpush1.bf16.msra.mxu0 %v13693_v19  ;;  %v13735_v19 = vld [vmem:[#allocation2 + $0x1430] ss:$20 sps:$4 sm:$0xff]  }
 0x2f6   :  { %6066 = vmatpush2.bf16.msra.mxu1 %v13690_v18  ;;  %6088 = vmatprep.subr.bf16.mxu0 %v13701_v22  ;;  %v13732_v18 = vld [vmem:[#allocation2 + $0x1520] ss:$20 sps:$4 sm:$0xff]  }
 0x2f7   :  { %6067 = vmatprep.subr.bf16.mxu1 %v13698_v8  ;;  %v13740_v8 = vld [vmem:[#allocation2 + $0x14fc] ss:$20 sps:$4 sm:$0xff]   ;;  %v13743_v22 = vld [vmem:[#allocation2 + $0x140c] ss:$20 sps:$4 sm:$0xff]  }
 0x2f9   :  { %v4061_v28 = vpop.f32.mrf.mxu1  ;;  %6089 = vmatpush1.bf16.msra.mxu0 %v13699_v23 }
 0x2fa   :  { %6068 = vmatpush2.bf16.msra.mxu1 %v13696_v42  ;;  %v4062_v29 = vadd.f32 %v4061_v28, %v15137_v21  ;;  %6090 = vmatprep.subr.bf16.mxu0 %v13707_v27  ;;  %v13719_v21 = vld [vmem:[#allocation2 + $0x122c] ss:$20 sps:$4 sm:$0xff]   ;;  %v13741_v27 = vld [vmem:[#allocation2 + $0x1408] ss:$20 sps:$4 sm:$0xff]  }
 0x2fb   :  { %v4063_v15 = vpop.f32.mrf.mxu1  ;;  %6069 = vmatprep.subr.bf16.mxu1 %v13704_v26  ;;  %v13738_v26 = vld [vmem:[#allocation2 + $0x14f8] ss:$20 sps:$4 sm:$0xff]   ;;  %v13746_v28 = vld [vmem:[#allocation2 + $0x14d4] ss:$20 sps:$4 sm:$0xff]  }
 0x2fc   :  { %v4064_v37 = vadd.f32 %v4063_v15, %v15139_v25  ;;  %v13725_v25 = vld [vmem:[#allocation2 + $0x1204] ss:$20 sps:$4 sm:$0xff]   ;;  %v13755_v15 = vld [vmem:[#allocation2 + $0x13bc] ss:$20 sps:$4 sm:$0xff]  }
 0x2fd   :  { %v4065_v38 = vpop.f32.mrf.mxu1  ;;  %6091 = vmatpush1.bf16.msra.mxu0 %v13705_v31  ;;  %v13747_v31 = vld [vmem:[#allocation2 + $0x13e0] ss:$20 sps:$4 sm:$0xff]  }
 0x2fe   :  { %6070 = vmatpush2.bf16.msra.mxu1 %v13702_v30  ;;  %6092 = vmatprep.subr.bf16.mxu0 %v13713_v35  ;;  %v13744_v30 = vld [vmem:[#allocation2 + $0x14d0] ss:$20 sps:$4 sm:$0xff]   ;;  %v13750_v35 = vld [vmem:[#allocation2 + $0x14a8] ss:$20 sps:$4 sm:$0xff]  }
 0x2ff   :  { %v4066_v44 = vpop.f32.mrf.mxu1  ;;  %6071 = vmatprep.subr.bf16.mxu1 %v13710_v34  ;;  %v13752_v34 = vld [vmem:[#allocation2 + $0x14ac] ss:$20 sps:$4 sm:$0xff]   ;;  %v13758_v38 = vld [vmem:[#allocation2 + $0x1484] ss:$20 sps:$4 sm:$0xff]  }
 0x300   :  { %v13764_v44 = vld [vmem:[#allocation2 + $0x145c] ss:$20 sps:$4 sm:$0xff]  }
 0x301   :  { %v4143_v46 = vpop.f32.mrf.mxu1  ;;  %6093 = vmatpush1.bf16.msra.mxu0 %v13711_v40  ;;  %v13756_v40 = vld [vmem:[#allocation2 + $0x1480] ss:$20 sps:$4 sm:$0xff]  }
 0x302   :  { %6072 = vmatpush2.bf16.msra.mxu1 %v13708_v17  ;;  %6094 = vmatprep.subr.bf16.mxu0 %v13719_v21  ;;  %v13761_v17 = vld [vmem:[#allocation2 + $0x1394] ss:$20 sps:$4 sm:$0xff]   ;;  %v13767_v21 = vld [vmem:[#allocation2 + $0x136c] ss:$20 sps:$4 sm:$0xff]  }
 0x303   :  { %v4145_v52 = vpop.f32.mrf.mxu1  ;;  %6073 = vmatprep.subr.bf16.mxu1 %v13716_v43  ;;  %v13759_v43 = vld [vmem:[#allocation2 + $0x1390] ss:$20 sps:$4 sm:$0xff]  }
 0x305   :  { %v4147_v54 = vpop.f32.mrf.mxu1  ;;  %6095 = vmatpush1.bf16.msra.mxu0 %v13717_v48  ;;  %v13765_v48 = vld [vmem:[#allocation2 + $0x1368] ss:$20 sps:$4 sm:$0xff]  }
 0x306   :  { %6074 = vmatpush2.bf16.msra.mxu1 %v13714_v45  ;;  %6096 = vmatprep.subr.bf16.mxu0 %v13725_v25  ;;  %v13773_v25 = vld [vmem:[#allocation2 + $0x1344] ss:$20 sps:$4 sm:$0xff]  }
 0x307   :  { %v4148_v60 = vpop.f32.mrf.mxu1  ;;  %6125 = vmatprep.subr.bf16.mxu1 %v13722_v50  ;;  %v13770_v50 = vld [vmem:[#allocation2 + $0x16b4] ss:$20 sps:$4 sm:$0xff]  }
 0x308   :  { %v4102_v0 = vpop.f32.mrf.mxu0  ;;  %v13771_v60 = vld [vmem:[#allocation2 + $0x1340] ss:$20 sps:$4 sm:$0xff]  }
 0x309   :  { %6076 = vmatmul.mubr.bf16.vlgmr.msra.gmra.mxu1 %v14991_v6  ;;  %v4103_v2 = vadd.f32 %v4102_v0, %v4062_v29  ;;  %6097 = vmatpush1.bf16.msra.mxu0 %v13723_v59  ;;  %v13749_v29 = vld [vmem:[#allocation2 + $0x13e4] ss:$20 sps:$4 sm:$0xff]   ;;  %v13779_v0 = vld [vmem:[#allocation2 + $0x131c] ss:$20 sps:$4 sm:$0xff]  }
 0x30a   :  { %6126 = vmatpush1.bf16.msra.mxu1 %v13720_v58  ;;  %v4104_v10 = vpop.f32.mrf.mxu0  ;;  %6098 = vmatprep.subr.bf16.mxu0 %v13731_v63  ;;  %v13768_v59 = vld [vmem:[#allocation2 + $0x16b0] ss:$20 sps:$4 sm:$0xff]  }
 0x30b   :  { %6127 = vmatprep.subr.bf16.mxu1 %v13728_v62  ;;  %v15147_v41 = vadd.f32 %v4143_v46, %v4103_v2  ;;  %v4105_v39 = vadd.f32 %v4104_v10, %v4064_v37  ;;  %6157 = vmatprep.mubr.bf16.mxu1 %v15010_v33  ;;  %v13753_v37 = vld [vmem:[#allocation2 + $0x13b8] ss:$20 sps:$4 sm:$0xff]  }
 0x30c   :  { %v4106_v56 = vpop.f32.mrf.mxu0  ;;  %v13762_v46 = vld [vmem:[#allocation2 + $0x1458] ss:$20 sps:$4 sm:$0xff]  }
 0x30d   :  { %v8426_v53 = vmax.f32 %v15077_v55, %v15147_v41  ;;  %v15152_v57 = vadd.f32 %v4145_v52, %v4105_v39  ;;  %6099 = vmatpush1.bf16.msra.mxu0 %v13729_v5  ;;  %v13776_v62 = vld [vmem:[#allocation2 + $0x168c] ss:$20 sps:$4 sm:$0xff]   ;;  %v13782_v10 = vld [vmem:[#allocation2 + $0x1664] ss:$20 sps:$4 sm:$0xff]  }
 0x30e   :  { %6128 = vmatpush1.bf16.msra.mxu1 %v13726_v4  ;;  %6100 = vmatprep.subr.bf16.mxu0 %v13737_v14  ;;  %v4107_v42 = vpop.f32.mrf.mxu0  ;;  %v13774_v4 = vld [vmem:[#allocation2 + $0x1688] ss:$20 sps:$4 sm:$0xff]   ;;  %v13777_v5 = vld [vmem:[#allocation2 + $0x1318] ss:$20 sps:$4 sm:$0xff]  }
 0x30f   :  { %6129 = vmatprep.subr.bf16.mxu1 %v13734_v11  ;;  %v8427_v23 = vmax.f32 %v15079_v61, %v15152_v57  ;;  %v13788_v14 = vld [vmem:[#allocation2 + $0x16dc] ss:$20 sps:$4 sm:$0xff]  }
 0x310   :  { %v14292_v55 = vld [vmem:[#allocation6 + $0x2a0] ss:$8 sps:$4 sm:$0xff]   ;;  %v14297_v41 = vld [vmem:[#allocation6 + $0x294] ss:$8 sps:$4 sm:$0xff]   ;;  %v14295_v61 = vld [vmem:[#allocation6 + $0x290] ss:$8 sps:$4 sm:$0xff]  }
 0x311   :  { %6101 = vmatpush2.bf16.msra.mxu0 %v13735_v19  ;;  %v13780_v19 = vld [vmem:[#allocation2 + $0x1660] ss:$20 sps:$4 sm:$0xff]  }
 0x312   :  { %6130 = vmatpush1.bf16.msra.mxu1 %v13732_v18  ;;  %6102 = vmatprep.subr.bf16.mxu0 %v13743_v22  ;;  %v13785_v22 = vld [vmem:[#allocation2 + $0x163c] ss:$20 sps:$4 sm:$0xff]  }
 0x313   :  { %6131 = vmatprep.subr.bf16.mxu1 %v13740_v8  ;;  %v13786_v8 = vld [vmem:[#allocation2 + $0x16d8] ss:$20 sps:$4 sm:$0xff]  }
 0x315   :  { %6103 = vmatpush2.bf16.msra.mxu0 %v13741_v27 }
 0x316   :  { %6132 = vmatpush1.bf16.msra.mxu1 %v13738_v26  ;;  %6104 = vmatprep.subr.bf16.mxu0 %v13749_v29  ;;  %v13792_v26 = vld [vmem:[#allocation2 + $0x11b8] ss:$20 sps:$4 sm:$0xff]   ;;  %v13791_v29 = vld [vmem:[#allocation2 + $0x1614] ss:$20 sps:$4 sm:$0xff]  }
 0x317   :  { %6133 = vmatprep.subr.bf16.mxu1 %v13746_v28  ;;  %v13783_v28 = vld [vmem:[#allocation2 + $0x1638] ss:$20 sps:$4 sm:$0xff]  }
 0x319   :  { %6105 = vmatpush2.bf16.msra.mxu0 %v13747_v31 }
 0x31a   :  { %6134 = vmatpush1.bf16.msra.mxu1 %v13744_v30  ;;  %6106 = vmatprep.subr.bf16.mxu0 %v13755_v15  ;;  %v13793_v15 = vld [vmem:[#allocation2 + $0x1078] ss:$20 sps:$4 sm:$0xff]  }
 0x31b   :  { %6135 = vmatprep.subr.bf16.mxu1 %v13752_v34  ;;  %v13789_v34 = vld [vmem:[#allocation2 + $0x1610] ss:$20 sps:$4 sm:$0xff]  }
 0x31d   :  { %6107 = vmatpush2.bf16.msra.mxu0 %v13753_v37  ;;  %v13797_v37 = vld [vmem:[#allocation2 + $0x1190] ss:$20 sps:$4 sm:$0xff]  }
 0x31e   :  { %6136 = vmatpush1.bf16.msra.mxu1 %v13750_v35  ;;  %6108 = vmatprep.subr.bf16.mxu0 %v13761_v17  ;;  %v13796_v35 = vld [vmem:[#allocation2 + $0x15ec] ss:$20 sps:$4 sm:$0xff]   ;;  %v13794_v17 = vld [vmem:[#allocation2 + $0x15e8] ss:$20 sps:$4 sm:$0xff]  }
 0x31f   :  { %6137 = vmatprep.subr.bf16.mxu1 %v13758_v38 }
 0x321   :  { %v12515_v45 = vpop.f32.mrf.mxu1  ;;  %6109 = vmatpush2.bf16.msra.mxu0 %v13759_v43  ;;  %v13801_v43 = vld [vmem:[#allocation2 + $0x15c4] ss:$20 sps:$4 sm:$0xff]  }
 0x322   :  { %6138 = vmatpush1.bf16.msra.mxu1 %v13756_v40  ;;  %6110 = vmatprep.subr.bf16.mxu0 %v13767_v21  ;;  %v13798_v40 = vld [vmem:[#allocation2 + $0x1050] ss:$20 sps:$4 sm:$0xff]   ;;  %v13799_v21 = vld [vmem:[#allocation2 + $0x15c0] ss:$20 sps:$4 sm:$0xff]  }
 0x323   :  { %v12516_v52 = vpop.f32.mrf.mxu1  ;;  %6139 = vmatprep.subr.bf16.mxu1 %v13764_v44  ;;  %v13802_v44 = vld [vmem:[#allocation2 + $0x1168] ss:$20 sps:$4 sm:$0xff]  }
 0x324   :  { %v12517_v54 = vadd.f32 %v12516_v52, %v12515_v45  ;;  %v13803_v45 = vld [vmem:[#allocation2 + $0x1028] ss:$20 sps:$4 sm:$0xff]   ;;  %v13804_v52 = vld [vmem:[#allocation2 + $0x1598] ss:$20 sps:$4 sm:$0xff]  }
 0x325   :  { %v12518_v58 = vpop.f32.mrf.mxu1  ;;  %6111 = vmatpush2.bf16.msra.mxu0 %v13765_v48  ;;  %v13807_v48 = vld [vmem:[#allocation2 + $0x1140] ss:$20 sps:$4 sm:$0xff]  }
 0x326   :  { %6140 = vmatpush1.bf16.msra.mxu1 %v13762_v46  ;;  %6112 = vmatprep.subr.bf16.mxu0 %v13773_v25  ;;  %v13806_v46 = vld [vmem:[#allocation2 + $0x159c] ss:$20 sps:$4 sm:$0xff]   ;;  %v13809_v25 = vld [vmem:[#allocation2 + $0x1438] ss:$20 sps:$4 sm:$0xff]  }
 0x327   :  { %v12519_v63 = vpop.f32.mrf.mxu1  ;;  %6141 = vmatprep.subr.bf16.mxu1 %v13770_v50 }
 0x328   :  { %v12537_v2 = vpop.f32.mrf.mxu0 }
 0x329   :  { %6113 = vmatpush2.bf16.msra.mxu0 %v13771_v60 }
 0x32a   :  { %6142 = vmatpush2.bf16.msra.mxu1 %v13768_v59  ;;  %v12538_v11 = vpop.f32.mrf.mxu0  ;;  %6114 = vmatprep.subr.bf16.mxu0 %v13779_v0  ;;  %v13812_v0 = vld [vmem:[#allocation2 + $0xfd8] ss:$20 sps:$4 sm:$0xff]  }
 0x32b   :  { %6143 = vmatprep.subr.bf16.mxu1 %v13776_v62  ;;  %v12539_v39 = vadd.f32 %v12538_v11, %v12537_v2  ;;  %v13810_v62 = vld [vmem:[#allocation2 + $0x12f8] ss:$20 sps:$4 sm:$0xff]   ;;  %v13813_v2 = vld [vmem:[#allocation2 + $0x1410] ss:$20 sps:$4 sm:$0xff]  }
 0x32c   :  { %v12540_v56 = vpop.f32.mrf.mxu0  ;;  %v13814_v11 = vld [vmem:[#allocation2 + $0x12d0] ss:$20 sps:$4 sm:$0xff]  }
 0x32d   :  { %v4225_v18 = vadd.f32 %v12539_v39, %v12517_v54  ;;  %6115 = vmatpush2.bf16.msra.mxu0 %v13777_v5  ;;  %v13811_v54 = vld [vmem:[#allocation2 + $0x1118] ss:$20 sps:$4 sm:$0xff]   ;;  %v13816_v39 = vld [vmem:[#allocation2 + $0xfb0] ss:$20 sps:$4 sm:$0xff]   ;;  %v13817_v56 = vld [vmem:[#allocation2 + $0x13e8] ss:$20 sps:$4 sm:$0xff]  }
 0x32e   :  { %6144 = vmatpush2.bf16.msra.mxu1 %v13774_v4  ;;  %6180 = vmatprep.subr.bf16.mxu0 %v13788_v14  ;;  %v12541_v42 = vpop.f32.mrf.mxu0  ;;  %v13815_v4 = vld [vmem:[#allocation2 + $0x10f0] ss:$20 sps:$4 sm:$0xff]  }
 0x32f   :  { %6145 = vmatprep.subr.bf16.mxu1 %v13782_v10  ;;  %v13823_v42 = vld [vmem:[#allocation2 + $0x10a0] ss:$20 sps:$4 sm:$0xff]  }
 0x330   :  { %6117 = vmatmul.mubr.bf16.vlgmr.msra.gmra.mxu0 %v14993_v7  ;;  %v4304_v27 = vpop.f32.mrf.mxu0 }
 0x331   :  { %6181 = vmatpush1.bf16.msra.mxu0 %v13786_v8  ;;  %6198 = vmatprep.mubr.bf16.mxu0 %v14886_v13  ;;  %v13820_v8 = vld [vmem:[#allocation2 + $0xf88] ss:$20 sps:$4 sm:$0xff]  }
 0x332   :  { %6146 = vmatpush2.bf16.msra.mxu1 %v13780_v19  ;;  %v12749_v30 = vpop.f32.mrf.mxu0  ;;  %12567 = vmatprep.subr.bf16.mxu0 %v13792_v26  ;;  %v13818_v19 = vld [vmem:[#allocation2 + $0x12a8] ss:$20 sps:$4 sm:$0xff]   ;;  %v13822_v26 = vld [vmem:[#allocation2 + $0x1280] ss:$20 sps:$4 sm:$0xff]  }
 0x333   :  { %6147 = vmatprep.subr.bf16.mxu1 %v13785_v22  ;;  %v13821_v22 = vld [vmem:[#allocation2 + $0x13c0] ss:$20 sps:$4 sm:$0xff]   ;;  %v13826_v30 = vld [vmem:[#allocation2 + $0x1258] ss:$20 sps:$4 sm:$0xff]  }
 0x334   :  { %v4307_v31 = vpop.f32.mrf.mxu0 }
 0x335   :  { %v13828_v31 = vld [vmem:[#allocation2 + $0x1578] ss:$20 sps:$4 sm:$0xff]  }
 0x336   :  { %6148 = vmatpush2.bf16.msra.mxu1 %v13783_v28  ;;  %v12750_v38 = vpop.f32.mrf.mxu0  ;;  %v13825_v28 = vld [vmem:[#allocation2 + $0x1398] ss:$20 sps:$4 sm:$0xff]  }
 0x337   :  { %6149 = vmatprep.subr.bf16.mxu1 %v13791_v29  ;;  %v13827_v29 = vld [vmem:[#allocation2 + $0x16b8] ss:$20 sps:$4 sm:$0xff]   ;;  %v13833_v38 = vld [vmem:[#allocation2 + $0x1348] ss:$20 sps:$4 sm:$0xff]  }
 0x338   :  { %11857 = vmatmul.mubr.msk.bf16.vlgmr.msra.gmra.mxu0 %vm1761_vm0, %v15133_v20  ;;  %v13808_v20 = vld [vmem:[#allocation2 + $0x1000] ss:$20 sps:$4 sm:$0xff]  }
 0x339   :  { %12568 = vmatpush3.bf16.msra.mxu0 %v13793_v15  ;;  %6239 = vmatprep.mubr.bf16.mxu0 %v14982_v47  ;;  %v13831_v15 = vld [vmem:[#allocation2 + $0x1690] ss:$20 sps:$4 sm:$0xff]  }
 0x33a   :  { %6150 = vmatpush2.bf16.msra.mxu1 %v13789_v34  ;;  %12569 = vmatprep.subr.bf16.mxu0 %v13797_v37  ;;  %v13829_v34 = vld [vmem:[#allocation2 + $0x1370] ss:$20 sps:$4 sm:$0xff]  }
 0x33b   :  { %6151 = vmatprep.subr.bf16.mxu1 %v13796_v35  ;;  %v13830_v35 = vld [vmem:[#allocation2 + $0x1230] ss:$20 sps:$4 sm:$0xff]  }
 0x33c   :  { %v13832_v37 = vld [vmem:[#allocation2 + $0x1550] ss:$20 sps:$4 sm:$0xff]  }
 0x33d   :  { %12570 = vmatpush3.bf16.msra.mxu0 %v13798_v40  ;;  %v13834_v40 = vld [vmem:[#allocation2 + $0x1208] ss:$20 sps:$4 sm:$0xff]  }
 0x33e   :  { %6152 = vmatpush2.bf16.msra.mxu1 %v13794_v17  ;;  %12571 = vmatprep.subr.bf16.mxu0 %v13802_v44  ;;  %v13835_v17 = vld [vmem:[#allocation2 + $0x1668] ss:$20 sps:$4 sm:$0xff]   ;;  %v13837_v44 = vld [vmem:[#allocation2 + $0x1320] ss:$20 sps:$4 sm:$0xff]  }
 0x33f   :  { %6153 = vmatprep.subr.bf16.mxu1 %v13801_v43  ;;  %v13836_v43 = vld [vmem:[#allocation2 + $0x1528] ss:$20 sps:$4 sm:$0xff]  }
 0x341   :  { %v12559_v50 = vpop.f32.mrf.mxu1  ;;  %12572 = vmatpush3.bf16.msra.mxu0 %v13803_v45  ;;  %v13838_v45 = vld [vmem:[#allocation2 + $0x11e0] ss:$20 sps:$4 sm:$0xff]  }
 0x342   :  { %6154 = vmatpush2.bf16.msra.mxu1 %v13799_v21  ;;  %12573 = vmatprep.subr.bf16.mxu0 %v13807_v48  ;;  %v13839_v21 = vld [vmem:[#allocation2 + $0x1640] ss:$20 sps:$4 sm:$0xff]   ;;  %v13842_v48 = vld [vmem:[#allocation2 + $0x1618] ss:$20 sps:$4 sm:$0xff]  }
 0x343   :  { %v12560_v58 = vpop.f32.mrf.mxu1  ;;  %6155 = vmatprep.subr.bf16.mxu1 %v13806_v46  ;;  %v13840_v46 = vld [vmem:[#allocation2 + $0x1500] ss:$20 sps:$4 sm:$0xff]  }
 0x344   :  { %v12561_v59 = vadd.f32 %v12560_v58, %v12559_v50  ;;  %v13841_v50 = vld [vmem:[#allocation2 + $0x16e0] ss:$20 sps:$4 sm:$0xff]   ;;  %v13849_v58 = vld [vmem:[#allocation2 + $0x15c8] ss:$20 sps:$4 sm:$0xff]  }
 0x345   :  { %v12562_v60 = vpop.f32.mrf.mxu1  ;;  %12574 = vmatpush3.bf16.msra.mxu0 %v13808_v20  ;;  %v13844_v20 = vld [vmem:[#allocation2 + $0x15f0] ss:$20 sps:$4 sm:$0xff]  }
 0x346   :  { %v4265_v63 = vadd.f32 %v12561_v59, %v4225_v18  ;;  %6156 = vmatpush2.bf16.msra.mxu1 %v13804_v52  ;;  %12575 = vmatprep.subr.bf16.mxu0 %v13811_v54  ;;  %v13819_v18 = vld [vmem:[#allocation2 + $0x10c8] ss:$20 sps:$4 sm:$0xff]   ;;  %v13843_v52 = vld [vmem:[#allocation2 + $0x14d8] ss:$20 sps:$4 sm:$0xff]   ;;  %v13845_v54 = vld [vmem:[#allocation2 + $0x14b0] ss:$20 sps:$4 sm:$0xff]  }
 0x347   :  { %v12563_v5 = vpop.f32.mrf.mxu1  ;;  %12589 = vmatprep.subr.bf16.mxu1 %v13809_v25  ;;  %v13848_v25 = vld [vmem:[#allocation2 + $0x1814] ss:$20 sps:$4 sm:$0xff]   ;;  %v13846_v59 = vld [vmem:[#allocation2 + $0x1810] ss:$20 sps:$4 sm:$0xff]  }
 0x348   :  { %v15161_v10 = vadd.f32 %v4304_v27, %v4265_v63  ;;  %v13824_v27 = vld [vmem:[#allocation2 + $0xf60] ss:$20 sps:$4 sm:$0xff]   ;;  %v13850_v60 = vld [vmem:[#allocation2 + $0x1488] ss:$20 sps:$4 sm:$0xff]  }
 0x349   :  { %6158 = vmatmul.mubr.bf16.vlgmr.msra.gmra.mxu1 %v15015_v16  ;;  %12576 = vmatpush3.bf16.msra.mxu0 %v13812_v0  ;;  %v13854_v63 = vld [vmem:[#allocation2 + $0x15a0] ss:$20 sps:$4 sm:$0xff]   ;;  %v15176_v0 = vld [vmem:[%s15391_s0 + $0x18] ss:$0 sps:$4 sm:$0xff]  }
 0x34a   :  { %v8428_v14 = vmax.f32 %v15091_v24, %v15161_v10  ;;  %12590 = vmatpush3.bf16.msra.mxu1 %v13810_v62  ;;  %12577 = vmatprep.subr.bf16.mxu0 %v13815_v4  ;;  %v13853_v62 = vld [vmem:[#allocation2 + $0x17ec] ss:$20 sps:$4 sm:$0xff]  }
 0x34b   :  { %12591 = vmatprep.subr.bf16.mxu1 %v13813_v2  ;;  %6279 = vmatprep.mubr.bf16.mxu1 %v14987_v51  ;;  %v13851_v2 = vld [vmem:[#allocation2 + $0x17e8] ss:$20 sps:$4 sm:$0xff]   ;;  %v13855_v5 = vld [vmem:[#allocation2 + $0x1460] ss:$20 sps:$4 sm:$0xff]  }
 0x34c   :  { %v14349_v24 = vld [vmem:[#allocation6 + $0x3a0] ss:$8 sps:$4 sm:$0xff]   ;;  %v14360_v10 = vld [vmem:[#allocation6 + $0x474] ss:$8 sps:$4 sm:$0xff]  }
 0x34d   :  { %12578 = vmatpush3.bf16.msra.mxu0 %v13816_v39  ;;  %v13861_v39 = vld [vmem:[#allocation2 + $0x1a94] ss:$20 sps:$4 sm:$0xff]  }
 0x34e   :  { %12592 = vmatpush3.bf16.msra.mxu1 %v13814_v11  ;;  %12579 = vmatprep.subr.bf16.mxu0 %v13819_v18  ;;  %v13858_v11 = vld [vmem:[#allocation2 + $0x17c4] ss:$20 sps:$4 sm:$0xff]   ;;  %v13856_v18 = vld [vmem:[#allocation2 + $0x17c0] ss:$20 sps:$4 sm:$0xff]  }
 0x34f   :  { %12593 = vmatprep.subr.bf16.mxu1 %v13817_v56 }
 0x351   :  { %12580 = vmatpush3.bf16.msra.mxu0 %v13820_v8  ;;  %v13859_v8 = vld [vmem:[#allocation2 + $0x1a90] ss:$20 sps:$4 sm:$0xff]  }
 0x352   :  { %12594 = vmatpush3.bf16.msra.mxu1 %v13818_v19  ;;  %12581 = vmatprep.subr.bf16.mxu0 %v13823_v42  ;;  %v13867_v42 = vld [vmem:[#allocation2 + $0x1a6c] ss:$20 sps:$4 sm:$0xff]  }
 0x353   :  { %12595 = vmatprep.subr.bf16.mxu1 %v13821_v22  ;;  %v13864_v22 = vld [vmem:[#allocation2 + $0x179c] ss:$20 sps:$4 sm:$0xff]  }
 0x355   :  { %12582 = vmatpush3.bf16.msra.mxu0 %v13824_v27  ;;  %v13862_v27 = vld [vmem:[#allocation2 + $0x1798] ss:$20 sps:$4 sm:$0xff]  }
 0x356   :  { %12596 = vmatpush3.bf16.msra.mxu1 %v13822_v26  ;;  %12611 = vmatprep.subr.bf16.mxu0 %v13827_v29  ;;  %v13870_v29 = vld [vmem:[#allocation2 + $0x1774] ss:$20 sps:$4 sm:$0xff]  }
 0x357   :  { %12597 = vmatprep.subr.bf16.mxu1 %v13825_v28  ;;  %v13865_v28 = vld [vmem:[#allocation2 + $0x1a68] ss:$20 sps:$4 sm:$0xff]  }
 0x358   :  { %6240 = vmatmul.mubr.bf16.vlgmr.msra.gmra.mxu0 %v14991_v6 }
 0x359   :  { %12612 = vmatpush3.bf16.msra.mxu0 %v13828_v31  ;;  %6319 = vmatprep.mubr.bf16.mxu0 %v15010_v33  ;;  %v13868_v31 = vld [vmem:[#allocation2 + $0x1770] ss:$20 sps:$4 sm:$0xff]  }
 0x35a   :  { %12598 = vmatpush3.bf16.msra.mxu1 %v13826_v30  ;;  %12613 = vmatprep.subr.bf16.mxu0 %v13831_v15  ;;  %v13873_v30 = vld [vmem:[#allocation2 + $0x1a44] ss:$20 sps:$4 sm:$0xff]   ;;  %v13876_v15 = vld [vmem:[#allocation2 + $0x174c] ss:$20 sps:$4 sm:$0xff]  }
 0x35b   :  { %12599 = vmatprep.subr.bf16.mxu1 %v13829_v34  ;;  %v13871_v34 = vld [vmem:[#allocation2 + $0x1a40] ss:$20 sps:$4 sm:$0xff]  }
 0x35d   :  { %12614 = vmatpush3.bf16.msra.mxu0 %v13832_v37 }
 0x35e   :  { %12600 = vmatpush3.bf16.msra.mxu1 %v13830_v35  ;;  %12615 = vmatprep.subr.bf16.mxu0 %v13835_v17  ;;  %v13879_v35 = vld [vmem:[#allocation2 + $0x1a1c] ss:$20 sps:$4 sm:$0xff]  }
 0x35f   :  { %12601 = vmatprep.subr.bf16.mxu1 %v13833_v38  ;;  %v13874_v38 = vld [vmem:[#allocation2 + $0x1748] ss:$20 sps:$4 sm:$0xff]  }
 0x361   :  { %12616 = vmatpush3.bf16.msra.mxu0 %v13836_v43  ;;  %v13882_v43 = vld [vmem:[#allocation2 + $0x1724] ss:$20 sps:$4 sm:$0xff]  }
 0x362   :  { %12602 = vmatpush3.bf16.msra.mxu1 %v13834_v40  ;;  %12617 = vmatprep.subr.bf16.mxu0 %v13839_v21  ;;  %v13877_v40 = vld [vmem:[#allocation2 + $0x1a18] ss:$20 sps:$4 sm:$0xff]  }
 0x363   :  { %12603 = vmatprep.subr.bf16.mxu1 %v13837_v44  ;;  %v13885_v44 = vld [vmem:[#allocation2 + $0x19f4] ss:$20 sps:$4 sm:$0xff]  }
 0x365   :  { %12618 = vmatpush3.bf16.msra.mxu0 %v13840_v46 }
 0x366   :  { %12604 = vmatpush3.bf16.msra.mxu1 %v13838_v45  ;;  %12619 = vmatprep.subr.bf16.mxu0 %v13842_v48  ;;  %v13880_v48 = vld [vmem:[#allocation2 + $0x1720] ss:$20 sps:$4 sm:$0xff]  }
 0x367   :  { %12751 = vmatprep.subr.bf16.mxu1 %v14887_v12 }
 0x369   :  { %6280 = vmatmul.mubr.bf16.vlgmr.msra.gmra.mxu1 %v14993_v7  ;;  %12620 = vmatpush3.bf16.msra.mxu0 %v13843_v52  ;;  %v13888_v52 = vld [vmem:[#allocation2 + $0x16fc] ss:$20 sps:$4 sm:$0xff]  }
 0x36a   :  { %12752 = vmatpush3.bf16.msra.mxu1 %v13841_v50  ;;  %12621 = vmatprep.subr.bf16.mxu0 %v13844_v20  ;;  %v13883_v50 = vld [vmem:[#allocation2 + $0x19f0] ss:$20 sps:$4 sm:$0xff]   ;;  %v13891_v20 = vld [vmem:[#allocation2 + $0x19cc] ss:$20 sps:$4 sm:$0xff]  }
 0x36b   :  { %12753 = vmatprep.mubr.msk.bf16.mxu1 %vm14888_vm1, %v14887_v12  ;;  %7936 = vmatprep.subr.bf16.mxu1 %v13848_v25 }
 0x36d   :  { %12622 = vmatpush3.bf16.msra.mxu0 %v13845_v54  ;;  %v13886_v54 = vld [vmem:[#allocation2 + $0x16f8] ss:$20 sps:$4 sm:$0xff]  }
 0x36e   :  { %12623 = vmatprep.subr.bf16.mxu0 %v13849_v58 }
 0x370   :  { %v5913_v4 = vpop.f32.mrf.mxu0 }
 0x371   :  { %12754 = vmatmul.mubr.msk.bf16.vlgmr.msra.gmra.mxu1 %vm1761_vm0, %v15176_v0  ;;  %12624 = vmatpush3.bf16.msra.mxu0 %v13850_v60  ;;  %v13894_v60 = vld [vmem:[#allocation2 + $0x1954] ss:$20 sps:$4 sm:$0xff]  }
 0x372   :  { %7937 = vmatpush1.bf16.msra.mxu1 %v13846_v59  ;;  %12625 = vmatprep.subr.bf16.mxu0 %v13854_v63  ;;  %v5915_v56 = vpop.f32.mrf.mxu0  ;;  %v13889_v59 = vld [vmem:[#allocation2 + $0x19c8] ss:$20 sps:$4 sm:$0xff]   ;;  %v13897_v63 = vld [vmem:[#allocation2 + $0x19a4] ss:$20 sps:$4 sm:$0xff]  }
 0x373   :  { %7938 = vmatprep.subr.bf16.mxu1 %v13853_v62  ;;  %7968 = vmatprep.mubr.bf16.mxu1 %v14982_v47 }
 0x374   :  { %v5917_v19 = vpop.f32.mrf.mxu0 }
 0x375   :  { %12626 = vmatpush3.bf16.msra.mxu0 %v13855_v5  ;;  %v13895_v5 = vld [vmem:[#allocation2 + $0x19a0] ss:$20 sps:$4 sm:$0xff]   ;;  %v13901_v19 = vld [vmem:[#allocation2 + $0x1978] ss:$20 sps:$4 sm:$0xff]  }
 0x376   :  { %7939 = vmatpush1.bf16.msra.mxu1 %v13851_v2  ;;  %7977 = vmatprep.subr.bf16.mxu0 %v13861_v39  ;;  %v5918_v26 = vpop.f32.mrf.mxu0  ;;  %v13900_v39 = vld [vmem:[#allocation2 + $0x192c] ss:$20 sps:$4 sm:$0xff]  }
 0x377   :  { %7940 = vmatprep.subr.bf16.mxu1 %v13858_v11  ;;  %v13907_v26 = vld [vmem:[#allocation2 + $0x1bd0] ss:$20 sps:$4 sm:$0xff]  }
 0x378   :  { %6320 = vmatmul.mubr.bf16.vlgmr.msra.gmra.mxu0 %v15015_v16 }
 0x379   :  { %7978 = vmatpush1.bf16.msra.mxu0 %v13859_v8  ;;  %8009 = vmatprep.mubr.bf16.mxu0 %v14987_v51  ;;  %v13906_v8 = vld [vmem:[#allocation2 + $0x1904] ss:$20 sps:$4 sm:$0xff]  }
 0x37a   :  { %7941 = vmatpush1.bf16.msra.mxu1 %v13856_v18  ;;  %7979 = vmatprep.subr.bf16.mxu0 %v13867_v42  ;;  %v13898_v18 = vld [vmem:[#allocation2 + $0x1928] ss:$20 sps:$4 sm:$0xff]   ;;  %v13904_v42 = vld [vmem:[#allocation2 + $0x1900] ss:$20 sps:$4 sm:$0xff]  }
 0x37b   :  { %7942 = vmatprep.subr.bf16.mxu1 %v13864_v22  ;;  %v13909_v22 = vld [vmem:[#allocation2 + $0x1bd4] ss:$20 sps:$4 sm:$0xff]  }
 0x37d   :  { %7980 = vmatpush1.bf16.msra.mxu0 %v13865_v28  ;;  %v13915_v28 = vld [vmem:[#allocation2 + $0x1bac] ss:$20 sps:$4 sm:$0xff]  }
 0x37e   :  { %7943 = vmatpush1.bf16.msra.mxu1 %v13862_v27  ;;  %7981 = vmatprep.subr.bf16.mxu0 %v13873_v30  ;;  %v13912_v27 = vld [vmem:[#allocation2 + $0x18dc] ss:$20 sps:$4 sm:$0xff]  }
 0x37f   :  { %7944 = vmatprep.subr.bf16.mxu1 %v13870_v29  ;;  %v13910_v29 = vld [vmem:[#allocation2 + $0x18d8] ss:$20 sps:$4 sm:$0xff]   ;;  %v13913_v30 = vld [vmem:[#allocation2 + $0x1ba8] ss:$20 sps:$4 sm:$0xff]  }
 0x381   :  { %v5954_v37 = vpop.f32.mrf.mxu1  ;;  %7982 = vmatpush1.bf16.msra.mxu0 %v13871_v34  ;;  %v13921_v34 = vld [vmem:[#allocation2 + $0x1b84] ss:$20 sps:$4 sm:$0xff]  }
 0x382   :  { %7945 = vmatpush1.bf16.msra.mxu1 %v13868_v31  ;;  %v15183_v17 = vadd.f32 %v5954_v37, %v5913_v4  ;;  %7983 = vmatprep.subr.bf16.mxu0 %v13879_v35  ;;  %v13892_v4 = vld [vmem:[#allocation2 + $0x1950] ss:$20 sps:$4 sm:$0xff]   ;;  %v13918_v31 = vld [vmem:[#allocation2 + $0x18b4] ss:$20 sps:$4 sm:$0xff]   ;;  %v13924_v37 = vld [vmem:[#allocation2 + $0x188c] ss:$20 sps:$4 sm:$0xff]  }
 0x383   :  { %v5956_v21 = vpop.f32.mrf.mxu1  ;;  %7946 = vmatprep.subr.bf16.mxu1 %v13876_v15  ;;  %v13916_v15 = vld [vmem:[#allocation2 + $0x18b0] ss:$20 sps:$4 sm:$0xff]   ;;  %v13919_v35 = vld [vmem:[#allocation2 + $0x1b80] ss:$20 sps:$4 sm:$0xff]  }
 0x384   :  { %v15185_v45 = vadd.f32 %v5956_v21, %v5915_v56  ;;  %v13903_v56 = vld [vmem:[#allocation2 + $0x197c] ss:$20 sps:$4 sm:$0xff]   ;;  %v13933_v21 = vld [vmem:[#allocation2 + $0x1b34] ss:$20 sps:$4 sm:$0xff]  }
 0x385   :  { %v5958_v46 = vpop.f32.mrf.mxu1  ;;  %7984 = vmatpush1.bf16.msra.mxu0 %v13877_v40  ;;  %v13922_v40 = vld [vmem:[#allocation2 + $0x1888] ss:$20 sps:$4 sm:$0xff]  }
 0x386   :  { %7947 = vmatpush1.bf16.msra.mxu1 %v13874_v38  ;;  %7985 = vmatprep.subr.bf16.mxu0 %v13885_v44  ;;  %v13927_v38 = vld [vmem:[#allocation2 + $0x1b5c] ss:$20 sps:$4 sm:$0xff]   ;;  %v13930_v44 = vld [vmem:[#allocation2 + $0x1864] ss:$20 sps:$4 sm:$0xff]   ;;  %v13928_v46 = vld [vmem:[#allocation2 + $0x1860] ss:$20 sps:$4 sm:$0xff]  }
 0x387   :  { %v5959_v25 = vpop.f32.mrf.mxu1  ;;  %7948 = vmatprep.subr.bf16.mxu1 %v13882_v43  ;;  %v13925_v43 = vld [vmem:[#allocation2 + $0x1b58] ss:$20 sps:$4 sm:$0xff]  }
 0x388   :  { %v13937_v25 = vld [vmem:[#allocation2 + $0x1b08] ss:$20 sps:$4 sm:$0xff]  }
 0x389   :  { %v15187_v58 = vpop.f32.mrf.mxu1  ;;  %7986 = vmatpush1.bf16.msra.mxu0 %v13883_v50  ;;  %v13936_v50 = vld [vmem:[#allocation2 + $0x183c] ss:$20 sps:$4 sm:$0xff]  }
 0x38a   :  { %7949 = vmatpush1.bf16.msra.mxu1 %v13880_v48  ;;  %7987 = vmatprep.subr.bf16.mxu0 %v13891_v20  ;;  %v13931_v48 = vld [vmem:[#allocation2 + $0x1b30] ss:$20 sps:$4 sm:$0xff]   ;;  %v13934_v20 = vld [vmem:[#allocation2 + $0x1838] ss:$20 sps:$4 sm:$0xff]  }
 0x38b   :  { %v15189_v62 = vpop.f32.mrf.mxu1  ;;  %7950 = vmatprep.subr.bf16.mxu1 %v13888_v52  ;;  %v13939_v52 = vld [vmem:[#allocation2 + $0x1b0c] ss:$20 sps:$4 sm:$0xff]  }
 0x38d   :  { %v6040_v2 = vpop.f32.mrf.mxu1  ;;  %7988 = vmatpush1.bf16.msra.mxu0 %v13889_v59  ;;  %v13945_v59 = vld [vmem:[#allocation2 + $0x1ae4] ss:$20 sps:$4 sm:$0xff]  }
 0x38e   :  { %7951 = vmatpush1.bf16.msra.mxu1 %v13886_v54  ;;  %7989 = vmatprep.subr.bf16.mxu0 %v13897_v63  ;;  %v13942_v54 = vld [vmem:[#allocation2 + $0x1d14] ss:$20 sps:$4 sm:$0xff]   ;;  %v13948_v2 = vld [vmem:[#allocation2 + $0x1cec] ss:$20 sps:$4 sm:$0xff]  }
 0x38f   :  { %v6041_v11 = vpop.f32.mrf.mxu1  ;;  %7952 = vmatprep.subr.bf16.mxu1 %v13894_v60  ;;  %v13940_v60 = vld [vmem:[#allocation2 + $0x1d10] ss:$20 sps:$4 sm:$0xff]   ;;  %v13943_v63 = vld [vmem:[#allocation2 + $0x1ae0] ss:$20 sps:$4 sm:$0xff]  }
 0x391   :  { %7990 = vmatpush1.bf16.msra.mxu0 %v13895_v5 }
 0x392   :  { %7953 = vmatpush2.bf16.msra.mxu1 %v13892_v4  ;;  %7991 = vmatprep.subr.bf16.mxu0 %v13903_v56  ;;  %v13951_v4 = vld [vmem:[#allocation2 + $0x1abc] ss:$20 sps:$4 sm:$0xff]   ;;  %v13949_v56 = vld [vmem:[#allocation2 + $0x1ab8] ss:$20 sps:$4 sm:$0xff]  }
 0x393   :  { %7954 = vmatprep.subr.bf16.mxu1 %v13900_v39  ;;  %v13946_v39 = vld [vmem:[#allocation2 + $0x1ce8] ss:$20 sps:$4 sm:$0xff]  }
 0x395   :  { %7992 = vmatpush1.bf16.msra.mxu0 %v13901_v19  ;;  %v13954_v19 = vld [vmem:[#allocation2 + $0x1cc4] ss:$20 sps:$4 sm:$0xff]  }
 0x396   :  { %7955 = vmatpush2.bf16.msra.mxu1 %v13898_v18  ;;  %7993 = vmatprep.subr.bf16.mxu0 %v13909_v22 }
 0x397   :  { %7956 = vmatprep.subr.bf16.mxu1 %v13906_v8  ;;  %v13960_v8 = vld [vmem:[#allocation2 + $0x1e7c] ss:$20 sps:$4 sm:$0xff]  }
 0x399   :  { %7994 = vmatpush2.bf16.msra.mxu0 %v13907_v26 }
 0x39a   :  { %7957 = vmatpush2.bf16.msra.mxu1 %v13904_v42  ;;  %7995 = vmatprep.subr.bf16.mxu0 %v13915_v28  ;;  %v13958_v28 = vld [vmem:[#allocation2 + $0x1e78] ss:$20 sps:$4 sm:$0xff]  }
 0x39b   :  { %7958 = vmatprep.subr.bf16.mxu1 %v13912_v27 }
 0x39d   :  { %7996 = vmatpush2.bf16.msra.mxu0 %v13913_v30 }
 0x39e   :  { %7959 = vmatpush2.bf16.msra.mxu1 %v13910_v29  ;;  %7997 = vmatprep.subr.bf16.mxu0 %v13921_v34  ;;  %v13957_v29 = vld [vmem:[#allocation2 + $0x1c9c] ss:$20 sps:$4 sm:$0xff]   ;;  %v13964_v34 = vld [vmem:[#allocation2 + $0x1818] ss:$20 sps:$4 sm:$0xff]  }
 0x39f   :  { %7960 = vmatprep.subr.bf16.mxu1 %v13918_v31  ;;  %v13966_v31 = vld [vmem:[#allocation2 + $0x181c] ss:$20 sps:$4 sm:$0xff]  }
 0x3a1   :  { %7998 = vmatpush2.bf16.msra.mxu0 %v13919_v35  ;;  %v13972_v35 = vld [vmem:[#allocation2 + $0x17f4] ss:$20 sps:$4 sm:$0xff]  }
 0x3a2   :  { %7961 = vmatpush2.bf16.msra.mxu1 %v13916_v15  ;;  %7999 = vmatprep.subr.bf16.mxu0 %v13927_v38  ;;  %v13969_v15 = vld [vmem:[#allocation2 + $0x1c4c] ss:$20 sps:$4 sm:$0xff]   ;;  %v13970_v38 = vld [vmem:[#allocation2 + $0x17f0] ss:$20 sps:$4 sm:$0xff]  }
 0x3a3   :  { %7962 = vmatprep.subr.bf16.mxu1 %v13924_v37  ;;  %v13967_v37 = vld [vmem:[#allocation2 + $0x1c48] ss:$20 sps:$4 sm:$0xff]  }
 0x3a5   :  { %8000 = vmatpush2.bf16.msra.mxu0 %v13925_v43  ;;  %v13978_v43 = vld [vmem:[#allocation2 + $0x17cc] ss:$20 sps:$4 sm:$0xff]  }
 0x3a6   :  { %7963 = vmatpush2.bf16.msra.mxu1 %v13922_v40  ;;  %8001 = vmatprep.subr.bf16.mxu0 %v13933_v21  ;;  %v13975_v40 = vld [vmem:[#allocation2 + $0x1c24] ss:$20 sps:$4 sm:$0xff]   ;;  %v13976_v21 = vld [vmem:[#allocation2 + $0x17c8] ss:$20 sps:$4 sm:$0xff]  }
 0x3a7   :  { %7964 = vmatprep.subr.bf16.mxu1 %v13930_v44  ;;  %v13973_v44 = vld [vmem:[#allocation2 + $0x1c20] ss:$20 sps:$4 sm:$0xff]  }
 0x3a9   :  { %8002 = vmatpush2.bf16.msra.mxu0 %v13931_v48  ;;  %v13984_v48 = vld [vmem:[#allocation2 + $0x17a4] ss:$20 sps:$4 sm:$0xff]  }
 0x3aa   :  { %7965 = vmatpush2.bf16.msra.mxu1 %v13928_v46  ;;  %8003 = vmatprep.subr.bf16.mxu0 %v13939_v52  ;;  %v13981_v46 = vld [vmem:[#allocation2 + $0x1bfc] ss:$20 sps:$4 sm:$0xff]   ;;  %v13982_v52 = vld [vmem:[#allocation2 + $0x17a0] ss:$20 sps:$4 sm:$0xff]  }
 0x3ab   :  { %7966 = vmatprep.subr.bf16.mxu1 %v13936_v50 }
 0x3ad   :  { %8004 = vmatpush2.bf16.msra.mxu0 %v13937_v25  ;;  %v13987_v25 = vld [vmem:[#allocation2 + $0x1e54] ss:$20 sps:$4 sm:$0xff]  }
 0x3ae   :  { %7967 = vmatpush2.bf16.msra.mxu1 %v13934_v20  ;;  %8005 = vmatprep.subr.bf16.mxu0 %v13945_v59 }
 0x3af   :  { %8018 = vmatprep.subr.bf16.mxu1 %v13942_v54  ;;  %v13990_v54 = vld [vmem:[#allocation2 + $0x177c] ss:$20 sps:$4 sm:$0xff]  }
 0x3b0   :  { %v5995_v5 = vpop.f32.mrf.mxu0 }
 0x3b1   :  { %7969 = vmatmul.mubr.bf16.vlgmr.msra.gmra.mxu1 %v14991_v6  ;;  %v5996_v11 = vadd.f32 %v5995_v5, %v15183_v17  ;;  %8006 = vmatpush2.bf16.msra.mxu0 %v13943_v63  ;;  %v13952_v17 = vld [vmem:[#allocation2 + $0x1cc0] ss:$20 sps:$4 sm:$0xff]   ;;  %v13988_v63 = vld [vmem:[#allocation2 + $0x1778] ss:$20 sps:$4 sm:$0xff]  }
 0x3b2   :  { %8019 = vmatpush1.bf16.msra.mxu1 %v13940_v60  ;;  %v5997_v18 = vpop.f32.mrf.mxu0  ;;  %8007 = vmatprep.subr.bf16.mxu0 %v13951_v4  ;;  %v13985_v60 = vld [vmem:[#allocation2 + $0x1e50] ss:$20 sps:$4 sm:$0xff]   ;;  %v13993_v4 = vld [vmem:[#allocation2 + $0x1e2c] ss:$20 sps:$4 sm:$0xff]   ;;  %v13996_v5 = vld [vmem:[#allocation2 + $0x1754] ss:$20 sps:$4 sm:$0xff]  }
 0x3b3   :  { %8020 = vmatprep.subr.bf16.mxu1 %v13948_v2  ;;  %v15194_v22 = vadd.f32 %v15187_v58, %v5996_v11  ;;  %v5998_v42 = vadd.f32 %v5997_v18, %v15185_v45  ;;  %8050 = vmatprep.mubr.bf16.mxu1 %v15010_v33  ;;  %v13955_v58 = vld [vmem:[#allocation2 + $0x1c98] ss:$20 sps:$4 sm:$0xff]   ;;  %v13963_v45 = vld [vmem:[#allocation2 + $0x1c74] ss:$20 sps:$4 sm:$0xff]  }
 0x3b4   :  { %v5999_v26 = vpop.f32.mrf.mxu0  ;;  %v13991_v11 = vld [vmem:[#allocation2 + $0x1e28] ss:$20 sps:$4 sm:$0xff]   ;;  %v14002_v18 = vld [vmem:[#allocation2 + $0x172c] ss:$20 sps:$4 sm:$0xff]  }
 0x3b5   :  { %v15199_v27 = vadd.f32 %v15189_v62, %v5998_v42  ;;  %8008 = vmatpush2.bf16.msra.mxu0 %v13949_v56  ;;  %v13961_v62 = vld [vmem:[#allocation2 + $0x1c70] ss:$20 sps:$4 sm:$0xff]  }
 0x3b6   :  { %8021 = vmatpush1.bf16.msra.mxu1 %v13946_v39  ;;  %8073 = vmatprep.subr.bf16.mxu0 %v13960_v8  ;;  %v6000_v30 = vpop.f32.mrf.mxu0  ;;  %v13994_v39 = vld [vmem:[#allocation2 + $0x1750] ss:$20 sps:$4 sm:$0xff]   ;;  %v14000_v8 = vld [vmem:[#allocation2 + $0x1728] ss:$20 sps:$4 sm:$0xff]  }
 0x3b7   :  { %8022 = vmatprep.subr.bf16.mxu1 %v13954_v19  ;;  %v13999_v56 = vld [vmem:[#allocation2 + $0x1e04] ss:$20 sps:$4 sm:$0xff]   ;;  %v13997_v19 = vld [vmem:[#allocation2 + $0x1e00] ss:$20 sps:$4 sm:$0xff]   ;;  %v14005_v42 = vld [vmem:[#allocation2 + $0x1ddc] ss:$20 sps:$4 sm:$0xff]  }
 0x3b8   :  { %8010 = vmatmul.mubr.bf16.vlgmr.msra.gmra.mxu0 %v14993_v7  ;;  %v14008_v26 = vld [vmem:[#allocation2 + $0x1704] ss:$20 sps:$4 sm:$0xff]   ;;  %v14014_v30 = vld [vmem:[#allocation2 + $0x195c] ss:$20 sps:$4 sm:$0xff]  }
 0x3b9   :  { %8074 = vmatpush1.bf16.msra.mxu0 %v13958_v28  ;;  %8091 = vmatprep.mubr.bf16.mxu0 %v14886_v13  ;;  %v14006_v28 = vld [vmem:[#allocation2 + $0x1700] ss:$20 sps:$4 sm:$0xff]  }
 0x3ba   :  { %8023 = vmatpush1.bf16.msra.mxu1 %v13952_v17  ;;  %8100 = vmatprep.subr.bf16.mxu0 %v13966_v31  ;;  %v14003_v17 = vld [vmem:[#allocation2 + $0x1dd8] ss:$20 sps:$4 sm:$0xff]   ;;  %v14009_v31 = vld [vmem:[#allocation2 + $0x1db0] ss:$20 sps:$4 sm:$0xff]  }
 0x3bb   :  { %8024 = vmatprep.subr.bf16.mxu1 %v13957_v29  ;;  %v14011_v29 = vld [vmem:[#allocation2 + $0x1db4] ss:$20 sps:$4 sm:$0xff]  }
 0x3be   :  { %8025 = vmatpush1.bf16.msra.mxu1 %v13955_v58  ;;  %v14012_v58 = vld [vmem:[#allocation2 + $0x1958] ss:$20 sps:$4 sm:$0xff]  }
 0x3bf   :  { %8026 = vmatprep.subr.bf16.mxu1 %v13963_v45  ;;  %v14017_v45 = vld [vmem:[#allocation2 + $0x1d8c] ss:$20 sps:$4 sm:$0xff]  }
 0x3c0   :  { %12104 = vmatmul.mubr.msk.bf16.vlgmr.msra.gmra.mxu0 %vm1761_vm0, %v15176_v0  ;;  %v13979_v0 = vld [vmem:[#allocation2 + $0x1bf8] ss:$20 sps:$4 sm:$0xff]  }
 0x3c1   :  { %8101 = vmatpush1.bf16.msra.mxu0 %v13964_v34  ;;  %8132 = vmatprep.mubr.bf16.mxu0 %v14982_v47  ;;  %v14015_v34 = vld [vmem:[#allocation2 + $0x1d88] ss:$20 sps:$4 sm:$0xff]  }
 0x3c2   :  { %8027 = vmatpush1.bf16.msra.mxu1 %v13961_v62  ;;  %8102 = vmatprep.subr.bf16.mxu0 %v13972_v35  ;;  %v14020_v62 = vld [vmem:[#allocation2 + $0x1934] ss:$20 sps:$4 sm:$0xff]   ;;  %v14023_v35 = vld [vmem:[#allocation2 + $0x1d64] ss:$20 sps:$4 sm:$0xff]  }
 0x3c3   :  { %8028 = vmatprep.subr.bf16.mxu1 %v13969_v15  ;;  %v14018_v15 = vld [vmem:[#allocation2 + $0x1930] ss:$20 sps:$4 sm:$0xff]  }
 0x3c5   :  { %8103 = vmatpush1.bf16.msra.mxu0 %v13970_v38  ;;  %v14021_v38 = vld [vmem:[#allocation2 + $0x1d60] ss:$20 sps:$4 sm:$0xff]  }
 0x3c6   :  { %8029 = vmatpush1.bf16.msra.mxu1 %v13967_v37  ;;  %8104 = vmatprep.subr.bf16.mxu0 %v13978_v43  ;;  %v14026_v37 = vld [vmem:[#allocation2 + $0x190c] ss:$20 sps:$4 sm:$0xff]   ;;  %v14029_v43 = vld [vmem:[#allocation2 + $0x1d3c] ss:$20 sps:$4 sm:$0xff]  }
 0x3c7   :  { %8030 = vmatprep.subr.bf16.mxu1 %v13975_v40  ;;  %v14024_v40 = vld [vmem:[#allocation2 + $0x1908] ss:$20 sps:$4 sm:$0xff]  }
 0x3c9   :  { %v15206_v50 = vpop.f32.mrf.mxu1  ;;  %8105 = vmatpush1.bf16.msra.mxu0 %v13976_v21  ;;  %v14027_v21 = vld [vmem:[#allocation2 + $0x1d38] ss:$20 sps:$4 sm:$0xff]  }
 0x3ca   :  { %8031 = vmatpush1.bf16.msra.mxu1 %v13973_v44  ;;  %8106 = vmatprep.subr.bf16.mxu0 %v13984_v48  ;;  %v14032_v44 = vld [vmem:[#allocation2 + $0x18e4] ss:$20 sps:$4 sm:$0xff]   ;;  %v14035_v48 = vld [vmem:[#allocation2 + $0x1a9c] ss:$20 sps:$4 sm:$0xff]  }
 0x3cb   :  { %v15208_v20 = vpop.f32.mrf.mxu1  ;;  %8032 = vmatprep.subr.bf16.mxu1 %v13981_v46  ;;  %v14030_v46 = vld [vmem:[#allocation2 + $0x18e0] ss:$20 sps:$4 sm:$0xff]  }
 0x3cd   :  { %v6081_v59 = vpop.f32.mrf.mxu1  ;;  %8107 = vmatpush1.bf16.msra.mxu0 %v13982_v52  ;;  %v14033_v52 = vld [vmem:[#allocation2 + $0x1a98] ss:$20 sps:$4 sm:$0xff]  }
 0x3ce   :  { %8033 = vmatpush1.bf16.msra.mxu1 %v13979_v0  ;;  %8108 = vmatprep.subr.bf16.mxu0 %v13990_v54  ;;  %v14038_v0 = vld [vmem:[#allocation2 + $0x18bc] ss:$20 sps:$4 sm:$0xff]   ;;  %v14041_v54 = vld [vmem:[#allocation2 + $0x1a74] ss:$20 sps:$4 sm:$0xff]  }
 0x3cf   :  { %v6082_v2 = vpop.f32.mrf.mxu1  ;;  %8034 = vmatprep.subr.bf16.mxu1 %v13987_v25  ;;  %v14036_v25 = vld [vmem:[#allocation2 + $0x18b8] ss:$20 sps:$4 sm:$0xff]   ;;  %v14044_v59 = vld [vmem:[#allocation2 + $0x1894] ss:$20 sps:$4 sm:$0xff]  }
 0x3d0   :  { %v14039_v2 = vld [vmem:[#allocation2 + $0x1a70] ss:$20 sps:$4 sm:$0xff]  }
 0x3d1   :  { %8109 = vmatpush1.bf16.msra.mxu0 %v13988_v63 }
 0x3d2   :  { %8035 = vmatpush2.bf16.msra.mxu1 %v13985_v60  ;;  %8110 = vmatprep.subr.bf16.mxu0 %v13996_v5 }
 0x3d3   :  { %8036 = vmatprep.subr.bf16.mxu1 %v13993_v4  ;;  %v14042_v4 = vld [vmem:[#allocation2 + $0x1890] ss:$20 sps:$4 sm:$0xff]  }
 0x3d5   :  { %8111 = vmatpush1.bf16.msra.mxu0 %v13994_v39  ;;  %v14050_v39 = vld [vmem:[#allocation2 + $0x186c] ss:$20 sps:$4 sm:$0xff]  }
 0x3d6   :  { %8037 = vmatpush2.bf16.msra.mxu1 %v13991_v11  ;;  %8112 = vmatprep.subr.bf16.mxu0 %v14002_v18  ;;  %v14047_v11 = vld [vmem:[#allocation2 + $0x1a4c] ss:$20 sps:$4 sm:$0xff]  }
 0x3d7   :  { %8038 = vmatprep.subr.bf16.mxu1 %v13999_v56 }
 0x3d9   :  { %8113 = vmatpush1.bf16.msra.mxu0 %v14000_v8  ;;  %v14048_v8 = vld [vmem:[#allocation2 + $0x1868] ss:$20 sps:$4 sm:$0xff]  }
 0x3da   :  { %8039 = vmatpush2.bf16.msra.mxu1 %v13997_v19  ;;  %8114 = vmatprep.subr.bf16.mxu0 %v14008_v26  ;;  %v14045_v19 = vld [vmem:[#allocation2 + $0x1a48] ss:$20 sps:$4 sm:$0xff]  }
 0x3db   :  { %8040 = vmatprep.subr.bf16.mxu1 %v14005_v42  ;;  %v14053_v42 = vld [vmem:[#allocation2 + $0x1a24] ss:$20 sps:$4 sm:$0xff]  }
 0x3dd   :  { %8115 = vmatpush1.bf16.msra.mxu0 %v14006_v28  ;;  %v14051_v28 = vld [vmem:[#allocation2 + $0x1a20] ss:$20 sps:$4 sm:$0xff]  }
 0x3de   :  { %8041 = vmatpush2.bf16.msra.mxu1 %v14003_v17  ;;  %8116 = vmatprep.subr.bf16.mxu0 %v14014_v30  ;;  %v14062_v30 = vld [vmem:[#allocation2 + $0x1d1c] ss:$20 sps:$4 sm:$0xff]  }
 0x3df   :  { %8042 = vmatprep.subr.bf16.mxu1 %v14011_v29  ;;  %v14054_v29 = vld [vmem:[#allocation2 + $0x1840] ss:$20 sps:$4 sm:$0xff]  }
 0x3e1   :  { %8117 = vmatpush2.bf16.msra.mxu0 %v14012_v58 }
 0x3e2   :  { %8043 = vmatpush2.bf16.msra.mxu1 %v14009_v31  ;;  %8118 = vmatprep.subr.bf16.mxu0 %v14020_v62  ;;  %v14060_v62 = vld [vmem:[#allocation2 + $0x1d18] ss:$20 sps:$4 sm:$0xff]  }
 0x3e3   :  { %8044 = vmatprep.subr.bf16.mxu1 %v14017_v45  ;;  %v14057_v45 = vld [vmem:[#allocation2 + $0x19f8] ss:$20 sps:$4 sm:$0xff]  }
 0x3e5   :  { %8119 = vmatpush2.bf16.msra.mxu0 %v14018_v15  ;;  %v14068_v15 = vld [vmem:[#allocation2 + $0x1cf4] ss:$20 sps:$4 sm:$0xff]  }
 0x3e6   :  { %8045 = vmatpush2.bf16.msra.mxu1 %v14015_v34  ;;  %8120 = vmatprep.subr.bf16.mxu0 %v14026_v37  ;;  %v14065_v34 = vld [vmem:[#allocation2 + $0x19d4] ss:$20 sps:$4 sm:$0xff]   ;;  %v14063_v37 = vld [vmem:[#allocation2 + $0x19d0] ss:$20 sps:$4 sm:$0xff]  }
 0x3e7   :  { %8046 = vmatprep.subr.bf16.mxu1 %v14023_v35 }
 0x3e9   :  { %8121 = vmatpush2.bf16.msra.mxu0 %v14024_v40  ;;  %v14071_v40 = vld [vmem:[#allocation2 + $0x19ac] ss:$20 sps:$4 sm:$0xff]  }
 0x3ea   :  { %8047 = vmatpush2.bf16.msra.mxu1 %v14021_v38  ;;  %8122 = vmatprep.subr.bf16.mxu0 %v14032_v44  ;;  %v14066_v38 = vld [vmem:[#allocation2 + $0x1cf0] ss:$20 sps:$4 sm:$0xff]   ;;  %v14069_v44 = vld [vmem:[#allocation2 + $0x19a8] ss:$20 sps:$4 sm:$0xff]  }
 0x3eb   :  { %8048 = vmatprep.subr.bf16.mxu1 %v14029_v43  ;;  %v14074_v43 = vld [vmem:[#allocation2 + $0x1ccc] ss:$20 sps:$4 sm:$0xff]  }
 0x3ed   :  { %8123 = vmatpush2.bf16.msra.mxu0 %v14030_v46  ;;  %v14077_v46 = vld [vmem:[#allocation2 + $0x1984] ss:$20 sps:$4 sm:$0xff]  }
 0x3ee   :  { %8049 = vmatpush2.bf16.msra.mxu1 %v14027_v21  ;;  %8124 = vmatprep.subr.bf16.mxu0 %v14038_v0  ;;  %v14072_v21 = vld [vmem:[#allocation2 + $0x1cc8] ss:$20 sps:$4 sm:$0xff]  }
 0x3ef   :  { %8141 = vmatprep.subr.bf16.mxu1 %v14035_v48  ;;  %v14080_v48 = vld [vmem:[#allocation2 + $0x1ca4] ss:$20 sps:$4 sm:$0xff]  }
 0x3f0   :  { %v6118_v60 = vpop.f32.mrf.mxu0 }
 0x3f1   :  { %8051 = vmatmul.mubr.bf16.vlgmr.msra.gmra.mxu1 %v15015_v16  ;;  %8125 = vmatpush2.bf16.msra.mxu0 %v14036_v25  ;;  %v6119_v63 = vadd.f32 %v6118_v60, %v15206_v50  ;;  %v14056_v50 = vld [vmem:[#allocation2 + $0x1844] ss:$20 sps:$4 sm:$0xff]   ;;  %v14075_v25 = vld [vmem:[#allocation2 + $0x1980] ss:$20 sps:$4 sm:$0xff]   ;;  %v14083_v60 = vld [vmem:[#allocation2 + $0x1bdc] ss:$20 sps:$4 sm:$0xff]  }
 0x3f2   :  { %8142 = vmatpush1.bf16.msra.mxu1 %v14033_v52  ;;  %v6120_v5 = vpop.f32.mrf.mxu0  ;;  %8126 = vmatprep.subr.bf16.mxu0 %v14044_v59 }
 0x3f3   :  { %8143 = vmatprep.subr.bf16.mxu1 %v14041_v54  ;;  %v6121_v56 = vadd.f32 %v6120_v5, %v15208_v20  ;;  %8173 = vmatprep.mubr.bf16.mxu1 %v14987_v51  ;;  %v14059_v20 = vld [vmem:[#allocation2 + $0x19fc] ss:$20 sps:$4 sm:$0xff]   ;;  %v14078_v54 = vld [vmem:[#allocation2 + $0x1ca0] ss:$20 sps:$4 sm:$0xff]  }
 0x3f4   :  { %v6122_v18 = vpop.f32.mrf.mxu0 }
 0x3f5   :  { %8127 = vmatpush2.bf16.msra.mxu0 %v14042_v4  ;;  %v14081_v18 = vld [vmem:[#allocation2 + $0x1bd8] ss:$20 sps:$4 sm:$0xff]  }
 0x3f6   :  { %8144 = vmatpush1.bf16.msra.mxu1 %v14039_v2  ;;  %8128 = vmatprep.subr.bf16.mxu0 %v14050_v39  ;;  %v6123_v26 = vpop.f32.mrf.mxu0  ;;  %v14086_v2 = vld [vmem:[#allocation2 + $0x1c7c] ss:$20 sps:$4 sm:$0xff]  }
 0x3f7   :  { %8145 = vmatprep.subr.bf16.mxu1 %v14047_v11  ;;  %v14090_v26 = vld [vmem:[#allocation2 + $0x1c50] ss:$20 sps:$4 sm:$0xff]  }
 0x3f8   :  { %v6200_v17 = vpop.f32.mrf.mxu0 }
 0x3f9   :  { %8129 = vmatpush2.bf16.msra.mxu0 %v14048_v8  ;;  %v14089_v8 = vld [vmem:[#allocation2 + $0x1bb4] ss:$20 sps:$4 sm:$0xff]  }
 0x3fa   :  { %8146 = vmatpush1.bf16.msra.mxu1 %v14045_v19  ;;  %8130 = vmatprep.subr.bf16.mxu0 %v14056_v50  ;;  %v6202_v31 = vpop.f32.mrf.mxu0  ;;  %v14084_v19 = vld [vmem:[#allocation2 + $0x1c78] ss:$20 sps:$4 sm:$0xff]   ;;  %v14087_v50 = vld [vmem:[#allocation2 + $0x1bb0] ss:$20 sps:$4 sm:$0xff]  }
 0x3fb   :  { %8147 = vmatprep.subr.bf16.mxu1 %v14053_v42  ;;  %v14092_v42 = vld [vmem:[#allocation2 + $0x1c54] ss:$20 sps:$4 sm:$0xff]  }
 0x3fc   :  { %v6204_v58 = vpop.f32.mrf.mxu0 }
 0x3fd   :  { %8131 = vmatpush2.bf16.msra.mxu0 %v14054_v29  ;;  %v14096_v29 = vld [vmem:[#allocation2 + $0x1c28] ss:$20 sps:$4 sm:$0xff]   ;;  %v14099_v58 = vld [vmem:[#allocation2 + $0x1b60] ss:$20 sps:$4 sm:$0xff]  }
 0x3fe   :  { %8148 = vmatpush1.bf16.msra.mxu1 %v14051_v28  ;;  %8182 = vmatprep.subr.bf16.mxu0 %v14062_v30  ;;  %v6205_v35 = vpop.f32.mrf.mxu0  ;;  %v14093_v28 = vld [vmem:[#allocation2 + $0x1b88] ss:$20 sps:$4 sm:$0xff]   ;;  %v14104_v30 = vld [vmem:[#allocation2 + $0x1c04] ss:$20 sps:$4 sm:$0xff]  }
 0x3ff   :  { %8149 = vmatprep.subr.bf16.mxu1 %v14059_v20  ;;  %v14101_v20 = vld [vmem:[#allocation2 + $0x1b64] ss:$20 sps:$4 sm:$0xff]  }
 0x400   :  { %8133 = vmatmul.mubr.bf16.vlgmr.msra.gmra.mxu0 %v14991_v6 }
 0x401   :  { %8183 = vmatpush1.bf16.msra.mxu0 %v14060_v62  ;;  %8214 = vmatprep.mubr.bf16.mxu0 %v15010_v33  ;;  %v14107_v62 = vld [vmem:[#allocation2 + $0x1b3c] ss:$20 sps:$4 sm:$0xff]  }
 0x402   :  { %8150 = vmatpush1.bf16.msra.mxu1 %v14057_v45  ;;  %8184 = vmatprep.subr.bf16.mxu0 %v14068_v15  ;;  %v14102_v45 = vld [vmem:[#allocation2 + $0x1c00] ss:$20 sps:$4 sm:$0xff]  }
 0x403   :  { %8151 = vmatprep.subr.bf16.mxu1 %v14065_v34  ;;  %v14110_v34 = vld [vmem:[#allocation2 + $0x1e5c] ss:$20 sps:$4 sm:$0xff]  }
 0x405   :  { %8185 = vmatpush1.bf16.msra.mxu0 %v14066_v38  ;;  %v14105_v38 = vld [vmem:[#allocation2 + $0x1b38] ss:$20 sps:$4 sm:$0xff]  }
 0x406   :  { %8152 = vmatpush1.bf16.msra.mxu1 %v14063_v37  ;;  %8186 = vmatprep.subr.bf16.mxu0 %v14074_v43  ;;  %v14113_v43 = vld [vmem:[#allocation2 + $0x1b14] ss:$20 sps:$4 sm:$0xff]  }
 0x407   :  { %8153 = vmatprep.subr.bf16.mxu1 %v14071_v40  ;;  %v14108_v40 = vld [vmem:[#allocation2 + $0x1e58] ss:$20 sps:$4 sm:$0xff]  }
 0x409   :  { %v6159_v0 = vpop.f32.mrf.mxu1  ;;  %8187 = vmatpush1.bf16.msra.mxu0 %v14072_v21 }
 0x40a   :  { %v6160_v52 = vadd.f32 %v6159_v0, %v6119_v63  ;;  %8154 = vmatpush1.bf16.msra.mxu1 %v14069_v44  ;;  %8188 = vmatprep.subr.bf16.mxu0 %v14080_v48  ;;  %v14116_v44 = vld [vmem:[#allocation2 + $0x1e34] ss:$20 sps:$4 sm:$0xff]   ;;  %v14114_v48 = vld [vmem:[#allocation2 + $0x1e30] ss:$20 sps:$4 sm:$0xff]   ;;  %v14119_v0 = vld [vmem:[#allocation2 + $0x1aec] ss:$20 sps:$4 sm:$0xff]  }
 0x40b   :  { %v6161_v59 = vpop.f32.mrf.mxu1  ;;  %8155 = vmatprep.subr.bf16.mxu1 %v14077_v46  ;;  %v14111_v46 = vld [vmem:[#allocation2 + $0x1b10] ss:$20 sps:$4 sm:$0xff]  }
 0x40c   :  { %v15216_v4 = vadd.f32 %v6200_v17, %v6160_v52  ;;  %v6162_v5 = vadd.f32 %v6161_v59, %v6121_v56  ;;  %v14095_v17 = vld [vmem:[#allocation2 + $0x1b8c] ss:$20 sps:$4 sm:$0xff]   ;;  %v14125_v59 = vld [vmem:[#allocation2 + $0x1ac4] ss:$20 sps:$4 sm:$0xff]  }
 0x40d   :  { %v6163_v11 = vpop.f32.mrf.mxu1  ;;  %8189 = vmatpush1.bf16.msra.mxu0 %v14078_v54  ;;  %v14098_v56 = vld [vmem:[#allocation2 + $0x1c2c] ss:$20 sps:$4 sm:$0xff]   ;;  %v14120_v54 = vld [vmem:[#allocation2 + $0x1e08] ss:$20 sps:$4 sm:$0xff]  }
 0x40e   :  { %v15218_v39 = vadd.f32 %v6202_v31, %v6162_v5  ;;  %8156 = vmatpush1.bf16.msra.mxu1 %v14075_v25  ;;  %8190 = vmatprep.subr.bf16.mxu0 %v14086_v2  ;;  %v14122_v52 = vld [vmem:[#allocation2 + $0x1e0c] ss:$20 sps:$4 sm:$0xff]   ;;  %v14117_v25 = vld [vmem:[#allocation2 + $0x1ae8] ss:$20 sps:$4 sm:$0xff]  }
 0x40f   :  { %v6164_v63 = vpop.f32.mrf.mxu1  ;;  %8157 = vmatprep.subr.bf16.mxu1 %v14083_v60  ;;  %v14128_v60 = vld [vmem:[#allocation2 + $0x1de4] ss:$20 sps:$4 sm:$0xff]   ;;  %v14123_v5 = vld [vmem:[#allocation2 + $0x1ac0] ss:$20 sps:$4 sm:$0xff]  }
 0x410   :  { %v14126_v11 = vld [vmem:[#allocation2 + $0x1de0] ss:$20 sps:$4 sm:$0xff]   ;;  %v14134_v63 = vld [vmem:[#allocation2 + $0x1dbc] ss:$20 sps:$4 sm:$0xff]  }
 0x411   :  { %8191 = vmatpush1.bf16.msra.mxu0 %v14084_v19  ;;  %v14131_v19 = vld [vmem:[#allocation2 + $0x1e84] ss:$20 sps:$4 sm:$0xff]  }
 0x412   :  { %8158 = vmatpush2.bf16.msra.mxu1 %v14081_v18  ;;  %8192 = vmatprep.subr.bf16.mxu0 %v14092_v42 }
 0x413   :  { %8159 = vmatprep.subr.bf16.mxu1 %v14089_v8 }
 0x415   :  { %8193 = vmatpush1.bf16.msra.mxu0 %v14090_v26  ;;  %v14129_v26 = vld [vmem:[#allocation2 + $0x1e80] ss:$20 sps:$4 sm:$0xff]  }
 0x416   :  { %8160 = vmatpush2.bf16.msra.mxu1 %v14087_v50  ;;  %8194 = vmatprep.subr.bf16.mxu0 %v14098_v56 }
 0x417   :  { %8161 = vmatprep.subr.bf16.mxu1 %v14095_v17  ;;  %v14132_v17 = vld [vmem:[#allocation2 + $0x1db8] ss:$20 sps:$4 sm:$0xff]  }
 0x418   :  { %v12583_v31 = vpop.f32.mrf.mxu0 }
 0x419   :  { %8195 = vmatpush1.bf16.msra.mxu0 %v14096_v29  ;;  %v14138_v29 = vld [vmem:[#allocation2 + $0x1960] ss:$20 sps:$4 sm:$0xff]  }
 0x41a   :  { %8162 = vmatpush2.bf16.msra.mxu1 %v14093_v28  ;;  %8196 = vmatprep.subr.bf16.mxu0 %v14104_v30  ;;  %v12584_v15 = vpop.f32.mrf.mxu0  ;;  %v14137_v28 = vld [vmem:[#allocation2 + $0x1d94] ss:$20 sps:$4 sm:$0xff]   ;;  %v14135_v30 = vld [vmem:[#allocation2 + $0x1d90] ss:$20 sps:$4 sm:$0xff]  }
 0x41b   :  { %8163 = vmatprep.subr.bf16.mxu1 %v14101_v20  ;;  %v12585_v35 = vadd.f32 %v12584_v15, %v12583_v31 }
 0x41c   :  { %v12586_v37 = vpop.f32.mrf.mxu0 }
 0x41d   :  { %8197 = vmatpush1.bf16.msra.mxu0 %v14102_v45  ;;  %v14147_v37 = vld [vmem:[#allocation2 + $0x1d44] ss:$20 sps:$4 sm:$0xff]  }
 0x41e   :  { %8164 = vmatpush2.bf16.msra.mxu1 %v14099_v58  ;;  %8198 = vmatprep.subr.bf16.mxu0 %v14110_v34  ;;  %v12587_v21 = vpop.f32.mrf.mxu0  ;;  %v14142_v58 = vld [vmem:[#allocation2 + $0x1d6c] ss:$20 sps:$4 sm:$0xff]   ;;  %v14140_v34 = vld [vmem:[#allocation2 + $0x1d68] ss:$20 sps:$4 sm:$0xff]  }
 0x41f   :  { %8165 = vmatprep.subr.bf16.mxu1 %v14107_v62  ;;  %v14139_v62 = vld [vmem:[#allocation2 + $0x1820] ss:$20 sps:$4 sm:$0xff]  }
 0x421   :  { %8199 = vmatpush2.bf16.msra.mxu0 %v14108_v40 }
 0x422   :  { %8166 = vmatpush2.bf16.msra.mxu1 %v14105_v38  ;;  %8200 = vmatprep.subr.bf16.mxu0 %v14116_v44  ;;  %v15225_v38 = vld [vmem:[%s15391_s0 + $0x18] ss:$0 sps:$4 sm:$0xff]   ;;  %v14145_v44 = vld [vmem:[#allocation2 + $0x1d40] ss:$20 sps:$4 sm:$0xff]  }
 0x423   :  { %8167 = vmatprep.subr.bf16.mxu1 %v14113_v43  ;;  %v14144_v43 = vld [vmem:[#allocation2 + $0x17f8] ss:$20 sps:$4 sm:$0xff]  }
 0x425   :  { %8201 = vmatpush2.bf16.msra.mxu0 %v14114_v48  ;;  %v14150_v48 = vld [vmem:[#allocation2 + $0x1be0] ss:$20 sps:$4 sm:$0xff]  }
 0x426   :  { %8168 = vmatpush2.bf16.msra.mxu1 %v14111_v46  ;;  %8202 = vmatprep.subr.bf16.mxu0 %v14122_v52  ;;  %v14148_v46 = vld [vmem:[#allocation2 + $0x1910] ss:$20 sps:$4 sm:$0xff]  }
 0x427   :  { %8169 = vmatprep.subr.bf16.mxu1 %v14119_v0 }
 0x429   :  { %v12605_v2 = vpop.f32.mrf.mxu1  ;;  %8203 = vmatpush2.bf16.msra.mxu0 %v14120_v54  ;;  %v14149_v54 = vld [vmem:[#allocation2 + $0x17d0] ss:$20 sps:$4 sm:$0xff]  }
 0x42a   :  { %8170 = vmatpush2.bf16.msra.mxu1 %v14117_v25  ;;  %8204 = vmatprep.subr.bf16.mxu0 %v14128_v60  ;;  %v14151_v60 = vld [vmem:[#allocation2 + $0x18e8] ss:$20 sps:$4 sm:$0xff]  }
 0x42b   :  { %v12606_v18 = vpop.f32.mrf.mxu1  ;;  %8171 = vmatprep.subr.bf16.mxu1 %v14125_v59  ;;  %v14152_v59 = vld [vmem:[#allocation2 + $0x1aa0] ss:$20 sps:$4 sm:$0xff]  }
 0x42c   :  { %v12607_v8 = vadd.f32 %v12606_v18, %v12605_v2  ;;  %v14154_v2 = vld [vmem:[#allocation2 + $0x1bb8] ss:$20 sps:$4 sm:$0xff]   ;;  %v14153_v18 = vld [vmem:[#allocation2 + $0x17a8] ss:$20 sps:$4 sm:$0xff]  }
 0x42d   :  { %v12608_v42 = vpop.f32.mrf.mxu1  ;;  %8205 = vmatpush2.bf16.msra.mxu0 %v14126_v11 }
 0x42e   :  { %v6282_v50 = vadd.f32 %v12607_v8, %v12585_v35  ;;  %8172 = vmatpush2.bf16.msra.mxu1 %v14123_v5  ;;  %8206 = vmatprep.subr.bf16.mxu0 %v14134_v63  ;;  %v14143_v35 = vld [vmem:[#allocation2 + $0x1938] ss:$20 sps:$4 sm:$0xff]   ;;  %v14158_v63 = vld [vmem:[#allocation2 + $0x1b90] ss:$20 sps:$4 sm:$0xff]   ;;  %v14157_v8 = vld [vmem:[#allocation2 + $0x1780] ss:$20 sps:$4 sm:$0xff]  }
 0x42f   :  { %v12609_v56 = vpop.f32.mrf.mxu1  ;;  %8237 = vmatprep.subr.bf16.mxu1 %v14131_v19  ;;  %v14156_v19 = vld [vmem:[#allocation2 + $0x1a78] ss:$20 sps:$4 sm:$0xff]   ;;  %v14160_v42 = vld [vmem:[#allocation2 + $0x1a50] ss:$20 sps:$4 sm:$0xff]  }
 0x430   :  { %v14164_v56 = vld [vmem:[#allocation2 + $0x1a28] ss:$20 sps:$4 sm:$0xff]  }
 0x431   :  { %8174 = vmatmul.mubr.bf16.vlgmr.msra.gmra.mxu1 %v14993_v7  ;;  %v6361_v20 = vpop.f32.mrf.mxu1  ;;  %8207 = vmatpush2.bf16.msra.mxu0 %v14132_v17  ;;  %v14161_v17 = vld [vmem:[#allocation2 + $0x1758] ss:$20 sps:$4 sm:$0xff]  }
 0x432   :  { %8238 = vmatpush1.bf16.msra.mxu1 %v14129_v26  ;;  %8208 = vmatprep.subr.bf16.mxu0 %v14137_v28  ;;  %v14162_v26 = vld [vmem:[#allocation2 + $0x1b68] ss:$20 sps:$4 sm:$0xff]   ;;  %v14163_v28 = vld [vmem:[#allocation2 + $0x1870] ss:$20 sps:$4 sm:$0xff]  }
 0x433   :  { %v12755_v31 = vpop.f32.mrf.mxu1  ;;  %8255 = vmatprep.mubr.bf16.mxu1 %v14886_v13  ;;  %12635 = vmatprep.subr.bf16.mxu1 %v14138_v29  ;;  %v14166_v29 = vld [vmem:[#allocation2 + $0x1b40] ss:$20 sps:$4 sm:$0xff]  }
 0x434   :  { %v14170_v31 = vld [vmem:[#allocation2 + $0x1b18] ss:$20 sps:$4 sm:$0xff]  }
 0x435   :  { %v6364_v45 = vpop.f32.mrf.mxu1  ;;  %8209 = vmatpush2.bf16.msra.mxu0 %v14135_v30  ;;  %v14167_v30 = vld [vmem:[#allocation2 + $0x1848] ss:$20 sps:$4 sm:$0xff]  }
 0x436   :  { %8210 = vmatprep.subr.bf16.mxu0 %v14142_v58  ;;  %v14169_v58 = vld [vmem:[#allocation2 + $0x1708] ss:$20 sps:$4 sm:$0xff]   ;;  %v14171_v45 = vld [vmem:[#allocation2 + $0x19d8] ss:$20 sps:$4 sm:$0xff]  }
 0x437   :  { %v12756_v15 = vpop.f32.mrf.mxu1 }
 0x438   :  { %v12627_v40 = vpop.f32.mrf.mxu0  ;;  %v14173_v15 = vld [vmem:[#allocation2 + $0x1d20] ss:$20 sps:$4 sm:$0xff]  }
 0x439   :  { %12105 = vmatmul.mubr.msk.bf16.vlgmr.msra.gmra.mxu1 %vm1761_vm0, %v15225_v38  ;;  %8211 = vmatpush2.bf16.msra.mxu0 %v14140_v34  ;;  %v14174_v34 = vld [vmem:[#allocation2 + $0x1af0] ss:$20 sps:$4 sm:$0xff]  }
 0x43a   :  { %12636 = vmatpush3.bf16.msra.mxu1 %v14139_v62  ;;  %v12628_v21 = vpop.f32.mrf.mxu0  ;;  %8212 = vmatprep.subr.bf16.mxu0 %v14147_v37  ;;  %v14172_v62 = vld [vmem:[#allocation2 + $0x1e60] ss:$20 sps:$4 sm:$0xff]   ;;  %v14176_v37 = vld [vmem:[#allocation2 + $0x1e38] ss:$20 sps:$4 sm:$0xff]  }
 0x43b   :  { %12637 = vmatprep.subr.bf16.mxu1 %v14143_v35  ;;  %v12629_v0 = vadd.f32 %v12628_v21, %v12627_v40  ;;  %8296 = vmatprep.mubr.bf16.mxu1 %v14982_v47  ;;  %v14155_v47 = vld [vmem:[#allocation2 + $0x18c0] ss:$20 sps:$4 sm:$0xff]   ;;  %v14175_v35 = vld [vmem:[#allocation2 + $0x19b0] ss:$20 sps:$4 sm:$0xff]   ;;  %v14178_v40 = vld [vmem:[#allocation2 + $0x1ac8] ss:$20 sps:$4 sm:$0xff]  }
 0x43c   :  { %v12630_v52 = vpop.f32.mrf.mxu0  ;;  %v14180_v21 = vld [vmem:[#allocation2 + $0x1e10] ss:$20 sps:$4 sm:$0xff]  }
 0x43d   :  { %v6322_v25 = vadd.f32 %v12629_v0, %v6282_v50  ;;  %8213 = vmatpush2.bf16.msra.mxu0 %v14145_v44  ;;  %v14159_v50 = vld [vmem:[#allocation2 + $0x1898] ss:$20 sps:$4 sm:$0xff]   ;;  %v14179_v44 = vld [vmem:[#allocation2 + $0x1988] ss:$20 sps:$4 sm:$0xff]  }
 0x43e   :  { %12638 = vmatpush3.bf16.msra.mxu1 %v14144_v43  ;;  %12657 = vmatprep.subr.bf16.mxu0 %v14150_v48  ;;  %v12631_v5 = vpop.f32.mrf.mxu0  ;;  %v14177_v43 = vld [vmem:[#allocation2 + $0x1cf8] ss:$20 sps:$4 sm:$0xff]   ;;  %v14192_v48 = vld [vmem:[#allocation2 + $0x1e88] ss:$20 sps:$4 sm:$0xff]  }
 0x43f   :  { %12639 = vmatprep.subr.bf16.mxu1 %v14148_v46  ;;  %v15230_v11 = vadd.f32 %v6361_v20, %v6322_v25  ;;  %v14165_v20 = vld [vmem:[#allocation2 + $0x1730] ss:$20 sps:$4 sm:$0xff]   ;;  %v14182_v0 = vld [vmem:[#allocation2 + $0x1de8] ss:$20 sps:$4 sm:$0xff]   ;;  %v14184_v25 = vld [vmem:[#allocation2 + $0x1dc0] ss:$20 sps:$4 sm:$0xff]  }
 0x440   :  { %8215 = vmatmul.mubr.bf16.vlgmr.msra.gmra.mxu0 %v15015_v16  ;;  %v14181_v46 = vld [vmem:[#allocation2 + $0x1cd0] ss:$20 sps:$4 sm:$0xff]  }
 0x441   :  { %12658 = vmatpush3.bf16.msra.mxu0 %v14152_v59  ;;  %8336 = vmatprep.mubr.bf16.mxu0 %v14987_v51  ;;  %v14168_v51 = vld [vmem:[#allocation2 + $0x1a00] ss:$20 sps:$4 sm:$0xff]   ;;  %v14186_v59 = vld [vmem:[#allocation2 + $0x1d98] ss:$20 sps:$4 sm:$0xff]   ;;  %v14188_v5 = vld [vmem:[#allocation2 + $0x1d70] ss:$20 sps:$4 sm:$0xff]  }
 0x442   :  { %12640 = vmatpush3.bf16.msra.mxu1 %v14149_v54  ;;  %12659 = vmatprep.subr.bf16.mxu0 %v14154_v2  ;;  %v14195_v52 = vld [vmem:[#allocation6 + $0x74] ss:$8 sps:$4 sm:$0xff]   ;;  %v14193_v54 = vld [vmem:[#allocation6 + $0x70] ss:$8 sps:$4 sm:$0xff]   ;;  %v14196_v2 = vld [vmem:[#allocation6 + $0x60] ss:$8 sps:$4 sm:$0xff]  }
 0x443   :  { %12641 = vmatprep.subr.bf16.mxu1 %v14151_v60  ;;  %v14198_v60 = vld [vmem:[#allocation6 + $0x64] ss:$8 sps:$4 sm:$0xff]  }
 0x445   :  { %12660 = vmatpush3.bf16.msra.mxu0 %v14156_v19  ;;  %v14189_v19 = vld [vmem:[#allocation2 + $0x1c30] ss:$20 sps:$4 sm:$0xff]  }
 0x446   :  { %12642 = vmatpush3.bf16.msra.mxu1 %v14153_v18  ;;  %12661 = vmatprep.subr.bf16.mxu0 %v14158_v63  ;;  %v14201_v18 = vld [vmem:[#allocation6 + $0x54] ss:$8 sps:$4 sm:$0xff]  }
 0x447   :  { %12643 = vmatprep.subr.bf16.mxu1 %v14155_v47  ;;  %v14199_v47 = vld [vmem:[#allocation6 + $0x50] ss:$8 sps:$4 sm:$0xff]  }
 0x448   :  { %v14190_v63 = vld [vmem:[#allocation2 + $0x1d48] ss:$20 sps:$4 sm:$0xff]  }
 0x449   :  { %12662 = vmatpush3.bf16.msra.mxu0 %v14160_v42 }
 0x44a   :  { %12644 = vmatpush3.bf16.msra.mxu1 %v14157_v8  ;;  %12663 = vmatprep.subr.bf16.mxu0 %v14162_v26  ;;  %v14204_v8 = vld [vmem:[#allocation6 + $0x44] ss:$8 sps:$4 sm:$0xff]  }
 0x44b   :  { %12645 = vmatprep.subr.bf16.mxu1 %v14159_v50  ;;  %v14202_v50 = vld [vmem:[#allocation6 + $0x40] ss:$8 sps:$4 sm:$0xff]  }
 0x44d   :  { %12664 = vmatpush3.bf16.msra.mxu0 %v14164_v56  ;;  %v14243_v56 = vld [vmem:[#allocation6 + $0x174] ss:$8 sps:$4 sm:$0xff]  }
 0x44e   :  { %12646 = vmatpush3.bf16.msra.mxu1 %v14161_v17  ;;  %12665 = vmatprep.subr.bf16.mxu0 %v14166_v29  ;;  %v14207_v17 = vld [vmem:[#allocation6 + $0x34] ss:$8 sps:$4 sm:$0xff]   ;;  %v14205_v29 = vld [vmem:[#allocation6 + $0x30] ss:$8 sps:$4 sm:$0xff]  }
 0x44f   :  { %12647 = vmatprep.subr.bf16.mxu1 %v14163_v28 }
 0x451   :  { %12666 = vmatpush3.bf16.msra.mxu0 %v14168_v51 }
 0x452   :  { %12648 = vmatpush3.bf16.msra.mxu1 %v14165_v20  ;;  %12667 = vmatprep.subr.bf16.mxu0 %v14170_v31  ;;  %v14241_v20 = vld [vmem:[#allocation6 + $0x170] ss:$8 sps:$4 sm:$0xff]   ;;  %v14246_v31 = vld [vmem:[#allocation6 + $0x164] ss:$8 sps:$4 sm:$0xff]  }
 0x453   :  { %12649 = vmatprep.subr.bf16.mxu1 %v14167_v30  ;;  %v14210_v30 = vld [vmem:[#allocation6 + $0x24] ss:$8 sps:$4 sm:$0xff]  }
 0x455   :  { %12668 = vmatpush3.bf16.msra.mxu0 %v14171_v45  ;;  %v14208_v45 = vld [vmem:[#allocation6 + $0x20] ss:$8 sps:$4 sm:$0xff]  }
 0x456   :  { %12650 = vmatpush3.bf16.msra.mxu1 %v14169_v58  ;;  %12669 = vmatprep.subr.bf16.mxu0 %v14174_v34 }
 0x457   :  { %12679 = vmatprep.subr.bf16.mxu1 %v14172_v62  ;;  %v14244_v62 = vld [vmem:[#allocation6 + $0x160] ss:$8 sps:$4 sm:$0xff]  }
 0x459   :  { %8297 = vmatmul.mubr.bf16.vlgmr.msra.gmra.mxu1 %v14991_v6  ;;  %12670 = vmatpush3.bf16.msra.mxu0 %v14175_v35  ;;  %v14183_v6 = vld [vmem:[#allocation2 + $0x1ca8] ss:$20 sps:$4 sm:$0xff]  }
 0x45a   :  { %12680 = vmatpush3.bf16.msra.mxu1 %v14173_v15  ;;  %12671 = vmatprep.subr.bf16.mxu0 %v14178_v40  ;;  %v14213_v15 = vld [vmem:[#allocation6 + $0x14] ss:$8 sps:$4 sm:$0xff]   ;;  %v14211_v40 = vld [vmem:[#allocation6 + $0x10] ss:$8 sps:$4 sm:$0xff]  }
 0x45b   :  { %12681 = vmatprep.subr.bf16.mxu1 %v14176_v37  ;;  %8376 = vmatprep.mubr.bf16.mxu1 %v15010_v33  ;;  %v14185_v33 = vld [vmem:[#allocation2 + $0x1c80] ss:$20 sps:$4 sm:$0xff]  }
 0x45c   :  { %v14249_v35 = vld [vmem:[#allocation6 + $0x154] ss:$8 sps:$4 sm:$0xff]  }
 0x45d   :  { %12672 = vmatpush3.bf16.msra.mxu0 %v14179_v44 }
 0x45e   :  { %12682 = vmatpush3.bf16.msra.mxu1 %v14177_v43  ;;  %12757 = vmatprep.subr.bf16.mxu0 %v14887_v12  ;;  %v14247_v43 = vld [vmem:[#allocation6 + $0x150] ss:$8 sps:$4 sm:$0xff]  }
 0x45f   :  { %12683 = vmatprep.subr.bf16.mxu1 %v14180_v21  ;;  %v14252_v21 = vld [vmem:[#allocation6 + $0x144] ss:$8 sps:$4 sm:$0xff]  }
 0x460   :  { %8337 = vmatmul.mubr.bf16.vlgmr.msra.gmra.mxu0 %v14993_v7  ;;  %v14187_v7 = vld [vmem:[#allocation2 + $0x1c58] ss:$20 sps:$4 sm:$0xff]  }
 0x461   :  { %12758 = vmatpush3.bf16.msra.mxu0 %v14192_v48  ;;  %12759 = vmatprep.mubr.msk.bf16.mxu0 %vm14888_vm1, %v14887_v12  ;;  %v14214_v48 = vld [vmem:[#allocation6] ss:$8 sps:$4 sm:$0xff]  }
 0x462   :  { %12684 = vmatpush3.bf16.msra.mxu1 %v14181_v46  ;;  %8912 = vmatprep.subr.bf16.mxu0 %v14195_v52 }
 0x463   :  { %12685 = vmatprep.subr.bf16.mxu1 %v14182_v0  ;;  %v14250_v0 = vld [vmem:[#allocation6 + $0x140] ss:$8 sps:$4 sm:$0xff]  }
 0x466   :  { %12686 = vmatpush3.bf16.msra.mxu1 %v14183_v6  ;;  %v14219_v6 = vld [vmem:[#allocation6 + $0xf4] ss:$8 sps:$4 sm:$0xff]  }
 0x467   :  { %12687 = vmatprep.subr.bf16.mxu1 %v14184_v25  ;;  %v14255_v25 = vld [vmem:[#allocation6 + $0x134] ss:$8 sps:$4 sm:$0xff]  }
 0x468   :  { %12760 = vmatmul.mubr.msk.bf16.vlgmr.msra.gmra.mxu0 %vm1761_vm0, %v15225_v38  ;;  %v14191_v38 = vld [vmem:[#allocation2 + $0x1c08] ss:$20 sps:$4 sm:$0xff]  }
 0x469   :  { %8913 = vmatpush1.bf16.msra.mxu0 %v14193_v54  ;;  %v14217_v54 = vld [vmem:[#allocation6 + $0xf0] ss:$8 sps:$4 sm:$0xff]  }
 0x46a   :  { %12688 = vmatpush3.bf16.msra.mxu1 %v14185_v33  ;;  %8914 = vmatprep.subr.bf16.mxu0 %v14198_v60 }
 0x46b   :  { %12689 = vmatprep.subr.bf16.mxu1 %v14186_v59  ;;  %v14253_v59 = vld [vmem:[#allocation6 + $0x130] ss:$8 sps:$4 sm:$0xff]  }
 0x46d   :  { %8915 = vmatpush1.bf16.msra.mxu0 %v14196_v2  ;;  %v14258_v2 = vld [vmem:[#allocation6 + $0x124] ss:$8 sps:$4 sm:$0xff]  }
 0x46e   :  { %12690 = vmatpush3.bf16.msra.mxu1 %v14187_v7  ;;  %8916 = vmatprep.subr.bf16.mxu0 %v14201_v18  ;;  %v14222_v7 = vld [vmem:[#allocation6 + $0xe4] ss:$8 sps:$4 sm:$0xff]   ;;  %v14256_v18 = vld [vmem:[#allocation6 + $0x120] ss:$8 sps:$4 sm:$0xff]  }
 0x46f   :  { %12691 = vmatprep.subr.bf16.mxu1 %v14188_v5  ;;  %v14220_v5 = vld [vmem:[#allocation6 + $0xe0] ss:$8 sps:$4 sm:$0xff]  }
 0x471   :  { %v15242_v42 = vpop.f32.mrf.mxu1  ;;  %8917 = vmatpush1.bf16.msra.mxu0 %v14199_v47  ;;  %v14261_v47 = vld [vmem:[#allocation6 + $0x114] ss:$8 sps:$4 sm:$0xff]  }
 0x472   :  { %12692 = vmatpush3.bf16.msra.mxu1 %v14189_v19  ;;  %8918 = vmatprep.subr.bf16.mxu0 %v14204_v8  ;;  %v14225_v19 = vld [vmem:[#allocation6 + $0xd4] ss:$8 sps:$4 sm:$0xff]   ;;  %v14259_v8 = vld [vmem:[#allocation6 + $0x110] ss:$8 sps:$4 sm:$0xff]  }
 0x473   :  { %v15244_v26 = vpop.f32.mrf.mxu1  ;;  %12693 = vmatprep.subr.bf16.mxu1 %v14190_v63  ;;  %v14223_v63 = vld [vmem:[#allocation6 + $0xd0] ss:$8 sps:$4 sm:$0xff]  }
 0x475   :  { %v7974_v28 = vpop.f32.mrf.mxu1  ;;  %8919 = vmatpush1.bf16.msra.mxu0 %v14202_v50  ;;  %v14264_v50 = vld [vmem:[#allocation6 + $0x104] ss:$8 sps:$4 sm:$0xff]  }
 0x476   :  { %12694 = vmatpush3.bf16.msra.mxu1 %v14191_v38  ;;  %8920 = vmatprep.subr.bf16.mxu0 %v14207_v17  ;;  %v14228_v38 = vld [vmem:[#allocation6 + $0xc4] ss:$8 sps:$4 sm:$0xff]   ;;  %v14226_v17 = vld [vmem:[#allocation6 + $0xc0] ss:$8 sps:$4 sm:$0xff]   ;;  %v14231_v28 = vld [vmem:[#allocation6 + $0xb4] ss:$8 sps:$4 sm:$0xff]  }
 0x477   :  { %v7975_v51 = vpop.f32.mrf.mxu1  ;;  %8953 = vmatprep.subr.bf16.mxu1 %v14243_v56  ;;  %v14262_v56 = vld [vmem:[#allocation6 + $0x100] ss:$8 sps:$4 sm:$0xff]  }
 0x478   :  { %v15247_v58 = vpop.f32.mrf.mxu0  ;;  %v14265_v51 = vld [vmem:[#allocation6 + $0x1f0] ss:$8 sps:$4 sm:$0xff]  }
 0x479   :  { %8377 = vmatmul.mubr.bf16.vlgmr.msra.gmra.mxu1 %v15015_v16  ;;  %8921 = vmatpush1.bf16.msra.mxu0 %v14205_v29  ;;  %v14216_v16 = vld [vmem:[#allocation6 + $0x4] ss:$8 sps:$4 sm:$0xff]   ;;  %v14267_v29 = vld [vmem:[#allocation6 + $0x1f4] ss:$8 sps:$4 sm:$0xff]  }
 0x47a   :  { %8954 = vmatpush1.bf16.msra.mxu1 %v14241_v20  ;;  %v15249_v34 = vpop.f32.mrf.mxu0  ;;  %8922 = vmatprep.subr.bf16.mxu0 %v14210_v30  ;;  %v14229_v20 = vld [vmem:[#allocation6 + $0xb0] ss:$8 sps:$4 sm:$0xff]   ;;  %v14234_v30 = vld [vmem:[#allocation6 + $0xa4] ss:$8 sps:$4 sm:$0xff]  }
 0x47b   :  { %8955 = vmatprep.subr.bf16.mxu1 %v14246_v31  ;;  %v14270_v31 = vld [vmem:[#allocation6 + $0x1e4] ss:$8 sps:$4 sm:$0xff]  }
 0x47c   :  { %v8015_v37 = vpop.f32.mrf.mxu0 }
 0x47d   :  { %8923 = vmatpush1.bf16.msra.mxu0 %v14208_v45  ;;  %v14232_v45 = vld [vmem:[#allocation6 + $0xa0] ss:$8 sps:$4 sm:$0xff]   ;;  %v14235_v37 = vld [vmem:[#allocation6 + $0x90] ss:$8 sps:$4 sm:$0xff]  }
 0x47e   :  { %8956 = vmatpush1.bf16.msra.mxu1 %v14244_v62  ;;  %v8016_v44 = vpop.f32.mrf.mxu0  ;;  %8924 = vmatprep.subr.bf16.mxu0 %v14213_v15  ;;  %v14268_v62 = vld [vmem:[#allocation6 + $0x1e0] ss:$8 sps:$4 sm:$0xff]   ;;  %v14237_v15 = vld [vmem:[#allocation6 + $0x94] ss:$8 sps:$4 sm:$0xff]  }
 0x47f   :  { %8957 = vmatprep.subr.bf16.mxu1 %v14249_v35  ;;  %v14273_v35 = vld [vmem:[#allocation6 + $0x1d4] ss:$8 sps:$4 sm:$0xff]   ;;  %v14276_v44 = vld [vmem:[#allocation6 + $0x1c4] ss:$8 sps:$4 sm:$0xff]  }
 0x480   :  { %v15251_v46 = vpop.f32.mrf.mxu0 }
 0x481   :  { %8925 = vmatpush1.bf16.msra.mxu0 %v14211_v40  ;;  %v14271_v40 = vld [vmem:[#allocation6 + $0x1d0] ss:$8 sps:$4 sm:$0xff]  }
 0x482   :  { %8958 = vmatpush1.bf16.msra.mxu1 %v14247_v43  ;;  %v15253_v52 = vpop.f32.mrf.mxu0  ;;  %8926 = vmatprep.subr.bf16.mxu0 %v14216_v16  ;;  %v14240_v43 = vld [vmem:[#allocation6 + $0x84] ss:$8 sps:$4 sm:$0xff]   ;;  %v14238_v16 = vld [vmem:[#allocation6 + $0x80] ss:$8 sps:$4 sm:$0xff]  }
 0x483   :  { %8959 = vmatprep.subr.bf16.mxu1 %v14252_v21  ;;  %v14274_v21 = vld [vmem:[#allocation6 + $0x1c0] ss:$8 sps:$4 sm:$0xff]  }
 0x484   :  { %v8097_v33 = vpop.f32.mrf.mxu0 }
 0x485   :  { %8927 = vmatpush1.bf16.msra.mxu0 %v14214_v48  ;;  %v14279_v48 = vld [vmem:[#allocation6 + $0x1b4] ss:$8 sps:$4 sm:$0xff]   ;;  %v8441_v33 = vlaneseq }
 0x486   :  { %8960 = vmatpush1.bf16.msra.mxu1 %v14250_v0  ;;  %v8098_v60 = vpop.f32.mrf.mxu0  ;;  %8928 = vmatprep.subr.bf16.mxu0 %v14219_v6  ;;  %v14277_v0 = vld [vmem:[#allocation6 + $0x1b0] ss:$8 sps:$4 sm:$0xff]   ;;  %v14282_v6 = vld [vmem:[#allocation6 + $0x1a4] ss:$8 sps:$4 sm:$0xff]  }
 0x487   :  { %8961 = vmatprep.subr.bf16.mxu1 %v14255_v25  ;;  %v14280_v25 = vld [vmem:[#allocation6 + $0x1a0] ss:$8 sps:$4 sm:$0xff]   ;;  %v15255_v60 = vshrl.u32 %v8441_v33, 7 }
 0x489   :  { %8929 = vmatpush2.bf16.msra.mxu0 %v14217_v54  ;;  %v14285_v54 = vld [vmem:[#allocation6 + $0x194] ss:$8 sps:$4 sm:$0xff]  }
 0x48a   :  { %8962 = vmatpush1.bf16.msra.mxu1 %v14253_v59  ;;  %8930 = vmatprep.subr.bf16.mxu0 %v14222_v7  ;;  %v14283_v59 = vld [vmem:[#allocation6 + $0x190] ss:$8 sps:$4 sm:$0xff]   ;;  %v14288_v7 = vld [vmem:[#allocation6 + $0x184] ss:$8 sps:$4 sm:$0xff]  }
 0x48b   :  { %8963 = vmatprep.subr.bf16.mxu1 %v14258_v2  ;;  %v8012_v2 = vadd.f32 %v15247_v58, %v15242_v42 }
 0x48d   :  { %8931 = vmatpush2.bf16.msra.mxu0 %v14220_v5 }
 0x48e   :  { %8964 = vmatpush1.bf16.msra.mxu1 %v14256_v18  ;;  %8932 = vmatprep.subr.bf16.mxu0 %v14225_v19  ;;  %v8014_v18 = vadd.f32 %v15249_v34, %v15244_v26 }
 0x48f   :  { %8965 = vmatprep.subr.bf16.mxu1 %v14261_v47  ;;  %v14286_v47 = vld [vmem:[#allocation6 + $0x180] ss:$8 sps:$4 sm:$0xff]  }
 0x491   :  { %8933 = vmatpush2.bf16.msra.mxu0 %v14223_v63 }
 0x492   :  { %8966 = vmatpush1.bf16.msra.mxu1 %v14259_v8  ;;  %8934 = vmatprep.subr.bf16.mxu0 %v14228_v38  ;;  %v8443_v8 = vsub.s32 0, %v15255_v60  ;;  %v14291_v38 = vld [vmem:[#allocation6 + $0x2b4] ss:$8 sps:$4 sm:$0xff]  }
 0x493   :  { %8967 = vmatprep.subr.bf16.mxu1 %v14264_v50 }
 0x495   :  { %8935 = vmatpush2.bf16.msra.mxu0 %v14226_v17 }
 0x496   :  { %8968 = vmatpush1.bf16.msra.mxu1 %v14262_v56  ;;  %8936 = vmatprep.subr.bf16.mxu0 %v14231_v28  ;;  %v15263_v56 = vld [vmem:[#allocation4] sm:$0x1f]  ;;  %v8447_v28 = vsub.s32 1, %v15255_v60 }
 0x497   :  { %8969 = vmatprep.subr.bf16.mxu1 %v14267_v29  ;;  %v8444_v29 = vrot.slane %v15263_v56, %v8443_v8 }
 0x499   :  { %8937 = vmatpush2.bf16.msra.mxu0 %v14229_v20  ;;  %v14321_v20 = vld [vmem:[#allocation6 + $0x234] ss:$8 sps:$4 sm:$0xff]  }
 0x49a   :  { %8970 = vmatpush2.bf16.msra.mxu1 %v14265_v51  ;;  %8938 = vmatprep.subr.bf16.mxu0 %v14234_v30 }
 0x49b   :  { %8971 = vmatprep.subr.bf16.mxu1 %v14270_v31 }
 0x49d   :  { %8939 = vmatpush2.bf16.msra.mxu0 %v14232_v45 }
 0x49e   :  { %8972 = vmatpush2.bf16.msra.mxu1 %v14268_v62  ;;  %8940 = vmatprep.subr.bf16.mxu0 %v14237_v15  ;;  %v14319_v62 = vld [vmem:[#allocation6 + $0x230] ss:$8 sps:$4 sm:$0xff]  }
 0x49f   :  { %8973 = vmatprep.subr.bf16.mxu1 %v14273_v35 }
 0x4a1   :  { %8941 = vmatpush2.bf16.msra.mxu0 %v14235_v37  ;;  %v14339_v37 = vld [vmem:[#allocation6 + $0x204] ss:$8 sps:$4 sm:$0xff]  }
 0x4a2   :  { %8974 = vmatpush2.bf16.msra.mxu1 %v14271_v40  ;;  %8942 = vmatprep.subr.bf16.mxu0 %v14240_v43  ;;  %v14337_v40 = vld [vmem:[#allocation6 + $0x200] ss:$8 sps:$4 sm:$0xff]   ;;  %v14345_v43 = vld [vmem:[#allocation6 + $0x3b4] ss:$8 sps:$4 sm:$0xff]  }
 0x4a3   :  { %8975 = vmatprep.subr.bf16.mxu1 %v14276_v44 }
 0x4a5   :  { %8943 = vmatpush2.bf16.msra.mxu0 %v14238_v16 }
 0x4a6   :  { %8976 = vmatpush2.bf16.msra.mxu1 %v14274_v21  ;;  %9002 = vmatprep.subr.bf16.mxu0 %v14321_v20 }
 0x4a7   :  { %8977 = vmatprep.subr.bf16.mxu1 %v14279_v48 }
 0x4aa   :  { %8978 = vmatpush2.bf16.msra.mxu1 %v14277_v0 }
 0x4ab   :  { %8979 = vmatprep.subr.bf16.mxu1 %v14282_v6 }
 0x4ae   :  { %8980 = vmatpush2.bf16.msra.mxu1 %v14280_v25 }
 0x4af   :  { %8981 = vmatprep.subr.bf16.mxu1 %v14285_v54 }
 0x4b1   :  { %v8052_v5 = vpop.f32.mrf.mxu1 }
 0x4b2   :  { %v8053_v19 = vadd.f32 %v8052_v5, %v8012_v2  ;;  %8982 = vmatpush2.bf16.msra.mxu1 %v14283_v59 }
 0x4b3   :  { %v8054_v63 = vpop.f32.mrf.mxu1  ;;  %8983 = vmatprep.subr.bf16.mxu1 %v14288_v7 }
 0x4b4   :  { %v8094_v50 = vadd.f32 %v15251_v46, %v8053_v19  ;;  %v8055_v17 = vadd.f32 %v8054_v63, %v8014_v18  ;;  %v8451_v18 = vsub.s32 2, %v15255_v60  ;;  %v8455_v63 = vsub.s32 3, %v15255_v60 }
 0x4b5   :  { %v8056_v42 = vpop.f32.mrf.mxu1 }
 0x4b6   :  { %v8429_v58 = vmax.f32 %v15194_v22, %v8094_v50  ;;  %v8096_v26 = vadd.f32 %v15253_v52, %v8055_v17  ;;  %8984 = vmatpush2.bf16.msra.mxu1 %v14286_v47  ;;  %v8448_v22 = vrot.slane %v15263_v56, %v8447_v28  ;;  %v8452_v42 = vrot.slane %v15263_v56, %v8451_v18 }
 0x4b7   :  { %v8057_v34 = vpop.f32.mrf.mxu1  ;;  %9468 = vmatprep.subr.bf16.mxu1 %v14291_v38 }
 0x4b8   :  { %v8434_v46 = vmax.f32 %v8424_v36, %v8429_v58  ;;  %v8430_v51 = vmax.f32 %v15199_v27, %v8096_v26  ;;  %v14325_v36 = vld [vmem:[#allocation6 + $0x220] ss:$8 sps:$4 sm:$0xff]  }
 0x4ba   :  { %v8435_v52 = vmax.f32 %v8425_v49, %v8430_v51  ;;  %v8466_v30 = vadd.f32 %v8444_v29, %v8434_v46  ;;  %v14331_v49 = vld [vmem:[#allocation6 + $0x210] ss:$8 sps:$4 sm:$0xff]   ;;  %v8456_v29 = vrot.slane %v15263_v56, %v8455_v63 }
 0x4bc   :  { %v8467_v31 = vadd.f32 %v8448_v22, %v8435_v52  ;;  %v15283_v15 = vpack.c.bf16 %v8466_v30, %v8466_v30  ;;  %v14294_v30 = vld [vmem:[#allocation6 + $0x2a4] ss:$8 sps:$4 sm:$0xff]  }
 0x4be   :  { %v15281_v45 = vpack.c.bf16 %v8467_v31, %v8467_v31  ;;  %v14303_v31 = vld [vmem:[#allocation6 + $0x274] ss:$8 sps:$4 sm:$0xff]  }
 0x4c0   :  { %8944 = vmatprep.mubr.bf16.mxu0 %v15281_v45  ;;  %v8134_v1 = vpop.f32.mrf.mxu0 }
 0x4c1   :  { %8945 = vmatmul.mubr.bf16.vlgmr.msra.gmra.mxu0 %v15283_v15 }
 0x4c2   :  { %9003 = vmatpush1.bf16.msra.mxu0 %v14319_v62  ;;  %9026 = vmatprep.mubr.bf16.mxu0 %v14886_v13  ;;  %v8136_v27 = vpop.f32.mrf.mxu0 }
 0x4c3   :  { %9004 = vmatprep.subr.bf16.mxu0 %v14327_v3  ;;  %v14301_v3 = vld [vmem:[#allocation6 + $0x270] ss:$8 sps:$4 sm:$0xff]  }
 0x4c4   :  { %v8138_v32 = vpop.f32.mrf.mxu0 }
 0x4c6   :  { %9005 = vmatpush1.bf16.msra.mxu0 %v14325_v36  ;;  %v8139_v35 = vpop.f32.mrf.mxu0  ;;  %v14306_v36 = vld [vmem:[#allocation6 + $0x264] ss:$8 sps:$4 sm:$0xff]  }
 0x4c7   :  { %9006 = vmatprep.subr.bf16.mxu0 %v14333_v9  ;;  %v14304_v9 = vld [vmem:[#allocation6 + $0x260] ss:$8 sps:$4 sm:$0xff]  }
 0x4ca   :  { %9007 = vmatpush1.bf16.msra.mxu0 %v14331_v49  ;;  %v14309_v49 = vld [vmem:[#allocation6 + $0x254] ss:$8 sps:$4 sm:$0xff]  }
 0x4cb   :  { %9008 = vmatprep.subr.bf16.mxu0 %v14339_v37  ;;  %v14307_v37 = vld [vmem:[#allocation6 + $0x250] ss:$8 sps:$4 sm:$0xff]  }
 0x4ce   :  { %9009 = vmatpush1.bf16.msra.mxu0 %v14337_v40  ;;  %v14312_v40 = vld [vmem:[#allocation6 + $0x244] ss:$8 sps:$4 sm:$0xff]  }
 0x4cf   :  { %9509 = vmatprep.subr.bf16.mxu0 %v14345_v43 }
 0x4f1   :  { %v8175_v44 = vpop.f32.mrf.mxu1 }
 0x4f2   :  { %v8176_v54 = vadd.f32 %v8175_v44, %v8134_v1 }
 0x4f3   :  { %v8177_v16 = vpop.f32.mrf.mxu1 }
 0x4f4   :  { %v8178_v7 = vadd.f32 %v8177_v16, %v8136_v27  ;;  %v14310_v16 = vld [vmem:[#allocation6 + $0x240] ss:$8 sps:$4 sm:$0xff]  }
 0x4f5   :  { %v8179_v21 = vpop.f32.mrf.mxu1 }
 0x4f6   :  { %v14315_v21 = vld [vmem:[#allocation6 + $0x334] ss:$8 sps:$4 sm:$0xff]  }
 0x4f7   :  { %v8180_v48 = vpop.f32.mrf.mxu1 }
 0x4f9   :  { %v8257_v0 = vpop.f32.mrf.mxu1 }
 0x4fb   :  { %v8259_v6 = vpop.f32.mrf.mxu1 }
 0x4fd   :  { %v8261_v25 = vpop.f32.mrf.mxu1 }
 0x4fe   :  { %v14318_v25 = vld [vmem:[#allocation6 + $0x324] ss:$8 sps:$4 sm:$0xff]  }
 0x4ff   :  { %v8262_v33 = vpop.f32.mrf.mxu1 }
 0x500   :  { %v8216_v59 = vpop.f32.mrf.mxu0 }
 0x501   :  { %v8217_v2 = vadd.f32 %v8216_v59, %v8176_v54  ;;  %v14316_v54 = vld [vmem:[#allocation6 + $0x320] ss:$8 sps:$4 sm:$0xff]   ;;  %v14324_v59 = vld [vmem:[#allocation6 + $0x314] ss:$8 sps:$4 sm:$0xff]  }
 0x502   :  { %v8218_v5 = vpop.f32.mrf.mxu0 }
 0x503   :  { %v8258_v19 = vadd.f32 %v8257_v0, %v8217_v2  ;;  %v8219_v47 = vadd.f32 %v8218_v5, %v8178_v7  ;;  %v14322_v7 = vld [vmem:[#allocation6 + $0x310] ss:$8 sps:$4 sm:$0xff]   ;;  %v14330_v2 = vld [vmem:[#allocation6 + $0x304] ss:$8 sps:$4 sm:$0xff]  }
 0x504   :  { %v8220_v38 = vpop.f32.mrf.mxu0 }
 0x505   :  { %v8431_v50 = vmax.f32 %v15216_v4, %v8258_v19  ;;  %v8260_v17 = vadd.f32 %v8259_v6, %v8219_v47  ;;  %v14289_v4 = vld [vmem:[#allocation6 + $0x2b0] ss:$8 sps:$4 sm:$0xff]   ;;  %v14328_v47 = vld [vmem:[#allocation6 + $0x300] ss:$8 sps:$4 sm:$0xff]   ;;  %v14336_v38 = vld [vmem:[#allocation6 + $0x2f4] ss:$8 sps:$4 sm:$0xff]  }
 0x506   :  { %v8221_v58 = vpop.f32.mrf.mxu0  ;;  %v14313_v6 = vld [vmem:[#allocation6 + $0x330] ss:$8 sps:$4 sm:$0xff]  }
 0x507   :  { %v8436_v26 = vmax.f32 %v8426_v53, %v8431_v50  ;;  %v8432_v34 = vmax.f32 %v15218_v39, %v8260_v17  ;;  %v14300_v53 = vld [vmem:[#allocation6 + $0x284] ss:$8 sps:$4 sm:$0xff]  }
 0x509   :  { %v8437_v20 = vmax.f32 %v8427_v23, %v8432_v34  ;;  %v8468_v46 = vadd.f32 %v8452_v42, %v8436_v26  ;;  %v14298_v23 = vld [vmem:[#allocation6 + $0x280] ss:$8 sps:$4 sm:$0xff]   ;;  %v8459_v26 = vsub.s32 4, %v15255_v60  ;;  %v14334_v34 = vld [vmem:[#allocation6 + $0x2f0] ss:$8 sps:$4 sm:$0xff]  }
 0x50a   :  { %v14648_v60 = vld [vmem:[#allocation12] sm:$0xff]  }
 0x50b   :  { %v8469_v51 = vadd.f32 %v8456_v29, %v8437_v20  ;;  %v15302_v52 = vpack.c.bf16 %v8468_v46, %v8468_v46  ;;  %v14342_v20 = vld [vmem:[#allocation6 + $0x2e4] ss:$8 sps:$4 sm:$0xff]  }
 0x50d   :  { %v15300_v22 = vpack.c.bf16 %v8469_v51, %v8469_v51 }
 0x50f   :  { %8985 = vmatprep.mubr.bf16.mxu1 %v15300_v22 }
 0x510   :  { %8986 = vmatmul.mubr.bf16.vlgmr.msra.gmra.mxu1 %v15302_v52 }
 0x511   :  { %9469 = vmatpush1.bf16.msra.mxu1 %v14289_v4  ;;  %9500 = vmatprep.mubr.bf16.mxu1 %v15281_v45  ;;  %v8460_v4 = vrot.slane %v15263_v56, %v8459_v26  ;;  %v14352_v56 = vld [vmem:[#allocation6 + $0x2c0] ss:$8 sps:$4 sm:$0xff]   ;;  %v14411_v26 = vld [vmem:[#allocation6 + $0x404] ss:$8 sps:$4 sm:$0xff]  }
 0x512   :  { %9470 = vmatprep.subr.bf16.mxu1 %v14294_v30  ;;  %v14340_v30 = vld [vmem:[#allocation6 + $0x2e0] ss:$8 sps:$4 sm:$0xff]  }
 0x515   :  { %9471 = vmatpush1.bf16.msra.mxu1 %v14292_v55  ;;  %v14348_v55 = vld [vmem:[#allocation6 + $0x2d4] ss:$8 sps:$4 sm:$0xff]  }
 0x516   :  { %9472 = vmatprep.subr.bf16.mxu1 %v14297_v41 }
 0x519   :  { %v12651_v57 = vpop.f32.mrf.mxu1  ;;  %9473 = vmatpush1.bf16.msra.mxu1 %v14295_v61 }
 0x51a   :  { %9474 = vmatprep.subr.bf16.mxu1 %v14300_v53  ;;  %v14346_v53 = vld [vmem:[#allocation6 + $0x2d0] ss:$8 sps:$4 sm:$0xff]  }
 0x51b   :  { %v12652_v39 = vpop.f32.mrf.mxu1 }
 0x51c   :  { %v12653_v19 = vadd.f32 %v12652_v39, %v12651_v57  ;;  %v14343_v57 = vld [vmem:[#allocation6 + $0x3b0] ss:$8 sps:$4 sm:$0xff]   ;;  %v14351_v39 = vld [vmem:[#allocation6 + $0x3a4] ss:$8 sps:$4 sm:$0xff]  }
 0x51d   :  { %v12654_v62 = vpop.f32.mrf.mxu1  ;;  %9475 = vmatpush1.bf16.msra.mxu1 %v14298_v23 }
 0x51e   :  { %9476 = vmatprep.subr.bf16.mxu1 %v14303_v31  ;;  %v14358_v31 = vld [vmem:[#allocation6 + $0x470] ss:$8 sps:$4 sm:$0xff]  }
 0x51f   :  { %v12655_v1 = vpop.f32.mrf.mxu1  ;;  %v14355_v62 = vld [vmem:[#allocation6 + $0x390] ss:$8 sps:$4 sm:$0xff]  }
 0x520   :  { %v12673_v27 = vpop.f32.mrf.mxu0  ;;  %v14363_v1 = vld [vmem:[#allocation6 + $0x384] ss:$8 sps:$4 sm:$0xff]  }
 0x521   :  { %9477 = vmatpush1.bf16.msra.mxu1 %v14301_v3  ;;  %v14366_v3 = vld [vmem:[#allocation6 + $0x464] ss:$8 sps:$4 sm:$0xff]  }
 0x522   :  { %v12674_v32 = vpop.f32.mrf.mxu0  ;;  %9478 = vmatprep.subr.bf16.mxu1 %v14306_v36  ;;  %v14364_v36 = vld [vmem:[#allocation6 + $0x460] ss:$8 sps:$4 sm:$0xff]  }
 0x523   :  { %v12675_v5 = vadd.f32 %v12674_v32, %v12673_v27  ;;  %v14361_v27 = vld [vmem:[#allocation6 + $0x380] ss:$8 sps:$4 sm:$0xff]   ;;  %v14369_v32 = vld [vmem:[#allocation6 + $0x374] ss:$8 sps:$4 sm:$0xff]  }
 0x524   :  { %v12676_v35 = vpop.f32.mrf.mxu0 }
 0x525   :  { %9479 = vmatpush1.bf16.msra.mxu1 %v14304_v9  ;;  %v8339_v50 = vadd.f32 %v12675_v5, %v12653_v19  ;;  %v14372_v9 = vld [vmem:[#allocation6 + $0x454] ss:$8 sps:$4 sm:$0xff]   ;;  %v14367_v35 = vld [vmem:[#allocation6 + $0x370] ss:$8 sps:$4 sm:$0xff]   ;;  %v14399_v19 = vld [vmem:[#allocation6 + $0x424] ss:$8 sps:$4 sm:$0xff]  }
 0x526   :  { %9480 = vmatprep.subr.bf16.mxu1 %v14309_v49  ;;  %v12677_v43 = vpop.f32.mrf.mxu0  ;;  %v14370_v49 = vld [vmem:[#allocation6 + $0x450] ss:$8 sps:$4 sm:$0xff]  }
 0x527   :  { %v14376_v43 = vld [vmem:[#allocation6 + $0x440] ss:$8 sps:$4 sm:$0xff]   ;;  %v14391_v5 = vld [vmem:[#allocation6 + $0x430] ss:$8 sps:$4 sm:$0xff]  }
 0x528   :  { %v8418_v44 = vpop.f32.mrf.mxu0 }
 0x529   :  { %9481 = vmatpush1.bf16.msra.mxu1 %v14307_v37  ;;  %v14378_v37 = vld [vmem:[#allocation6 + $0x444] ss:$8 sps:$4 sm:$0xff]  }
 0x52a   :  { %9482 = vmatprep.subr.bf16.mxu1 %v14312_v40  ;;  %v12761_v48 = vpop.f32.mrf.mxu0  ;;  %v14375_v40 = vld [vmem:[#allocation6 + $0x364] ss:$8 sps:$4 sm:$0xff]  }
 0x52b   :  { %v14382_v48 = vld [vmem:[#allocation6 + $0x5f0] ss:$8 sps:$4 sm:$0xff]  }
 0x52c   :  { %v8421_v0 = vpop.f32.mrf.mxu0 }
 0x52d   :  { %9483 = vmatpush1.bf16.msra.mxu1 %v14310_v16  ;;  %v14384_v16 = vld [vmem:[#allocation6 + $0x5f4] ss:$8 sps:$4 sm:$0xff]   ;;  %v14379_v0 = vld [vmem:[#allocation6 + $0x350] ss:$8 sps:$4 sm:$0xff]  }
 0x52e   :  { %9484 = vmatprep.subr.bf16.mxu1 %v14315_v21  ;;  %v12762_v33 = vpop.f32.mrf.mxu0  ;;  %v14381_v21 = vld [vmem:[#allocation6 + $0x354] ss:$8 sps:$4 sm:$0xff]  }
 0x52f   :  { %v14388_v33 = vld [vmem:[#allocation6 + $0x5e0] ss:$8 sps:$4 sm:$0xff]  }
 0x531   :  { %9485 = vmatpush2.bf16.msra.mxu1 %v14313_v6  ;;  %v14390_v6 = vld [vmem:[#allocation6 + $0x5e4] ss:$8 sps:$4 sm:$0xff]  }
 0x532   :  { %9486 = vmatprep.subr.bf16.mxu1 %v14318_v25  ;;  %v14387_v25 = vld [vmem:[#allocation6 + $0x344] ss:$8 sps:$4 sm:$0xff]  }
 0x535   :  { %9487 = vmatpush2.bf16.msra.mxu1 %v14316_v54  ;;  %v14385_v54 = vld [vmem:[#allocation6 + $0x340] ss:$8 sps:$4 sm:$0xff]  }
 0x536   :  { %9488 = vmatprep.subr.bf16.mxu1 %v14324_v59  ;;  %v14396_v59 = vld [vmem:[#allocation6 + $0x5d4] ss:$8 sps:$4 sm:$0xff]  }
 0x539   :  { %v12695_v18 = vpop.f32.mrf.mxu1  ;;  %9489 = vmatpush2.bf16.msra.mxu1 %v14322_v7  ;;  %v14393_v7 = vld [vmem:[#allocation6 + $0x434] ss:$8 sps:$4 sm:$0xff]  }
 0x53a   :  { %9490 = vmatprep.subr.bf16.mxu1 %v14330_v2  ;;  %v14394_v2 = vld [vmem:[#allocation6 + $0x5d0] ss:$8 sps:$4 sm:$0xff]  }
 0x53b   :  { %v12696_v63 = vpop.f32.mrf.mxu1 }
 0x53c   :  { %v12697_v17 = vadd.f32 %v12696_v63, %v12695_v18  ;;  %v14402_v18 = vld [vmem:[#allocation6 + $0x5c4] ss:$8 sps:$4 sm:$0xff]   ;;  %v14397_v63 = vld [vmem:[#allocation6 + $0x420] ss:$8 sps:$4 sm:$0xff]  }
 0x53d   :  { %v12698_v42 = vpop.f32.mrf.mxu1  ;;  %9491 = vmatpush2.bf16.msra.mxu1 %v14328_v47  ;;  %v14400_v47 = vld [vmem:[#allocation6 + $0x5c0] ss:$8 sps:$4 sm:$0xff]  }
 0x53e   :  { %v8379_v58 = vadd.f32 %v12697_v17, %v8339_v50  ;;  %9492 = vmatprep.subr.bf16.mxu1 %v14336_v38  ;;  %v14408_v38 = vld [vmem:[#allocation6 + $0x5b4] ss:$8 sps:$4 sm:$0xff]   ;;  %v14406_v17 = vld [vmem:[#allocation6 + $0x5b0] ss:$8 sps:$4 sm:$0xff]  }
 0x53f   :  { %v12699_v29 = vpop.f32.mrf.mxu1  ;;  %v14405_v50 = vld [vmem:[#allocation6 + $0x414] ss:$8 sps:$4 sm:$0xff]   ;;  %v14403_v42 = vld [vmem:[#allocation6 + $0x410] ss:$8 sps:$4 sm:$0xff]  }
 0x540   :  { %v8419_v46 = vadd.f32 %v8418_v44, %v8379_v58  ;;  %v14373_v44 = vld [vmem:[#allocation6 + $0x360] ss:$8 sps:$4 sm:$0xff]   ;;  %v14414_v58 = vld [vmem:[#allocation6 + $0x5a4] ss:$8 sps:$4 sm:$0xff]  }
 0x541   :  { %9493 = vmatpush2.bf16.msra.mxu1 %v14334_v34  ;;  %v14412_v34 = vld [vmem:[#allocation6 + $0x5a0] ss:$8 sps:$4 sm:$0xff]  }
 0x542   :  { %v8433_v51 = vmax.f32 %v15230_v11, %v8419_v46  ;;  %9494 = vmatprep.subr.bf16.mxu1 %v14342_v20  ;;  %v14354_v11 = vld [vmem:[#allocation6 + $0x2c4] ss:$8 sps:$4 sm:$0xff]   ;;  %v14409_v29 = vld [vmem:[#allocation6 + $0x400] ss:$8 sps:$4 sm:$0xff]   ;;  %v14420_v20 = vld [vmem:[#allocation6 + $0x594] ss:$8 sps:$4 sm:$0xff]  }
 0x543   :  { %v14417_v46 = vld [vmem:[#allocation6 + $0x3f4] ss:$8 sps:$4 sm:$0xff]  }
 0x544   :  { %v8438_v41 = vmax.f32 %v8428_v14, %v8433_v51  ;;  %v14357_v14 = vld [vmem:[#allocation6 + $0x394] ss:$8 sps:$4 sm:$0xff]   ;;  %v14418_v51 = vld [vmem:[#allocation6 + $0x590] ss:$8 sps:$4 sm:$0xff]  }
 0x545   :  { %9495 = vmatpush2.bf16.msra.mxu1 %v14340_v30  ;;  %v14426_v30 = vld [vmem:[#allocation6 + $0x584] ss:$8 sps:$4 sm:$0xff]  }
 0x546   :  { %v8470_v61 = vadd.f32 %v8460_v4, %v8438_v41  ;;  %9496 = vmatprep.subr.bf16.mxu1 %v14348_v55  ;;  %v14415_v4 = vld [vmem:[#allocation6 + $0x3f0] ss:$8 sps:$4 sm:$0xff]   ;;  %v14423_v55 = vld [vmem:[#allocation6 + $0x3e4] ss:$8 sps:$4 sm:$0xff]   ;;  %v14424_v41 = vld [vmem:[#allocation6 + $0x580] ss:$8 sps:$4 sm:$0xff]  }
 0x548   :  { %v15313_v23 = vpack.c.bf16 %v8470_v61, %v8470_v61  ;;  %v14421_v61 = vld [vmem:[#allocation6 + $0x3e0] ss:$8 sps:$4 sm:$0xff]  }
 0x549   :  { %9497 = vmatpush2.bf16.msra.mxu1 %v14346_v53  ;;  %v14432_v53 = vld [vmem:[#allocation6 + $0x674] ss:$8 sps:$4 sm:$0xff]  }
 0x54a   :  { %12179 = vmatmul.mubr.msk.bf16.vlgmr.msra.gmra.mxu0 %vm8908_vm2, %v15313_v23  ;;  %9498 = vmatprep.subr.bf16.mxu1 %v14354_v11  ;;  %v14427_v11 = vld [vmem:[#allocation6 + $0x3d0] ss:$8 sps:$4 sm:$0xff]  }
 0x54b   :  { %9510 = vmatpush1.bf16.msra.mxu0 %v14343_v57  ;;  %9541 = vmatprep.mubr.bf16.mxu0 %v15300_v22  ;;  %v14429_v57 = vld [vmem:[#allocation6 + $0x3d4] ss:$8 sps:$4 sm:$0xff]  }
 0x54c   :  { %9511 = vmatprep.subr.bf16.mxu0 %v14351_v39  ;;  %v14430_v39 = vld [vmem:[#allocation6 + $0x670] ss:$8 sps:$4 sm:$0xff]  }
 0x54d   :  { %9499 = vmatpush2.bf16.msra.mxu1 %v14352_v56  ;;  %v14438_v56 = vld [vmem:[#allocation6 + $0x664] ss:$8 sps:$4 sm:$0xff]  }
 0x54e   :  { %9558 = vmatprep.subr.bf16.mxu1 %v14360_v10 }
 0x54f   :  { %9512 = vmatpush1.bf16.msra.mxu0 %v14349_v24  ;;  %v14435_v24 = vld [vmem:[#allocation6 + $0x3c4] ss:$8 sps:$4 sm:$0xff]  }
 0x550   :  { %9513 = vmatprep.subr.bf16.mxu0 %v14357_v14  ;;  %9501 = vmatmul.mubr.bf16.vlgmr.msra.gmra.mxu1 %v15283_v15  ;;  %v14436_v14 = vld [vmem:[#allocation6 + $0x660] ss:$8 sps:$4 sm:$0xff]  }
 0x551   :  { %9559 = vmatpush1.bf16.msra.mxu1 %v14358_v31  ;;  %9582 = vmatprep.mubr.bf16.mxu1 %v14886_v13 }
 0x552   :  { %9560 = vmatprep.subr.bf16.mxu1 %v14366_v3  ;;  %v14444_v3 = vld [vmem:[#allocation6 + $0x654] ss:$8 sps:$4 sm:$0xff]  }
 0x553   :  { %9514 = vmatpush1.bf16.msra.mxu0 %v14355_v62  ;;  %v14433_v62 = vld [vmem:[#allocation6 + $0x3c0] ss:$8 sps:$4 sm:$0xff]  }
 0x554   :  { %9515 = vmatprep.subr.bf16.mxu0 %v14363_v1  ;;  %v14441_v1 = vld [vmem:[#allocation6 + $0x4f4] ss:$8 sps:$4 sm:$0xff]  }
 0x555   :  { %9561 = vmatpush1.bf16.msra.mxu1 %v14364_v36 }
 0x556   :  { %9562 = vmatprep.subr.bf16.mxu1 %v14372_v9 }
 0x557   :  { %9516 = vmatpush1.bf16.msra.mxu0 %v14361_v27  ;;  %v14442_v27 = vld [vmem:[#allocation6 + $0x650] ss:$8 sps:$4 sm:$0xff]  }
 0x558   :  { %9517 = vmatprep.subr.bf16.mxu0 %v14369_v32  ;;  %v14439_v32 = vld [vmem:[#allocation6 + $0x4f0] ss:$8 sps:$4 sm:$0xff]  }
 0x559   :  { %9563 = vmatpush1.bf16.msra.mxu1 %v14370_v49  ;;  %v14447_v49 = vld [vmem:[#allocation6 + $0x4e4] ss:$8 sps:$4 sm:$0xff]  }
 0x55a   :  { %9564 = vmatprep.subr.bf16.mxu1 %v14378_v37  ;;  %v14448_v37 = vld [vmem:[#allocation6 + $0x640] ss:$8 sps:$4 sm:$0xff]  }
 0x55b   :  { %9518 = vmatpush1.bf16.msra.mxu0 %v14367_v35  ;;  %v14450_v35 = vld [vmem:[#allocation6 + $0x644] ss:$8 sps:$4 sm:$0xff]  }
 0x55c   :  { %9519 = vmatprep.subr.bf16.mxu0 %v14375_v40  ;;  %v14445_v40 = vld [vmem:[#allocation6 + $0x4e0] ss:$8 sps:$4 sm:$0xff]  }
 0x55d   :  { %9565 = vmatpush1.bf16.msra.mxu1 %v14376_v43  ;;  %v14456_v43 = vld [vmem:[#allocation6 + $0x634] ss:$8 sps:$4 sm:$0xff]  }
 0x55e   :  { %10065 = vmatprep.subr.bf16.mxu1 %v14384_v16  ;;  %v14454_v16 = vld [vmem:[#allocation6 + $0x630] ss:$8 sps:$4 sm:$0xff]  }
 0x55f   :  { %9520 = vmatpush1.bf16.msra.mxu0 %v14373_v44  ;;  %v14453_v44 = vld [vmem:[#allocation6 + $0x4d4] ss:$8 sps:$4 sm:$0xff]  }
 0x560   :  { %9521 = vmatprep.subr.bf16.mxu0 %v14381_v21  ;;  %12252 = vmatmul.mubr.msk.bf16.vlgmr.msra.gmra.mxu1 %vm8908_vm2, %v15313_v23  ;;  %v14451_v21 = vld [vmem:[#allocation6 + $0x4d0] ss:$8 sps:$4 sm:$0xff]  }
 0x561   :  { %10066 = vmatpush1.bf16.msra.mxu1 %v14382_v48  ;;  %10097 = vmatprep.mubr.bf16.mxu1 %v15300_v22  ;;  %v14462_v48 = vld [vmem:[#allocation6 + $0x624] ss:$8 sps:$4 sm:$0xff]  }
 0x562   :  { %10067 = vmatprep.subr.bf16.mxu1 %v14390_v6  ;;  %v14460_v6 = vld [vmem:[#allocation6 + $0x620] ss:$8 sps:$4 sm:$0xff]  }
 0x563   :  { %9522 = vmatpush1.bf16.msra.mxu0 %v14379_v0  ;;  %v14459_v0 = vld [vmem:[#allocation6 + $0x4c4] ss:$8 sps:$4 sm:$0xff]  }
 0x564   :  { %9523 = vmatprep.subr.bf16.mxu0 %v14387_v25  ;;  %v14457_v25 = vld [vmem:[#allocation6 + $0x4c0] ss:$8 sps:$4 sm:$0xff]  }
 0x565   :  { %10068 = vmatpush1.bf16.msra.mxu1 %v14388_v33  ;;  %v14468_v33 = vld [vmem:[#allocation6 + $0x614] ss:$8 sps:$4 sm:$0xff]  }
 0x566   :  { %10069 = vmatprep.subr.bf16.mxu1 %v14396_v59  ;;  %v14466_v59 = vld [vmem:[#allocation6 + $0x610] ss:$8 sps:$4 sm:$0xff]  }
 0x567   :  { %9524 = vmatpush1.bf16.msra.mxu0 %v14385_v54  ;;  %v14465_v54 = vld [vmem:[#allocation6 + $0x4b4] ss:$8 sps:$4 sm:$0xff]  }
 0x568   :  { %9525 = vmatprep.subr.bf16.mxu0 %v14393_v7  ;;  %v14463_v7 = vld [vmem:[#allocation6 + $0x4b0] ss:$8 sps:$4 sm:$0xff]  }
 0x569   :  { %10070 = vmatpush1.bf16.msra.mxu1 %v14394_v2  ;;  %v14474_v2 = vld [vmem:[#allocation6 + $0x604] ss:$8 sps:$4 sm:$0xff]  }
 0x56a   :  { %10071 = vmatprep.subr.bf16.mxu1 %v14402_v18  ;;  %v14472_v18 = vld [vmem:[#allocation6 + $0x600] ss:$8 sps:$4 sm:$0xff]  }
 0x56b   :  { %9526 = vmatpush2.bf16.msra.mxu0 %v14391_v5  ;;  %v14471_v5 = vld [vmem:[#allocation6 + $0x4a4] ss:$8 sps:$4 sm:$0xff]  }
 0x56c   :  { %9527 = vmatprep.subr.bf16.mxu0 %v14399_v19  ;;  %v14469_v19 = vld [vmem:[#allocation6 + $0x4a0] ss:$8 sps:$4 sm:$0xff]  }
 0x56d   :  { %10072 = vmatpush1.bf16.msra.mxu1 %v14400_v47  ;;  %v14480_v47 = vld [vmem:[#allocation6 + $0x734] ss:$8 sps:$4 sm:$0xff]  }
 0x56e   :  { %10073 = vmatprep.subr.bf16.mxu1 %v14408_v38  ;;  %v14478_v38 = vld [vmem:[#allocation6 + $0x730] ss:$8 sps:$4 sm:$0xff]  }
 0x56f   :  { %9528 = vmatpush2.bf16.msra.mxu0 %v14397_v63  ;;  %v14477_v63 = vld [vmem:[#allocation6 + $0x494] ss:$8 sps:$4 sm:$0xff]  }
 0x570   :  { %9529 = vmatprep.subr.bf16.mxu0 %v14405_v50  ;;  %v14475_v50 = vld [vmem:[#allocation6 + $0x490] ss:$8 sps:$4 sm:$0xff]  }
 0x571   :  { %10074 = vmatpush1.bf16.msra.mxu1 %v14406_v17  ;;  %v14486_v17 = vld [vmem:[#allocation6 + $0x724] ss:$8 sps:$4 sm:$0xff]  }
 0x572   :  { %10075 = vmatprep.subr.bf16.mxu1 %v14414_v58  ;;  %v14484_v58 = vld [vmem:[#allocation6 + $0x720] ss:$8 sps:$4 sm:$0xff]  }
 0x573   :  { %9530 = vmatpush2.bf16.msra.mxu0 %v14403_v42  ;;  %v14483_v42 = vld [vmem:[#allocation6 + $0x484] ss:$8 sps:$4 sm:$0xff]  }
 0x574   :  { %9531 = vmatprep.subr.bf16.mxu0 %v14411_v26  ;;  %v14481_v26 = vld [vmem:[#allocation6 + $0x480] ss:$8 sps:$4 sm:$0xff]  }
 0x575   :  { %10076 = vmatpush1.bf16.msra.mxu1 %v14412_v34  ;;  %v14492_v34 = vld [vmem:[#allocation6 + $0x714] ss:$8 sps:$4 sm:$0xff]  }
 0x576   :  { %10077 = vmatprep.subr.bf16.mxu1 %v14420_v20  ;;  %v14490_v20 = vld [vmem:[#allocation6 + $0x710] ss:$8 sps:$4 sm:$0xff]  }
 0x577   :  { %9532 = vmatpush2.bf16.msra.mxu0 %v14409_v29  ;;  %v14489_v29 = vld [vmem:[#allocation6 + $0x574] ss:$8 sps:$4 sm:$0xff]  }
 0x578   :  { %9533 = vmatprep.subr.bf16.mxu0 %v14417_v46  ;;  %v14487_v46 = vld [vmem:[#allocation6 + $0x570] ss:$8 sps:$4 sm:$0xff]  }
 0x579   :  { %10078 = vmatpush1.bf16.msra.mxu1 %v14418_v51  ;;  %v14498_v51 = vld [vmem:[#allocation6 + $0x704] ss:$8 sps:$4 sm:$0xff]  }
 0x57a   :  { %10079 = vmatprep.subr.bf16.mxu1 %v14426_v30  ;;  %v14496_v30 = vld [vmem:[#allocation6 + $0x700] ss:$8 sps:$4 sm:$0xff]  }
 0x57b   :  { %9534 = vmatpush2.bf16.msra.mxu0 %v14415_v4  ;;  %v14495_v4 = vld [vmem:[#allocation6 + $0x564] ss:$8 sps:$4 sm:$0xff]  }
 0x57c   :  { %9535 = vmatprep.subr.bf16.mxu0 %v14423_v55  ;;  %v14493_v55 = vld [vmem:[#allocation6 + $0x560] ss:$8 sps:$4 sm:$0xff]  }
 0x57d   :  { %10080 = vmatpush1.bf16.msra.mxu1 %v14424_v41  ;;  %v14501_v41 = vld [vmem:[#allocation6 + $0x554] ss:$8 sps:$4 sm:$0xff]  }
 0x57e   :  { %10081 = vmatprep.subr.bf16.mxu1 %v14432_v53  ;;  %v14499_v53 = vld [vmem:[#allocation6 + $0x550] ss:$8 sps:$4 sm:$0xff]  }
 0x57f   :  { %9536 = vmatpush2.bf16.msra.mxu0 %v14421_v61  ;;  %v14502_v61 = vld [vmem:[#allocation6 + $0x6f0] ss:$8 sps:$4 sm:$0xff]  }
 0x580   :  { %9537 = vmatprep.subr.bf16.mxu0 %v14429_v57  ;;  %v14510_v57 = vld [vmem:[#allocation6 + $0x6e4] ss:$8 sps:$4 sm:$0xff]  }
 0x581   :  { %v15323_v10 = vpop.f32.mrf.mxu0  ;;  %10082 = vmatpush2.bf16.msra.mxu1 %v14430_v39  ;;  %v14507_v39 = vld [vmem:[#allocation6 + $0x544] ss:$8 sps:$4 sm:$0xff]  }
 0x582   :  { %10083 = vmatprep.subr.bf16.mxu1 %v14438_v56  ;;  %v14505_v56 = vld [vmem:[#allocation6 + $0x540] ss:$8 sps:$4 sm:$0xff]  }
 0x583   :  { %9538 = vmatpush2.bf16.msra.mxu0 %v14427_v11  ;;  %v15325_v31 = vpop.f32.mrf.mxu0  ;;  %v14508_v11 = vld [vmem:[#allocation6 + $0x6e0] ss:$8 sps:$4 sm:$0xff]  }
 0x584   :  { %9539 = vmatprep.subr.bf16.mxu0 %v14435_v24  ;;  %v14516_v24 = vld [vmem:[#allocation6 + $0x6d4] ss:$8 sps:$4 sm:$0xff]  }
 0x585   :  { %v8950_v36 = vpop.f32.mrf.mxu0  ;;  %10084 = vmatpush2.bf16.msra.mxu1 %v14436_v14  ;;  %v14513_v14 = vld [vmem:[#allocation6 + $0x534] ss:$8 sps:$4 sm:$0xff]  }
 0x586   :  { %10085 = vmatprep.subr.bf16.mxu1 %v14444_v3  ;;  %v14511_v3 = vld [vmem:[#allocation6 + $0x530] ss:$8 sps:$4 sm:$0xff]   ;;  %v14519_v36 = vld [vmem:[#allocation6 + $0x524] ss:$8 sps:$4 sm:$0xff]  }
 0x587   :  { %9540 = vmatpush2.bf16.msra.mxu0 %v14433_v62  ;;  %v8951_v9 = vpop.f32.mrf.mxu0  ;;  %v14514_v62 = vld [vmem:[#allocation6 + $0x6d0] ss:$8 sps:$4 sm:$0xff]  }
 0x588   :  { %10024 = vmatprep.subr.bf16.mxu0 %v14441_v1  ;;  %v14522_v1 = vld [vmem:[#allocation6 + $0x6c4] ss:$8 sps:$4 sm:$0xff]   ;;  %v14517_v9 = vld [vmem:[#allocation6 + $0x520] ss:$8 sps:$4 sm:$0xff]  }
 0x589   :  { %10086 = vmatpush2.bf16.msra.mxu1 %v14442_v27  ;;  %v14520_v27 = vld [vmem:[#allocation6 + $0x6c0] ss:$8 sps:$4 sm:$0xff]  }
 0x58a   :  { %9542 = vmatmul.mubr.bf16.vlgmr.msra.gmra.mxu0 %v15302_v52  ;;  %10087 = vmatprep.subr.bf16.mxu1 %v14450_v35  ;;  %v14526_v35 = vld [vmem:[#allocation6 + $0x7b0] ss:$8 sps:$4 sm:$0xff]  }
 0x58b   :  { %10025 = vmatpush1.bf16.msra.mxu0 %v14439_v32  ;;  %10056 = vmatprep.mubr.bf16.mxu0 %v15281_v45  ;;  %v14528_v32 = vld [vmem:[#allocation6 + $0x7b4] ss:$8 sps:$4 sm:$0xff]  }
 0x58c   :  { %10026 = vmatprep.subr.bf16.mxu0 %v14447_v49  ;;  %v14525_v49 = vld [vmem:[#allocation6 + $0x514] ss:$8 sps:$4 sm:$0xff]  }
 0x58d   :  { %10088 = vmatpush2.bf16.msra.mxu1 %v14448_v37  ;;  %v14523_v37 = vld [vmem:[#allocation6 + $0x510] ss:$8 sps:$4 sm:$0xff]  }
 0x58e   :  { %10089 = vmatprep.subr.bf16.mxu1 %v14456_v43  ;;  %v14531_v43 = vld [vmem:[#allocation6 + $0x504] ss:$8 sps:$4 sm:$0xff]  }
 0x58f   :  { %10027 = vmatpush1.bf16.msra.mxu0 %v14445_v40  ;;  %v14534_v40 = vld [vmem:[#allocation6 + $0x7a4] ss:$8 sps:$4 sm:$0xff]  }
 0x590   :  { %10028 = vmatprep.subr.bf16.mxu0 %v14453_v44  ;;  %v14532_v44 = vld [vmem:[#allocation6 + $0x7a0] ss:$8 sps:$4 sm:$0xff]  }
 0x591   :  { %10090 = vmatpush2.bf16.msra.mxu1 %v14454_v16  ;;  %v14529_v16 = vld [vmem:[#allocation6 + $0x500] ss:$8 sps:$4 sm:$0xff]  }
 0x592   :  { %10091 = vmatprep.subr.bf16.mxu1 %v14462_v48  ;;  %v14537_v48 = vld [vmem:[#allocation6 + $0x6b4] ss:$8 sps:$4 sm:$0xff]  }
 0x593   :  { %10029 = vmatpush1.bf16.msra.mxu0 %v14451_v21  ;;  %v14540_v21 = vld [vmem:[#allocation6 + $0x794] ss:$8 sps:$4 sm:$0xff]  }
 0x594   :  { %10030 = vmatprep.subr.bf16.mxu0 %v14459_v0  ;;  %v14538_v0 = vld [vmem:[#allocation6 + $0x790] ss:$8 sps:$4 sm:$0xff]  }
 0x595   :  { %10092 = vmatpush2.bf16.msra.mxu1 %v14460_v6  ;;  %v14535_v6 = vld [vmem:[#allocation6 + $0x6b0] ss:$8 sps:$4 sm:$0xff]  }
 0x596   :  { %10093 = vmatprep.subr.bf16.mxu1 %v14468_v33  ;;  %v14543_v33 = vld [vmem:[#allocation6 + $0x6a4] ss:$8 sps:$4 sm:$0xff]  }
 0x597   :  { %10031 = vmatpush1.bf16.msra.mxu0 %v14457_v25  ;;  %v14546_v25 = vld [vmem:[#allocation6 + $0x784] ss:$8 sps:$4 sm:$0xff]  }
 0x598   :  { %10032 = vmatprep.subr.bf16.mxu0 %v14465_v54  ;;  %v14544_v54 = vld [vmem:[#allocation6 + $0x780] ss:$8 sps:$4 sm:$0xff]  }
 0x599   :  { %10094 = vmatpush2.bf16.msra.mxu1 %v14466_v59  ;;  %v14541_v59 = vld [vmem:[#allocation6 + $0x6a0] ss:$8 sps:$4 sm:$0xff]  }
 0x59a   :  { %10095 = vmatprep.subr.bf16.mxu1 %v14474_v2  ;;  %v14549_v2 = vld [vmem:[#allocation6 + $0x694] ss:$8 sps:$4 sm:$0xff]  }
 0x59b   :  { %10033 = vmatpush1.bf16.msra.mxu0 %v14463_v7  ;;  %v14552_v7 = vld [vmem:[#allocation6 + $0x774] ss:$8 sps:$4 sm:$0xff]  }
 0x59c   :  { %10034 = vmatprep.subr.bf16.mxu0 %v14471_v5  ;;  %v14550_v5 = vld [vmem:[#allocation6 + $0x770] ss:$8 sps:$4 sm:$0xff]  }
 0x59d   :  { %10096 = vmatpush2.bf16.msra.mxu1 %v14472_v18  ;;  %v14547_v18 = vld [vmem:[#allocation6 + $0x690] ss:$8 sps:$4 sm:$0xff]  }
 0x59e   :  { %10580 = vmatprep.subr.bf16.mxu1 %v14480_v47  ;;  %v14555_v47 = vld [vmem:[#allocation6 + $0x684] ss:$8 sps:$4 sm:$0xff]  }
 0x59f   :  { %10035 = vmatpush1.bf16.msra.mxu0 %v14469_v19  ;;  %v14558_v19 = vld [vmem:[#allocation6 + $0x764] ss:$8 sps:$4 sm:$0xff]  }
 0x5a0   :  { %10036 = vmatprep.subr.bf16.mxu0 %v14477_v63  ;;  %10098 = vmatmul.mubr.bf16.vlgmr.msra.gmra.mxu1 %v15302_v52 }
 0x5a1   :  { %10581 = vmatpush1.bf16.msra.mxu1 %v14478_v38  ;;  %10612 = vmatprep.mubr.bf16.mxu1 %v15281_v45  ;;  %v14504_v45 = vld [vmem:[#allocation6 + $0x6f4] ss:$8 sps:$4 sm:$0xff]   ;;  %v14556_v38 = vld [vmem:[#allocation6 + $0x760] ss:$8 sps:$4 sm:$0xff]  }
 0x5a2   :  { %10582 = vmatprep.subr.bf16.mxu1 %v14486_v17 }
 0x5a3   :  { %10037 = vmatpush1.bf16.msra.mxu0 %v14475_v50  ;;  %v14553_v50 = vld [vmem:[#allocation6 + $0x680] ss:$8 sps:$4 sm:$0xff]  }
 0x5a4   :  { %10038 = vmatprep.subr.bf16.mxu0 %v14483_v42  ;;  %v14564_v42 = vld [vmem:[#allocation6 + $0x754] ss:$8 sps:$4 sm:$0xff]  }
 0x5a5   :  { %10583 = vmatpush1.bf16.msra.mxu1 %v14484_v58  ;;  %v14561_v58 = vld [vmem:[#allocation6 + $0x834] ss:$8 sps:$4 sm:$0xff]  }
 0x5a6   :  { %10584 = vmatprep.subr.bf16.mxu1 %v14492_v34  ;;  %v14562_v34 = vld [vmem:[#allocation6 + $0x750] ss:$8 sps:$4 sm:$0xff]  }
 0x5a7   :  { %10039 = vmatpush1.bf16.msra.mxu0 %v14481_v26 }
 0x5a8   :  { %10040 = vmatprep.subr.bf16.mxu0 %v14489_v29  ;;  %v14559_v29 = vld [vmem:[#allocation6 + $0x830] ss:$8 sps:$4 sm:$0xff]  }
 0x5a9   :  { %10585 = vmatpush1.bf16.msra.mxu1 %v14490_v20 }
 0x5aa   :  { %10586 = vmatprep.subr.bf16.mxu1 %v14498_v51  ;;  %v14570_v51 = vld [vmem:[#allocation6 + $0x744] ss:$8 sps:$4 sm:$0xff]  }
 0x5ab   :  { %10041 = vmatpush2.bf16.msra.mxu0 %v14487_v46  ;;  %v14567_v46 = vld [vmem:[#allocation6 + $0x824] ss:$8 sps:$4 sm:$0xff]  }
 0x5ac   :  { %10042 = vmatprep.subr.bf16.mxu0 %v14495_v4  ;;  %v14568_v4 = vld [vmem:[#allocation6 + $0x740] ss:$8 sps:$4 sm:$0xff]  }
 0x5ad   :  { %10587 = vmatpush1.bf16.msra.mxu1 %v14496_v30  ;;  %v14565_v30 = vld [vmem:[#allocation6 + $0x820] ss:$8 sps:$4 sm:$0xff]  }
 0x5ae   :  { %10588 = vmatprep.subr.bf16.mxu1 %v14504_v45  ;;  %v14573_v45 = vld [vmem:[#allocation6 + $0x814] ss:$8 sps:$4 sm:$0xff]  }
 0x5af   :  { %10043 = vmatpush2.bf16.msra.mxu0 %v14493_v55  ;;  %v14576_v55 = vld [vmem:[#allocation6 + $0x8f4] ss:$8 sps:$4 sm:$0xff]  }
 0x5b0   :  { %10044 = vmatprep.subr.bf16.mxu0 %v14501_v41  ;;  %v14574_v41 = vld [vmem:[#allocation6 + $0x8f0] ss:$8 sps:$4 sm:$0xff]  }
 0x5b1   :  { %10589 = vmatpush1.bf16.msra.mxu1 %v14502_v61  ;;  %v14571_v61 = vld [vmem:[#allocation6 + $0x810] ss:$8 sps:$4 sm:$0xff]  }
 0x5b2   :  { %10590 = vmatprep.subr.bf16.mxu1 %v14510_v57  ;;  %v14579_v57 = vld [vmem:[#allocation6 + $0x804] ss:$8 sps:$4 sm:$0xff]  }
 0x5b3   :  { %10045 = vmatpush2.bf16.msra.mxu0 %v14499_v53  ;;  %v14582_v53 = vld [vmem:[#allocation6 + $0x8e4] ss:$8 sps:$4 sm:$0xff]  }
 0x5b4   :  { %10046 = vmatprep.subr.bf16.mxu0 %v14507_v39  ;;  %v14580_v39 = vld [vmem:[#allocation6 + $0x8e0] ss:$8 sps:$4 sm:$0xff]  }
 0x5b5   :  { %10591 = vmatpush1.bf16.msra.mxu1 %v14508_v11  ;;  %v14588_v11 = vld [vmem:[#allocation6 + $0x8d4] ss:$8 sps:$4 sm:$0xff]  }
 0x5b6   :  { %10592 = vmatprep.subr.bf16.mxu1 %v14516_v24  ;;  %v14586_v24 = vld [vmem:[#allocation6 + $0x8d0] ss:$8 sps:$4 sm:$0xff]  }
 0x5b7   :  { %10047 = vmatpush2.bf16.msra.mxu0 %v14505_v56  ;;  %v14585_v56 = vld [vmem:[#allocation6 + $0x7f4] ss:$8 sps:$4 sm:$0xff]  }
 0x5b8   :  { %10048 = vmatprep.subr.bf16.mxu0 %v14513_v14  ;;  %v14583_v14 = vld [vmem:[#allocation6 + $0x7f0] ss:$8 sps:$4 sm:$0xff]  }
 0x5b9   :  { %10593 = vmatpush1.bf16.msra.mxu1 %v14514_v62  ;;  %v14594_v62 = vld [vmem:[#allocation6 + $0x8c4] ss:$8 sps:$4 sm:$0xff]  }
 0x5ba   :  { %10594 = vmatprep.subr.bf16.mxu1 %v14522_v1  ;;  %v14589_v1 = vld [vmem:[#allocation6 + $0x7e0] ss:$8 sps:$4 sm:$0xff]  }
 0x5bb   :  { %10049 = vmatpush2.bf16.msra.mxu0 %v14511_v3  ;;  %v14591_v3 = vld [vmem:[#allocation6 + $0x7e4] ss:$8 sps:$4 sm:$0xff]  }
 0x5bc   :  { %10050 = vmatprep.subr.bf16.mxu0 %v14519_v36  ;;  %v14595_v36 = vld [vmem:[#allocation6 + $0x7d0] ss:$8 sps:$4 sm:$0xff]  }
 0x5bd   :  { %10595 = vmatpush1.bf16.msra.mxu1 %v14520_v27  ;;  %v14600_v27 = vld [vmem:[#allocation6 + $0x7c4] ss:$8 sps:$4 sm:$0xff]  }
 0x5be   :  { %10596 = vmatprep.subr.bf16.mxu1 %v14528_v32  ;;  %v14603_v32 = vld [vmem:[#allocation6 + $0x8b4] ss:$8 sps:$4 sm:$0xff]  }
 0x5bf   :  { %10051 = vmatpush2.bf16.msra.mxu0 %v14517_v9  ;;  %v14598_v9 = vld [vmem:[#allocation6 + $0x7c0] ss:$8 sps:$4 sm:$0xff]  }
 0x5c0   :  { %10052 = vmatprep.subr.bf16.mxu0 %v14525_v49  ;;  %v14601_v49 = vld [vmem:[#allocation6 + $0x8b0] ss:$8 sps:$4 sm:$0xff]  }
 0x5c1   :  { %10597 = vmatpush2.bf16.msra.mxu1 %v14526_v35  ;;  %v14606_v35 = vld [vmem:[#allocation6 + $0x8a4] ss:$8 sps:$4 sm:$0xff]  }
 0x5c2   :  { %10598 = vmatprep.subr.bf16.mxu1 %v14534_v40  ;;  %v14609_v40 = vld [vmem:[#allocation6 + $0x894] ss:$8 sps:$4 sm:$0xff]  }
 0x5c3   :  { %10053 = vmatpush2.bf16.msra.mxu0 %v14523_v37  ;;  %v14604_v37 = vld [vmem:[#allocation6 + $0x8a0] ss:$8 sps:$4 sm:$0xff]  }
 0x5c4   :  { %10054 = vmatprep.subr.bf16.mxu0 %v14531_v43  ;;  %v14607_v43 = vld [vmem:[#allocation6 + $0x890] ss:$8 sps:$4 sm:$0xff]  }
 0x5c5   :  { %10599 = vmatpush2.bf16.msra.mxu1 %v14532_v44  ;;  %v14612_v44 = vld [vmem:[#allocation6 + $0x884] ss:$8 sps:$4 sm:$0xff]  }
 0x5c6   :  { %10600 = vmatprep.subr.bf16.mxu1 %v14540_v21  ;;  %v14613_v21 = vld [vmem:[#allocation6 + $0x870] ss:$8 sps:$4 sm:$0xff]  }
 0x5c7   :  { %10055 = vmatpush2.bf16.msra.mxu0 %v14529_v16  ;;  %v14615_v16 = vld [vmem:[#allocation6 + $0x874] ss:$8 sps:$4 sm:$0xff]  }
 0x5c8   :  { %10114 = vmatprep.subr.bf16.mxu0 %v14537_v48  ;;  %v14618_v48 = vld [vmem:[#allocation6 + $0x864] ss:$8 sps:$4 sm:$0xff]  }
 0x5c9   :  { %10601 = vmatpush2.bf16.msra.mxu1 %v14538_v0 }
 0x5ca   :  { %10057 = vmatmul.mubr.bf16.vlgmr.msra.gmra.mxu0 %v15283_v15  ;;  %10602 = vmatprep.subr.bf16.mxu1 %v14546_v25 }
 0x5cb   :  { %10115 = vmatpush1.bf16.msra.mxu0 %v14535_v6  ;;  %10138 = vmatprep.mubr.bf16.mxu0 %v14886_v13 }
 0x5cc   :  { %10116 = vmatprep.subr.bf16.mxu0 %v14543_v33 }
 0x5cd   :  { %10603 = vmatpush2.bf16.msra.mxu1 %v14544_v54  ;;  %v14616_v54 = vld [vmem:[#allocation6 + $0x860] ss:$8 sps:$4 sm:$0xff]  }
 0x5ce   :  { %10604 = vmatprep.subr.bf16.mxu1 %v14552_v7  ;;  %v14621_v7 = vld [vmem:[#allocation6 + $0x854] ss:$8 sps:$4 sm:$0xff]  }
 0x5cf   :  { %10117 = vmatpush1.bf16.msra.mxu0 %v14541_v59 }
 0x5d0   :  { %10118 = vmatprep.subr.bf16.mxu0 %v14549_v2  ;;  %v15333_v63 = vpop.f32.mrf.mxu1 }
 0x5d1   :  { %10605 = vmatpush2.bf16.msra.mxu1 %v14550_v5  ;;  %v8988_v0 = vadd.f32 %v15333_v63, %v15323_v10 }
 0x5d2   :  { %v15335_v17 = vpop.f32.mrf.mxu1  ;;  %10606 = vmatprep.subr.bf16.mxu1 %v14558_v19 }
 0x5d3   :  { %10119 = vmatpush1.bf16.msra.mxu0 %v14547_v18  ;;  %v8990_v25 = vadd.f32 %v15335_v17, %v15325_v31  ;;  %v14619_v18 = vld [vmem:[#allocation6 + $0x850] ss:$8 sps:$4 sm:$0xff]  }
 0x5d4   :  { %10120 = vmatprep.subr.bf16.mxu0 %v14555_v47  ;;  %v8991_v26 = vpop.f32.mrf.mxu1  ;;  %v14624_v47 = vld [vmem:[#allocation6 + $0x844] ss:$8 sps:$4 sm:$0xff]  }
 0x5d5   :  { %10607 = vmatpush2.bf16.msra.mxu1 %v14556_v38  ;;  %v14622_v38 = vld [vmem:[#allocation6 + $0x840] ss:$8 sps:$4 sm:$0xff]  }
 0x5d6   :  { %v8992_v20 = vpop.f32.mrf.mxu1  ;;  %10608 = vmatprep.subr.bf16.mxu1 %v14564_v42 }
 0x5d7   :  { %10121 = vmatpush1.bf16.msra.mxu0 %v14553_v50  ;;  %v14627_v20 = vld [vmem:[#allocation9 + $0x70] sm:$0xff]  }
 0x5d8   :  { %10621 = vmatprep.subr.bf16.mxu0 %v14561_v58 }
 0x5d9   :  { %10609 = vmatpush2.bf16.msra.mxu1 %v14562_v34  ;;  %v14625_v34 = vld [vmem:[#allocation9 + $0x78] sm:$0xff]  }
 0x5da   :  { %12325 = vmatmul.mubr.msk.bf16.vlgmr.msra.gmra.mxu0 %vm8908_vm2, %v15313_v23  ;;  %10610 = vmatprep.subr.bf16.mxu1 %v14570_v51  ;;  %v14629_v51 = vld [vmem:[#allocation9 + $0x68] sm:$0xff]  }
 0x5db   :  { %10622 = vmatpush1.bf16.msra.mxu0 %v14559_v29  ;;  %10653 = vmatprep.mubr.bf16.mxu0 %v15300_v22  ;;  %v14577_v22 = vld [vmem:[#allocation6 + $0x800] ss:$8 sps:$4 sm:$0xff]  }
 0x5dc   :  { %10623 = vmatprep.subr.bf16.mxu0 %v14567_v46  ;;  %v14626_v29 = vld [vmem:[#allocation9 + $0x38] sm:$0xff]   ;;  %v14628_v46 = vld [vmem:[#allocation9 + $0x30] sm:$0xff]  }
 0x5dd   :  { %10611 = vmatpush2.bf16.msra.mxu1 %v14568_v4  ;;  %v14630_v4 = vld [vmem:[#allocation9 + $0x28] sm:$0xff]  }
 0x5de   :  { %10670 = vmatprep.subr.bf16.mxu1 %v14576_v55  ;;  %v14632_v55 = vld [vmem:[#allocation9 + $0x20] sm:$0xff]  }
 0x5df   :  { %10624 = vmatpush1.bf16.msra.mxu0 %v14565_v30  ;;  %v14631_v30 = vld [vmem:[#allocation9 + $0x60] sm:$0xff]  }
 0x5e0   :  { %10625 = vmatprep.subr.bf16.mxu0 %v14573_v45  ;;  %10613 = vmatmul.mubr.bf16.vlgmr.msra.gmra.mxu1 %v15283_v15  ;;  %v14592_v15 = vld [vmem:[#allocation6 + $0x8c0] ss:$8 sps:$4 sm:$0xff]  }
 0x5e1   :  { %10671 = vmatpush1.bf16.msra.mxu1 %v14574_v41  ;;  %10694 = vmatprep.mubr.bf16.mxu1 %v14886_v13  ;;  %v14597_v13 = vld [vmem:[#allocation6 + $0x7d4] ss:$8 sps:$4 sm:$0xff]  }
 0x5e2   :  { %10672 = vmatprep.subr.bf16.mxu1 %v14582_v53 }
 0x5e3   :  { %10626 = vmatpush1.bf16.msra.mxu0 %v14571_v61 }
 0x5e4   :  { %10627 = vmatprep.subr.bf16.mxu0 %v14579_v57 }
 0x5e5   :  { %10673 = vmatpush1.bf16.msra.mxu1 %v14580_v39 }
 0x5e6   :  { %10674 = vmatprep.subr.bf16.mxu1 %v14588_v11 }
 0x5e7   :  { %10628 = vmatpush1.bf16.msra.mxu0 %v14577_v22 }
 0x5e8   :  { %10629 = vmatprep.subr.bf16.mxu0 %v14585_v56 }
 0x5e9   :  { %10675 = vmatpush1.bf16.msra.mxu1 %v14586_v24  ;;  %v14633_v24 = vld [vmem:[#allocation9 + $0x58] sm:$0xff]  }
 0x5ea   :  { %10676 = vmatprep.subr.bf16.mxu1 %v14594_v62  ;;  %v14635_v62 = vld [vmem:[#allocation9 + $0x50] sm:$0xff]  }
 0x5eb   :  { %10630 = vmatpush1.bf16.msra.mxu0 %v14583_v14  ;;  %v14634_v14 = vld [vmem:[#allocation9 + $0x18] sm:$0xff]  }
 0x5ec   :  { %10631 = vmatprep.subr.bf16.mxu0 %v14591_v3  ;;  %v14636_v3 = vld [vmem:[#allocation9 + $0x10] sm:$0xff]  }
 0x5ed   :  { %10677 = vmatpush1.bf16.msra.mxu1 %v14592_v15  ;;  %v14637_v15 = vld [vmem:[#allocation9 + $0x48] sm:$0xff]  }
 0x5ee   :  { %12763 = vmatprep.subr.bf16.mxu1 %v14887_v12 }
 0x5ef   :  { %10632 = vmatpush1.bf16.msra.mxu0 %v14589_v1 }
 0x5f0   :  { %10633 = vmatprep.subr.bf16.mxu0 %v14597_v13  ;;  %12398 = vmatmul.mubr.msk.bf16.vlgmr.msra.gmra.mxu1 %vm8908_vm2, %v15313_v23  ;;  %v14610_v23 = vld [vmem:[#allocation6 + $0x880] ss:$8 sps:$4 sm:$0xff]  }
 0x5f1   :  { %12779 = vmatprep.mubr.msk.bf16.mxu1 %vm14888_vm1, %v14887_v12  ;;  %v14638_v13 = vld [vmem:[#allocation9 + $0x8] sm:$0xff]  }
 0x5f3   :  { %10634 = vmatpush1.bf16.msra.mxu0 %v14595_v36  ;;  %v14639_v36 = vld [vmem:[#allocation9 + $0x40] sm:$0xff]  }
 0x5f4   :  { %10635 = vmatprep.subr.bf16.mxu0 %v14600_v27 }
 0x5f7   :  { %10636 = vmatpush1.bf16.msra.mxu0 %v14598_v9  ;;  %v14640_v9 = vld [vmem:[#allocation9] sm:$0xff]  }
 0x5f8   :  { %10637 = vmatprep.subr.bf16.mxu0 %v14603_v32 }
 0x5fb   :  { %10638 = vmatpush2.bf16.msra.mxu0 %v14601_v49 }
 0x5fc   :  { %10639 = vmatprep.subr.bf16.mxu0 %v14606_v35  ;;  %v14641_v35 = vld [vmem:[#allocation12 + $0x38] sm:$0xff]  }
 0x5fd   :  { %12764 = vmatpush3.bf16.msra.mxu1 %v14641_v35 }
 0x5fe   :  { %12765 = vmatprep.subr.bf16.mxu1 %v14887_v12 }
 0x5ff   :  { %10640 = vmatpush2.bf16.msra.mxu0 %v14604_v37  ;;  %v14642_v37 = vld [vmem:[#allocation12 + $0x30] sm:$0xff]  }
 0x600   :  { %10641 = vmatprep.subr.bf16.mxu0 %v14609_v40  ;;  %v14643_v40 = vld [vmem:[#allocation12 + $0x28] sm:$0xff]  }
 0x601   :  { %12766 = vmatpush3.bf16.msra.mxu1 %v14642_v37 }
 0x602   :  { %12767 = vmatprep.subr.bf16.mxu1 %v14887_v12 }
 0x603   :  { %10642 = vmatpush2.bf16.msra.mxu0 %v14607_v43  ;;  %v14644_v43 = vld [vmem:[#allocation12 + $0x20] sm:$0xff]  }
 0x604   :  { %10643 = vmatprep.subr.bf16.mxu0 %v14612_v44  ;;  %v14645_v44 = vld [vmem:[#allocation12 + $0x18] sm:$0xff]  }
 0x605   :  { %12768 = vmatpush3.bf16.msra.mxu1 %v14643_v40 }
 0x606   :  { %12769 = vmatprep.subr.bf16.mxu1 %v14887_v12 }
 0x607   :  { %10644 = vmatpush2.bf16.msra.mxu0 %v14610_v23 }
 0x608   :  { %10645 = vmatprep.subr.bf16.mxu0 %v14615_v16 }
 0x609   :  { %12770 = vmatpush3.bf16.msra.mxu1 %v14644_v43 }
 0x60a   :  { %v9028_v6 = vpop.f32.mrf.mxu0  ;;  %12771 = vmatprep.subr.bf16.mxu1 %v14887_v12 }
 0x60b   :  { %v15351_v33 = vadd.f32 %v9028_v6, %v8988_v0  ;;  %10646 = vmatpush2.bf16.msra.mxu0 %v14613_v21 }
 0x60c   :  { %v9030_v59 = vpop.f32.mrf.mxu0  ;;  %10647 = vmatprep.subr.bf16.mxu0 %v14618_v48 }
 0x60d   :  { %v15353_v2 = vadd.f32 %v9030_v59, %v8990_v25  ;;  %12772 = vmatpush3.bf16.msra.mxu1 %v14645_v44 }
 0x60e   :  { %v9032_v5 = vpop.f32.mrf.mxu0  ;;  %12773 = vmatprep.subr.bf16.mxu1 %v14887_v12 }
 0x60f   :  { %10648 = vmatpush2.bf16.msra.mxu0 %v14616_v54 }
 0x610   :  { %v9033_v19 = vpop.f32.mrf.mxu0  ;;  %10649 = vmatprep.subr.bf16.mxu0 %v14621_v7  ;;  %v9502_v10 = vpop.f32.mrf.mxu1 }
 0x612   :  { %v9504_v63 = vpop.f32.mrf.mxu1 }
 0x613   :  { %10650 = vmatpush2.bf16.msra.mxu0 %v14619_v18 }
 0x614   :  { %10651 = vmatprep.subr.bf16.mxu0 %v14624_v47  ;;  %v9506_v31 = vpop.f32.mrf.mxu1 }
 0x616   :  { %v9507_v50 = vpop.f32.mrf.mxu1 }
 0x617   :  { %10652 = vmatpush2.bf16.msra.mxu0 %v14622_v38 }
 0x618   :  { %12703 = vmatprep.subr.bf16.mxu0 %v14625_v34 }
 0x61a   :  { %10654 = vmatmul.mubr.bf16.vlgmr.msra.gmra.mxu0 %v15302_v52 }
 0x61b   :  { %12704 = vmatpush3.bf16.msra.mxu0 %v14626_v29 }
 0x61c   :  { %12705 = vmatprep.subr.bf16.mxu0 %v14627_v20  ;;  %v10709_v20 = vld [vmem:[#allocation7] sm:$0x3] }
 0x61f   :  { %12706 = vmatpush3.bf16.msra.mxu0 %v14628_v46 }
 0x620   :  { %v9584_v17 = vpop.f32.mrf.mxu1  ;;  %12707 = vmatprep.subr.bf16.mxu0 %v14629_v51 }
 0x622   :  { %v9586_v42 = vpop.f32.mrf.mxu1 }
 0x623   :  { %12708 = vmatpush3.bf16.msra.mxu0 %v14630_v4 }
 0x624   :  { %v9588_v58 = vpop.f32.mrf.mxu1  ;;  %12709 = vmatprep.subr.bf16.mxu0 %v14631_v30 }
 0x626   :  { %v9589_v26 = vpop.f32.mrf.mxu1 }
 0x627   :  { %12710 = vmatpush3.bf16.msra.mxu0 %v14632_v55  ;;  %v10714_v55 = vrot.slane %v10709_v20, %v8443_v8  ;;  %v14646_v8 = vld [vmem:[#allocation12 + $0x10] sm:$0xff]  }
 0x628   :  { %12711 = vmatprep.subr.bf16.mxu0 %v14633_v24  ;;  %12774 = vmatpush3.bf16.msra.mxu1 %v14646_v8 }
 0x629   :  { %12775 = vmatprep.subr.bf16.mxu1 %v14887_v12 }
 0x62b   :  { %12712 = vmatpush3.bf16.msra.mxu0 %v14634_v14 }
 0x62c   :  { %12713 = vmatprep.subr.bf16.mxu0 %v14635_v62 }
 0x62f   :  { %12714 = vmatpush3.bf16.msra.mxu0 %v14636_v3 }
 0x630   :  { %12715 = vmatprep.subr.bf16.mxu0 %v14637_v15 }
 0x633   :  { %12716 = vmatpush3.bf16.msra.mxu0 %v14638_v13 }
 0x634   :  { %12717 = vmatprep.subr.bf16.mxu0 %v14639_v36  ;;  %v14651_v36 = vld [vmem:[#allocation15 + $0x8] sm:$0xff]  }
 0x637   :  { %12718 = vmatpush3.bf16.msra.mxu0 %v14640_v9  ;;  %v12416_v9 = vld [vmem:[#allocation13] ss:$0 sm:$0xff] }
 0x638   :  { %12783 = vmatprep.subr.bf16.mxu0 %v14887_v12 }
 0x64a   :  { %v9543_v52 = vpop.f32.mrf.mxu0 }
 0x64b   :  { %v9544_v45 = vadd.f32 %v9543_v52, %v9502_v10 }
 0x64c   :  { %v9545_v41 = vpop.f32.mrf.mxu0 }
 0x64d   :  { %v15356_v61 = vadd.f32 %v9584_v17, %v9544_v45  ;;  %v9546_v53 = vadd.f32 %v9545_v41, %v9504_v63  ;;  %v10718_v41 = vrot.slane %v10709_v20, %v8447_v28  ;;  %v14649_v28 = vld [vmem:[#allocation15 + $0x18] sm:$0xff]  }
 0x64e   :  { %v9547_v57 = vpop.f32.mrf.mxu0 }
 0x64f   :  { %v10703_v39 = vmax.f32 %v15351_v33, %v15356_v61  ;;  %v15360_v22 = vadd.f32 %v9586_v42, %v9546_v53  ;;  %v14647_v33 = vld [vmem:[#allocation12 + $0x8] sm:$0xff]  }
 0x650   :  { %v9548_v11 = vpop.f32.mrf.mxu0  ;;  %12776 = vmatpush3.bf16.msra.mxu1 %v14647_v33 }
 0x651   :  { %v10704_v56 = vmax.f32 %v15353_v2, %v15360_v22  ;;  %12777 = vmatprep.subr.bf16.mxu1 %v14887_v12  ;;  %v14650_v2 = vld [vmem:[#allocation15 + $0x10] sm:$0xff]  }
 0x654   :  { %12778 = vmatpush3.bf16.msra.mxu1 %v14648_v60 }
 0x660   :  { %v10099_v1 = vpop.f32.mrf.mxu1 }
 0x662   :  { %v10101_v27 = vpop.f32.mrf.mxu1 }
 0x664   :  { %v10103_v32 = vpop.f32.mrf.mxu1 }
 0x666   :  { %v10104_v49 = vpop.f32.mrf.mxu1 }
 0x68a   :  { %v10058_v23 = vpop.f32.mrf.mxu0 }
 0x68b   :  { %v10100_v16 = vadd.f32 %v10099_v1, %v10058_v23  ;;  %v12425_v23 = vld [vmem:[#allocation16] ss:$0 sm:$0xff] }
 0x68c   :  { %v10060_v21 = vpop.f32.mrf.mxu0 }
 0x68d   :  { %v10102_v48 = vadd.f32 %v10101_v27, %v10060_v21  ;;  %v14652_v27 = vld [vmem:[#allocation15] sm:$0xff]  }
 0x68e   :  { %v10062_v0 = vpop.f32.mrf.mxu0 }
 0x690   :  { %v10063_v6 = vpop.f32.mrf.mxu0 }
 0x69a   :  { %v10140_v25 = vpop.f32.mrf.mxu0 }
 0x69b   :  { %v10141_v54 = vadd.f32 %v10140_v25, %v10100_v16 }
 0x69c   :  { %v10142_v59 = vpop.f32.mrf.mxu0 }
 0x69d   :  { %v10143_v7 = vadd.f32 %v10142_v59, %v10102_v48 }
 0x69e   :  { %v10144_v5 = vpop.f32.mrf.mxu0 }
 0x6a0   :  { %v10145_v18 = vpop.f32.mrf.mxu0  ;;  %v10614_v19 = vpop.f32.mrf.mxu1 }
 0x6a2   :  { %v10616_v47 = vpop.f32.mrf.mxu1 }
 0x6a4   :  { %v10618_v10 = vpop.f32.mrf.mxu1 }
 0x6a6   :  { %v10619_v63 = vpop.f32.mrf.mxu1 }
 0x6b0   :  { %v10696_v38 = vpop.f32.mrf.mxu1 }
 0x6b2   :  { %v10698_v31 = vpop.f32.mrf.mxu1 }
 0x6b4   :  { %v10700_v50 = vpop.f32.mrf.mxu1 }
 0x6b6   :  { %v10701_v17 = vpop.f32.mrf.mxu1 }
 0x6da   :  { %v10655_v42 = vpop.f32.mrf.mxu0 }
 0x6db   :  { %v10656_v58 = vadd.f32 %v10655_v42, %v10614_v19 }
 0x6dc   :  { %v10657_v26 = vpop.f32.mrf.mxu0 }
 0x6dd   :  { %v10697_v34 = vadd.f32 %v10696_v38, %v10656_v58  ;;  %v10658_v29 = vadd.f32 %v10657_v26, %v10616_v47 }
 0x6de   :  { %v10659_v46 = vpop.f32.mrf.mxu0 }
 0x6df   :  { %v10705_v51 = vmax.f32 %v10141_v54, %v10697_v34  ;;  %v10699_v4 = vadd.f32 %v10698_v31, %v10658_v29 }
 0x6e0   :  { %v10660_v30 = vpop.f32.mrf.mxu0 }
 0x6e1   :  { %v10707_v52 = vmax.f32 %v10703_v39, %v10705_v51  ;;  %v10706_v45 = vmax.f32 %v10143_v7, %v10699_v4  ;;  %v12399_v39 = vld [vmem:[#allocation10] ss:$0 sm:$0xff] }
 0x6e3   :  { %v10708_v53 = vmax.f32 %v10704_v56, %v10706_v45  ;;  %v10721_v57 = vadd.f32 %v10714_v55, %v10707_v52 }
 0x6e5   :  { %v10722_v11 = vadd.f32 %v10718_v41, %v10708_v53  ;;  %v10723_v14 = vpack.c.bf16 %v10721_v57, %v10721_v57 }
 0x6e7   :  { %v10724_v24 = vpack.c.bf16 %v10722_v11, %v10722_v11 }
 0x6e9   :  { %10892 = vmatprep.mubr.bf16.mxu0 %v10724_v24 }
 0x6ea   :  { %10893 = vmatmul.mubr.bf16.vlgmr.msra.gmra.mxu0 %v10723_v14 }
 0x6eb   :  { %12791 = vmatprep.mubr.msk.bf16.mxu0 %vm14888_vm1, %v14887_v12  ;;  %12784 = vmatpush3.bf16.msra.mxu0 %v14649_v28 }
 0x6ec   :  { %12785 = vmatprep.subr.bf16.mxu0 %v14887_v12 }
 0x6ef   :  { %12786 = vmatpush3.bf16.msra.mxu0 %v14650_v2 }
 0x6f0   :  { %12787 = vmatprep.subr.bf16.mxu0 %v14887_v12 }
 0x6f3   :  { %12788 = vmatpush3.bf16.msra.mxu0 %v14651_v36 }
 0x6f4   :  { %12789 = vmatprep.subr.bf16.mxu0 %v14887_v12 }
 0x6f7   :  { %12790 = vmatpush3.bf16.msra.mxu0 %v14652_v27 }
 0x7aa   :  { %v12719_v61 = vpop.f32.mrf.mxu0 }
 0x7ac   :  { %v12720_v22 = vpop.f32.mrf.mxu0 }
 0x7ad   :  { %v12721_v56 = vadd.f32 %v12720_v22, %v12719_v61 }
 0x7ae   :  { %v12722_v62 = vpop.f32.mrf.mxu0 }
 0x7af   :  { %v10895_v3 = vadd.f32 %v12721_v56, %v12399_v39 }
 0x7b0   :  { %v12723_v15 = vpop.f32.mrf.mxu0 }
 0x7b1   :  { %v10900_v1 = vmax.f32 %v10895_v3, 0.0 }
 0x7b3   :  { %v10901_v13 = vpack.c.bf16 %v10900_v1, %v10900_v1 }
 0x7b5   :  { %12780 = vmatmul.mubr.bf16.vlgmr.msra.gmra.mxu1 %v10901_v13 }
 0x875   :  { %v11007_v32 = vpop.f32.mrf.mxu1 }
 0x876   :  { %v11008_v49 = vadd.f32 %v12416_v9, %v11007_v32 }
 0x877   :  { %v12781_v35 = vpop.f32.mrf.mxu1 }
 0x878   :  { %v11013_v37 = vmax.f32 %v11008_v49, 0.0 }
 0x879   :  { %v11010_v40 = vpop.f32.mrf.mxu1 }
 0x87a   :  { %v11014_v43 = vpack.c.bf16 %v11013_v37, %v11013_v37 }
 0x87b   :  { %v12782_v44 = vpop.f32.mrf.mxu1 }
 0x87c   :  { %12792 = vmatmul.mubr.msk.bf16.vlgmr.msra.gmra.mxu0 %vm8908_vm2, %v11014_v43 }
 0x93c   :  { %v11091_v16 = vpop.f32.mrf.mxu0 }
 0x93d   :  { %v11092_v21 = vadd.f32 %v12425_v23, %v11091_v16 }
 0x93e   :  { %v12793_v48 = vpop.f32.mrf.mxu0 }
 0x93f   :  { %11097 = vst [vmem:[%s15402_s11] sm:$0xff] %v11092_v21 }
 0x940   :  { %v11094_v12 = vpop.f32.mrf.mxu0 }
 0x942   :  { %v12794_v0 = vpop.f32.mrf.mxu0 }
 0x943   :  { %11102 = vsyncpa [#allocation3], 1 }
 0x944   :  { %11103 = vsyncpa [#allocation5], 1 }
 0x945   :  { %11104 = vsyncpa [#allocation8], 1 }
 0x946   :  { %11105 = vsyncpa [#allocation11], 1 }
 0x947   :  { %11106 = vsyncpa [#allocation14], 1 }
 0x948   :  { %11107 = vsyncpa [#allocation17], 1 }

</bundles_post_ra>
